<compile_context>
chip_gen: v7x
topology: tpu7x:2x2x1
jax: 0.10.0
libtpu: 0.0.40
codegen_flags: <defaults>
</compile_context>

<pallas_src>
import functools

import jax
import jax.numpy as jnp
from jax.experimental import pallas as pl
from jax.experimental.pallas import tpu as pltpu


def _round_up(x, m):
    return (x + m - 1) // m * m


# ----------------------------------------------------------------------------
# Fused Pallas kernel: all GraphConv layers + ReLU + BN + max readout + concat
# ----------------------------------------------------------------------------
def _fused_gcn_kernel(adj_ref, x_ref, w_ref, b_ref, out_ref, *,
                      num_layers, n_valid, inv_bd):
    B, Np, Dp = x_ref.shape
    adj = adj_ref[...]                              # (B, Np, Np) bf16 (MXU)
    x = x_ref[...]                                  # (B, Np, Dp) bf16 (MXU)

    # Node-validity mask, (1, Np, 1): padded node rows excluded from readout.
    node_mask = jax.lax.broadcasted_iota(jnp.int32, (1, Np, 1), 1) < n_valid

    # L is small (3): keep the unrolled Python loop (per review). Switch to a
    # fori_loop / layer grid axis with dynamic w_ref[l] only if L grows.
    for l in range(num_layers):
        w = w_ref[l]                                # (Dp, Dp) bf16
        b = b_ref[l]                                # (1, Dp)  f32

        # y = adj @ x : bf16 operands, f32 MXU accumulation.
        y = jnp.einsum("bij,bjd->bid", adj, x,
                       preferred_element_type=jnp.float32)
        # y = y @ W : batched to (B*Np, Dp) rows for full MXU M occupancy.
        y = jnp.dot(y.reshape(B * Np, Dp).astype(jnp.bfloat16), w,
                    preferred_element_type=jnp.float32).reshape(B, Np, Dp)
        y = y + b                                   # bias (zeros in padded cols)

        # F.normalize(y, p=2, dim=2): y / max(||y||_2, 1e-12). Padded feature
        # columns are exactly 0 here, so ssq equals the true (unpadded) norm.
        ssq = jnp.sum(y * y, axis=-1, keepdims=True)
        y = y * jax.lax.rsqrt(jnp.maximum(ssq, 1e-24))

        if l < num_layers - 1:
            # ReLU then training-mode BatchNorm1d(N): per node-channel stats
            # over (batch, feature), biased var, eps=1e-5, gamma=1, beta=0.
            # One-pass stats: padded feature cols contribute exactly 0 to both
            # sums, so no feature mask is required.
            y = jnp.maximum(y, 0.0)
            mean = jnp.sum(y, axis=(0, 2), keepdims=True) * inv_bd
            e2 = jnp.sum(y * y, axis=(0, 2), keepdims=True) * inv_bd
            var = e2 - mean * mean
            y = (y - mean) * jax.lax.rsqrt(var + 1e-5)

        # max-over-nodes readout, packed lane-dense into the output slab.
        out_ref[:, l * Dp:(l + 1) * Dp] = jnp.max(
            jnp.where(node_mask, y, -1e30), axis=1)

        x = y.astype(jnp.bfloat16)                  # next layer's MXU operand


def fused_gcn_forward(adj_p, x_p, w_all, b_all, *, num_layers, n_valid,
                      d_true, hidden_dim):
    B, Np, Dp = x_p.shape
    kernel = functools.partial(
        _fused_gcn_kernel, num_layers=num_layers, n_valid=n_valid,
        inv_bd=1.0 / float(B * d_true))

    # Explicit scoped-VMEM limit sized from the real (double-buffered) operand
    # bytes plus f32 temporaries / headroom (v5e default is only 16 MiB).
    in_bytes = sum(int(a.size) * a.dtype.itemsize
                   for a in (adj_p, x_p, w_all, b_all))
    out_bytes = B * num_layers * Dp * 4
    vmem_limit = int(min(max(2 * (in_bytes + out_bytes) + (16 << 20), 32 << 20),
                         112 << 20))

    out = pl.pallas_call(
        kernel,
        out_shape=jax.ShapeDtypeStruct((B, num_layers * Dp), jnp.float32),
        grid=(1,),
        in_specs=[
            pl.BlockSpec((B, Np, Np), lambda i: (0, 0, 0)),
            pl.BlockSpec((B, Np, Dp), lambda i: (0, 0, 0)),
            pl.BlockSpec((num_layers, Dp, Dp), lambda i: (0, 0, 0)),
            pl.BlockSpec((num_layers, 1, Dp), lambda i: (0, 0, 0)),
        ],
        out_specs=pl.BlockSpec((B, num_layers * Dp), lambda i: (0, 0)),
        compiler_params=pltpu.CompilerParams(
            dimension_semantics=("arbitrary",),
            vmem_limit_bytes=vmem_limit),
    )(adj_p, x_p, w_all, b_all)

    # Unpack the lane-dense slab -> concat(out_all, dim=1) ordering.
    return out.reshape(B, num_layers, Dp)[:, :, :hidden_dim].reshape(
        B, num_layers * hidden_dim)


# ----------------------------------------------------------------------------
# Parameter construction (deterministic, mirrors GcnEncoderGraph.__init__)
# ----------------------------------------------------------------------------
def xavier_uniform(key, fan_in, fan_out, gain):
    bound = gain * jnp.sqrt(6.0 / (fan_in + fan_out))
    return jax.random.uniform(key, (fan_in, fan_out), jnp.float32, -bound, bound)


def init_params(key, input_dim, hidden_dim, num_layers):
    gain = float(jnp.sqrt(2.0))  # nn.init.calculate_gain('relu')
    keys = jax.random.split(key, num_layers)
    ws = [xavier_uniform(keys[0], input_dim, hidden_dim, gain)]
    for i in range(num_layers - 2):
        ws.append(xavier_uniform(keys[1 + i], hidden_dim, hidden_dim, gain))
    ws.append(xavier_uniform(keys[-1], hidden_dim, hidden_dim, gain))
    bs = [jnp.zeros((hidden_dim,), jnp.float32) for _ in range(num_layers)]
    return ws, bs


# ----------------------------------------------------------------------------
# One-time host-side padding / packing into the lane-dense bf16 kernel layout
# (kept OUT of the per-step jit so the adj-sized pad copy is paid once).
# ----------------------------------------------------------------------------
def prepare_inputs(ws, bs, x, adj):
    B, N, Din = x.shape
    hidden_dim = ws[-1].shape[1]
    L = len(ws)
    Dp = _round_up(max(Din, hidden_dim), 128)   # lane-dense feature dim
    Np = _round_up(N, 128)                      # lane-dense node dim (adj lanes
                                                # and the adj@x contraction K)
    x_p = jnp.zeros((B, Np, Dp), jnp.bfloat16).at[:, :N, :Din].set(
        x.astype(jnp.bfloat16))
    adj_p = jnp.zeros((B, Np, Np), jnp.bfloat16).at[:, :N, :N].set(
        adj.astype(jnp.bfloat16))
    w_all = jnp.stack([
        jnp.zeros((Dp, Dp), jnp.float32).at[:w.shape[0], :w.shape[1]].set(w)
        for w in ws]).astype(jnp.bfloat16)                   # (L, Dp, Dp) bf16
    b_all = jnp.stack([
        jnp.zeros((1, Dp), jnp.float32).at[0, :b.shape[0]].set(b)
        for b in bs])                                        # (L, 1, Dp) f32
    static = dict(num_layers=L, n_valid=N, d_true=hidden_dim,
                  hidden_dim=hidden_dim)
    return adj_p, x_p, w_all, b_all, static


# ----------------------------------------------------------------------------
# Pure-JAX references (for correctness checks)
# ----------------------------------------------------------------------------
def reference_forward_f32(ws, bs, x, adj):
    """Pure f32 reference of the PyTorch forward (semantic ground truth)."""
    outs = []
    L = len(ws)
    for l in range(L):
        y = jnp.einsum("bij,bjd->bid", adj, x) @ ws[l] + bs[l]
        norm = jnp.sqrt(jnp.sum(y * y, axis=-1, keepdims=True))
        y = y / jnp.maximum(norm, 1e-12)
        if l < L - 1:
            y = jnp.maximum(y, 0.0)
            mean = jnp.mean(y, axis=(0, 2), keepdims=True)
            var = jnp.mean((y - mean) ** 2, axis=(0, 2), keepdims=True)
            y = (y - mean) / jnp.sqrt(var + 1e-5)
        outs.append(jnp.max(y, axis=1))
        x = y
    return jnp.concatenate(outs, axis=1)


def reference_forward_bf16(ws, bs, x, adj):
    """Reference matching the kernel's mixed precision (bf16 MXU operands,
    f32 accumulation / elementwise)."""
    outs = []
    L = len(ws)
    x = x.astype(jnp.bfloat16)
    adj = adj.astype(jnp.bfloat16)
    for l in range(L):
        y = jnp.einsum("bij,bjd->bid", adj, x,
                       preferred_element_type=jnp.float32)
        y = jnp.einsum("bnd,de->bne", y.astype(jnp.bfloat16),
                       ws[l].astype(jnp.bfloat16),
                       preferred_element_type=jnp.float32)
        y = y + bs[l]
        ssq = jnp.sum(y * y, axis=-1, keepdims=True)
        y = y * jax.lax.rsqrt(jnp.maximum(ssq, 1e-24))
        if l < L - 1:
            y = jnp.maximum(y, 0.0)
            mean = jnp.mean(y, axis=(0, 2), keepdims=True)
            e2 = jnp.mean(y * y, axis=(0, 2), keepdims=True)
            y = (y - mean) * jax.lax.rsqrt(e2 - mean * mean + 1e-5)
        outs.append(jnp.max(y, axis=1))
        x = y.astype(jnp.bfloat16)
    return jnp.concatenate(outs, axis=1)


if __name__ == "__main__":
    B, N = 2, 16            # batch, max_num_nodes
    INPUT_DIM = 8
    HIDDEN_DIM = 32
    NUM_LAYERS = 3          # conv_first + 1 conv_block + conv_last

    root = jax.random.PRNGKey(0)
    k_x, k_adj, k_p = jax.random.split(root, 3)

    x = jax.random.normal(k_x, (B, N, INPUT_DIM), jnp.float32)
    adj = jax.random.uniform(k_adj, (B, N, N), jnp.float32)
    ws, bs = init_params(k_p, INPUT_DIM, HIDDEN_DIM, NUM_LAYERS)

    # One-time padding / bf16 packing, outside the jitted forward step.
    adj_p, x_p, w_all, b_all, static = prepare_inputs(ws, bs, x, adj)
    fwd = jax.jit(functools.partial(fused_gcn_forward, **static))

    output = fwd(adj_p, x_p, w_all, b_all)
    jax.block_until_ready(output)

    assert output.shape == (B, HIDDEN_DIM * NUM_LAYERS), output.shape
    assert bool(jnp.all(jnp.isfinite(output)))

    # Tight check vs a reference matching the kernel's mixed precision.
    ref_mixed = reference_forward_bf16(ws, bs, x, adj)
    err_mixed = float(jnp.max(jnp.abs(output - ref_mixed)))
    assert bool(jnp.allclose(output, ref_mixed, rtol=2e-2, atol=2e-2)), err_mixed

    # Loose check vs the pure-f32 PyTorch-semantics reference (bf16 MXU inputs
    # plus BatchNorm's ~10x rsqrt(var) amplification bound the deviation).
    ref_f32 = reference_forward_f32(ws, bs, x, adj)
    err_f32 = float(jnp.max(jnp.abs(output - ref_f32)))
    assert bool(jnp.allclose(output, ref_f32, rtol=1e-1, atol=1e-1)), err_f32

    print("KERNEL_OK")
</pallas_src>

<mosaic_0001>
module attributes {stable_mosaic.version = 11 : i64} {
  func.func @_fused_gcn_kernel(%arg0: i32, %arg1: memref<2x128x128xbf16, #tpu.memory_space<vmem>>, %arg2: memref<2x128x128xbf16, #tpu.memory_space<vmem>>, %arg3: memref<3x128x128xbf16, #tpu.memory_space<vmem>>, %arg4: memref<3x1x128xf32, #tpu.memory_space<vmem>>, %arg5: memref<2x384xf32, #tpu.memory_space<vmem>>) attributes {dimension_semantics = [#tpu.dimension_semantics<arbitrary>], iteration_bounds = array<i64: 1>, scalar_prefetch = 0 : i64, scratch_operands = 0 : i64, tpu.core_type = #tpu.core_type<tc>, window_params = [{pipeline_mode = #tpu.pipeline_mode<synchronous>, transform_indices = @transform_0, window_bounds = array<i64: 2, 128, 128>}, {pipeline_mode = #tpu.pipeline_mode<synchronous>, transform_indices = @transform_1, window_bounds = array<i64: 2, 128, 128>}, {pipeline_mode = #tpu.pipeline_mode<synchronous>, transform_indices = @transform_2, window_bounds = array<i64: 3, 128, 128>}, {pipeline_mode = #tpu.pipeline_mode<synchronous>, transform_indices = @transform_3, window_bounds = array<i64: 3, 1, 128>}, {pipeline_mode = #tpu.pipeline_mode<synchronous>, transform_indices = @transform_4, window_bounds = array<i64: 2, 384>}]} {
    %c0 = arith.constant 0 : index
    %c0_0 = arith.constant 0 : index
    %c0_1 = arith.constant 0 : index
    %0 = vector.load %arg1[%c0, %c0_0, %c0_1] : memref<2x128x128xbf16, #tpu.memory_space<vmem>>, vector<2x128x128xbf16>
    %c0_2 = arith.constant 0 : index
    %c0_3 = arith.constant 0 : index
    %c0_4 = arith.constant 0 : index
    %1 = vector.load %arg2[%c0_2, %c0_3, %c0_4] : memref<2x128x128xbf16, #tpu.memory_space<vmem>>, vector<2x128x128xbf16>
    %2 = tpu.iota {dimensions = array<i32: 1>} : vector<1x128x1xi32>
    %c16_i32 = arith.constant 16 : i32
    %3 = vector.broadcast %c16_i32 : i32 to vector<1x128x1xi32>
    %4 = arith.cmpi slt, %2, %3 : vector<1x128x1xi32>
    %c0_5 = arith.constant 0 : index
    %c0_6 = arith.constant 0 : index
    %c0_7 = arith.constant 0 : index
    %5 = vector.load %arg3[%c0_5, %c0_6, %c0_7] : memref<3x128x128xbf16, #tpu.memory_space<vmem>>, vector<1x128x128xbf16>
    %6 = vector.shape_cast %5 : vector<1x128x128xbf16> to vector<128x128xbf16>
    %c0_8 = arith.constant 0 : index
    %c0_9 = arith.constant 0 : index
    %c0_10 = arith.constant 0 : index
    %7 = vector.load %arg4[%c0_8, %c0_9, %c0_10] : memref<3x1x128xf32, #tpu.memory_space<vmem>>, vector<1x1x128xf32>
    %8 = vector.shape_cast %7 : vector<1x1x128xf32> to vector<1x128xf32>
    "tpu.trace_start"() <{level = 10 : i32, message = "bij,bjd->bid"}> : () -> ()
    %cst = arith.constant dense<0.000000e+00> : vector<2x128x128xf32>
    %9 = tpu.matmul %0, %1, %cst {dimension_numbers = #tpu.dot_dimension_numbers<[2], [1], [1], [2], [0, 0, 0, 1, 1, 2], [0], [0]>} : vector<2x128x128xbf16>, vector<2x128x128xbf16>, vector<2x128x128xf32> -> vector<2x128x128xf32>
    "tpu.trace_stop"() : () -> ()
    %10 = vector.shape_cast %9 : vector<2x128x128xf32> to vector<256x128xf32>
    %11 = arith.truncf %10 : vector<256x128xf32> to vector<256x128xbf16>
    %cst_11 = arith.constant dense<0.000000e+00> : vector<256x128xf32>
    %12 = tpu.matmul %11, %6, %cst_11 {dimension_numbers = #tpu.dot_dimension_numbers<[1], [0], [0], [1], [0, 0, 1, 1], [], []>} : vector<256x128xbf16>, vector<128x128xbf16>, vector<256x128xf32> -> vector<256x128xf32>
    %13 = vector.shape_cast %12 : vector<256x128xf32> to vector<2x128x128xf32>
    %14 = vector.shape_cast %8 : vector<1x128xf32> to vector<1x1x128xf32>
    %15 = vector.broadcast %14 : vector<1x1x128xf32> to vector<2x128x128xf32>
    %16 = arith.addf %13, %15 : vector<2x128x128xf32>
    %17 = arith.mulf %16, %16 : vector<2x128x128xf32>
    %cst_12 = arith.constant dense<0.000000e+00> : vector<2x128xf32>
    %18 = vector.multi_reduction <add>, %17, %cst_12 [2] : vector<2x128x128xf32> to vector<2x128xf32>
    %19 = vector.shape_cast %18 : vector<2x128xf32> to vector<2x128x1xf32>
    %cst_13 = arith.constant 1.000000e-24 : f32
    %20 = vector.broadcast %cst_13 : f32 to vector<2x128x1xf32>
    %21 = arith.maximumf %19, %20 : vector<2x128x1xf32>
    %22 = math.rsqrt %21 : vector<2x128x1xf32>
    %23 = vector.broadcast %22 : vector<2x128x1xf32> to vector<2x128x128xf32>
    %24 = arith.mulf %16, %23 : vector<2x128x128xf32>
    %cst_14 = arith.constant 0.000000e+00 : f32
    %25 = vector.broadcast %cst_14 : f32 to vector<2x128x128xf32>
    %26 = arith.maximumf %24, %25 : vector<2x128x128xf32>
    %cst_15 = arith.constant dense<0.000000e+00> : vector<128xf32>
    %27 = vector.multi_reduction <add>, %26, %cst_15 [0, 2] : vector<2x128x128xf32> to vector<128xf32>
    %28 = vector.shape_cast %27 : vector<128xf32> to vector<1x128x1xf32>
    %cst_16 = arith.constant 1.562500e-02 : f32
    %29 = vector.broadcast %cst_16 : f32 to vector<1x128x1xf32>
    %30 = arith.mulf %28, %29 : vector<1x128x1xf32>
    %31 = arith.mulf %26, %26 : vector<2x128x128xf32>
    %cst_17 = arith.constant dense<0.000000e+00> : vector<128xf32>
    %32 = vector.multi_reduction <add>, %31, %cst_17 [0, 2] : vector<2x128x128xf32> to vector<128xf32>
    %33 = vector.shape_cast %32 : vector<128xf32> to vector<1x128x1xf32>
    %cst_18 = arith.constant 1.562500e-02 : f32
    %34 = vector.broadcast %cst_18 : f32 to vector<1x128x1xf32>
    %35 = arith.mulf %33, %34 : vector<1x128x1xf32>
    %36 = arith.mulf %30, %30 : vector<1x128x1xf32>
    %37 = arith.subf %35, %36 : vector<1x128x1xf32>
    %38 = vector.broadcast %30 : vector<1x128x1xf32> to vector<2x128x128xf32>
    %39 = arith.subf %26, %38 : vector<2x128x128xf32>
    %cst_19 = arith.constant 9.99999974E-6 : f32
    %40 = vector.broadcast %cst_19 : f32 to vector<1x128x1xf32>
    %41 = arith.addf %37, %40 : vector<1x128x1xf32>
    %42 = math.rsqrt %41 : vector<1x128x1xf32>
    %43 = vector.broadcast %42 : vector<1x128x1xf32> to vector<2x128x128xf32>
    %44 = arith.mulf %39, %43 : vector<2x128x128xf32>
    %cst_20 = arith.constant -1.000000e+30 : f32
    %45 = vector.shape_cast %4 : vector<1x128x1xi1> to vector<1x128x1xi1>
    %46 = vector.broadcast %45 : vector<1x128x1xi1> to vector<2x128x128xi1>
    %47 = vector.broadcast %cst_20 : f32 to vector<2x128x128xf32>
    %48 = arith.select %46, %44, %47 : vector<2x128x128xi1>, vector<2x128x128xf32>
    %cst_21 = arith.constant dense<0xFF800000> : vector<2x128xf32>
    %49 = vector.multi_reduction <maximumf>, %48, %cst_21 [1] : vector<2x128x128xf32> to vector<2x128xf32>
    %c0_22 = arith.constant 0 : index
    %c0_23 = arith.constant 0 : index
    %50 = vector.load %arg5[%c0_22, %c0_23] : memref<2x384xf32, #tpu.memory_space<vmem>>, vector<2x128xf32>
    tpu.vector_store %arg5[%c0_22, %c0_23], %49 {strides = array<i32>} : memref<2x384xf32, #tpu.memory_space<vmem>>, vector<2x128xf32>,
    %51 = arith.truncf %44 : vector<2x128x128xf32> to vector<2x128x128xbf16>
    %c1 = arith.constant 1 : index
    %c0_24 = arith.constant 0 : index
    %c0_25 = arith.constant 0 : index
    %52 = vector.load %arg3[%c1, %c0_24, %c0_25] : memref<3x128x128xbf16, #tpu.memory_space<vmem>>, vector<1x128x128xbf16>
    %53 = vector.shape_cast %52 : vector<1x128x128xbf16> to vector<128x128xbf16>
    %c1_26 = arith.constant 1 : index
    %c0_27 = arith.constant 0 : index
    %c0_28 = arith.constant 0 : index
    %54 = vector.load %arg4[%c1_26, %c0_27, %c0_28] : memref<3x1x128xf32, #tpu.memory_space<vmem>>, vector<1x1x128xf32>
    %55 = vector.shape_cast %54 : vector<1x1x128xf32> to vector<1x128xf32>
    "tpu.trace_start"() <{level = 10 : i32, message = "bij,bjd->bid"}> : () -> ()
    %cst_29 = arith.constant dense<0.000000e+00> : vector<2x128x128xf32>
    %56 = tpu.matmul %0, %51, %cst_29 {dimension_numbers = #tpu.dot_dimension_numbers<[2], [1], [1], [2], [0, 0, 0, 1, 1, 2], [0], [0]>} : vector<2x128x128xbf16>, vector<2x128x128xbf16>, vector<2x128x128xf32> -> vector<2x128x128xf32>
    "tpu.trace_stop"() : () -> ()
    %57 = vector.shape_cast %56 : vector<2x128x128xf32> to vector<256x128xf32>
    %58 = arith.truncf %57 : vector<256x128xf32> to vector<256x128xbf16>
    %cst_30 = arith.constant dense<0.000000e+00> : vector<256x128xf32>
    %59 = tpu.matmul %58, %53, %cst_30 {dimension_numbers = #tpu.dot_dimension_numbers<[1], [0], [0], [1], [0, 0, 1, 1], [], []>} : vector<256x128xbf16>, vector<128x128xbf16>, vector<256x128xf32> -> vector<256x128xf32>
    %60 = vector.shape_cast %59 : vector<256x128xf32> to vector<2x128x128xf32>
    %61 = vector.shape_cast %55 : vector<1x128xf32> to vector<1x1x128xf32>
    %62 = vector.broadcast %61 : vector<1x1x128xf32> to vector<2x128x128xf32>
    %63 = arith.addf %60, %62 : vector<2x128x128xf32>
    %64 = arith.mulf %63, %63 : vector<2x128x128xf32>
    %cst_31 = arith.constant dense<0.000000e+00> : vector<2x128xf32>
    %65 = vector.multi_reduction <add>, %64, %cst_31 [2] : vector<2x128x128xf32> to vector<2x128xf32>
    %66 = vector.shape_cast %65 : vector<2x128xf32> to vector<2x128x1xf32>
    %cst_32 = arith.constant 1.000000e-24 : f32
    %67 = vector.broadcast %cst_32 : f32 to vector<2x128x1xf32>
    %68 = arith.maximumf %66, %67 : vector<2x128x1xf32>
    %69 = math.rsqrt %68 : vector<2x128x1xf32>
    %70 = vector.broadcast %69 : vector<2x128x1xf32> to vector<2x128x128xf32>
    %71 = arith.mulf %63, %70 : vector<2x128x128xf32>
    %cst_33 = arith.constant 0.000000e+00 : f32
    %72 = vector.broadcast %cst_33 : f32 to vector<2x128x128xf32>
    %73 = arith.maximumf %71, %72 : vector<2x128x128xf32>
    %cst_34 = arith.constant dense<0.000000e+00> : vector<128xf32>
    %74 = vector.multi_reduction <add>, %73, %cst_34 [0, 2] : vector<2x128x128xf32> to vector<128xf32>
    %75 = vector.shape_cast %74 : vector<128xf32> to vector<1x128x1xf32>
    %cst_35 = arith.constant 1.562500e-02 : f32
    %76 = vector.broadcast %cst_35 : f32 to vector<1x128x1xf32>
    %77 = arith.mulf %75, %76 : vector<1x128x1xf32>
    %78 = arith.mulf %73, %73 : vector<2x128x128xf32>
    %cst_36 = arith.constant dense<0.000000e+00> : vector<128xf32>
    %79 = vector.multi_reduction <add>, %78, %cst_36 [0, 2] : vector<2x128x128xf32> to vector<128xf32>
    %80 = vector.shape_cast %79 : vector<128xf32> to vector<1x128x1xf32>
    %cst_37 = arith.constant 1.562500e-02 : f32
    %81 = vector.broadcast %cst_37 : f32 to vector<1x128x1xf32>
    %82 = arith.mulf %80, %81 : vector<1x128x1xf32>
    %83 = arith.mulf %77, %77 : vector<1x128x1xf32>
    %84 = arith.subf %82, %83 : vector<1x128x1xf32>
    %85 = vector.broadcast %77 : vector<1x128x1xf32> to vector<2x128x128xf32>
    %86 = arith.subf %73, %85 : vector<2x128x128xf32>
    %cst_38 = arith.constant 9.99999974E-6 : f32
    %87 = vector.broadcast %cst_38 : f32 to vector<1x128x1xf32>
    %88 = arith.addf %84, %87 : vector<1x128x1xf32>
    %89 = math.rsqrt %88 : vector<1x128x1xf32>
    %90 = vector.broadcast %89 : vector<1x128x1xf32> to vector<2x128x128xf32>
    %91 = arith.mulf %86, %90 : vector<2x128x128xf32>
    %cst_39 = arith.constant -1.000000e+30 : f32
    %92 = vector.shape_cast %4 : vector<1x128x1xi1> to vector<1x128x1xi1>
    %93 = vector.broadcast %92 : vector<1x128x1xi1> to vector<2x128x128xi1>
    %94 = vector.broadcast %cst_39 : f32 to vector<2x128x128xf32>
    %95 = arith.select %93, %91, %94 : vector<2x128x128xi1>, vector<2x128x128xf32>
    %cst_40 = arith.constant dense<0xFF800000> : vector<2x128xf32>
    %96 = vector.multi_reduction <maximumf>, %95, %cst_40 [1] : vector<2x128x128xf32> to vector<2x128xf32>
    %c0_41 = arith.constant 0 : index
    %c128 = arith.constant 128 : index
    %97 = vector.load %arg5[%c0_41, %c128] : memref<2x384xf32, #tpu.memory_space<vmem>>, vector<2x128xf32>
    tpu.vector_store %arg5[%c0_41, %c128], %96 {strides = array<i32>} : memref<2x384xf32, #tpu.memory_space<vmem>>, vector<2x128xf32>,
    %98 = arith.truncf %91 : vector<2x128x128xf32> to vector<2x128x128xbf16>
    %c2 = arith.constant 2 : index
    %c0_42 = arith.constant 0 : index
    %c0_43 = arith.constant 0 : index
    %99 = vector.load %arg3[%c2, %c0_42, %c0_43] : memref<3x128x128xbf16, #tpu.memory_space<vmem>>, vector<1x128x128xbf16>
    %100 = vector.shape_cast %99 : vector<1x128x128xbf16> to vector<128x128xbf16>
    %c2_44 = arith.constant 2 : index
    %c0_45 = arith.constant 0 : index
    %c0_46 = arith.constant 0 : index
    %101 = vector.load %arg4[%c2_44, %c0_45, %c0_46] : memref<3x1x128xf32, #tpu.memory_space<vmem>>, vector<1x1x128xf32>
    %102 = vector.shape_cast %101 : vector<1x1x128xf32> to vector<1x128xf32>
    "tpu.trace_start"() <{level = 10 : i32, message = "bij,bjd->bid"}> : () -> ()
    %cst_47 = arith.constant dense<0.000000e+00> : vector<2x128x128xf32>
    %103 = tpu.matmul %0, %98, %cst_47 {dimension_numbers = #tpu.dot_dimension_numbers<[2], [1], [1], [2], [0, 0, 0, 1, 1, 2], [0], [0]>} : vector<2x128x128xbf16>, vector<2x128x128xbf16>, vector<2x128x128xf32> -> vector<2x128x128xf32>
    "tpu.trace_stop"() : () -> ()
    %104 = vector.shape_cast %103 : vector<2x128x128xf32> to vector<256x128xf32>
    %105 = arith.truncf %104 : vector<256x128xf32> to vector<256x128xbf16>
    %cst_48 = arith.constant dense<0.000000e+00> : vector<256x128xf32>
    %106 = tpu.matmul %105, %100, %cst_48 {dimension_numbers = #tpu.dot_dimension_numbers<[1], [0], [0], [1], [0, 0, 1, 1], [], []>} : vector<256x128xbf16>, vector<128x128xbf16>, vector<256x128xf32> -> vector<256x128xf32>
    %107 = vector.shape_cast %106 : vector<256x128xf32> to vector<2x128x128xf32>
    %108 = vector.shape_cast %102 : vector<1x128xf32> to vector<1x1x128xf32>
    %109 = vector.broadcast %108 : vector<1x1x128xf32> to vector<2x128x128xf32>
    %110 = arith.addf %107, %109 : vector<2x128x128xf32>
    %111 = arith.mulf %110, %110 : vector<2x128x128xf32>
    %cst_49 = arith.constant dense<0.000000e+00> : vector<2x128xf32>
    %112 = vector.multi_reduction <add>, %111, %cst_49 [2] : vector<2x128x128xf32> to vector<2x128xf32>
    %113 = vector.shape_cast %112 : vector<2x128xf32> to vector<2x128x1xf32>
    %cst_50 = arith.constant 1.000000e-24 : f32
    %114 = vector.broadcast %cst_50 : f32 to vector<2x128x1xf32>
    %115 = arith.maximumf %113, %114 : vector<2x128x1xf32>
    %116 = math.rsqrt %115 : vector<2x128x1xf32>
    %117 = vector.broadcast %116 : vector<2x128x1xf32> to vector<2x128x128xf32>
    %118 = arith.mulf %110, %117 : vector<2x128x128xf32>
    %cst_51 = arith.constant -1.000000e+30 : f32
    %119 = vector.shape_cast %4 : vector<1x128x1xi1> to vector<1x128x1xi1>
    %120 = vector.broadcast %119 : vector<1x128x1xi1> to vector<2x128x128xi1>
    %121 = vector.broadcast %cst_51 : f32 to vector<2x128x128xf32>
    %122 = arith.select %120, %118, %121 : vector<2x128x128xi1>, vector<2x128x128xf32>
    %cst_52 = arith.constant dense<0xFF800000> : vector<2x128xf32>
    %123 = vector.multi_reduction <maximumf>, %122, %cst_52 [1] : vector<2x128x128xf32> to vector<2x128xf32>
    %c0_53 = arith.constant 0 : index
    %c256 = arith.constant 256 : index
    %124 = vector.load %arg5[%c0_53, %c256] : memref<2x384xf32, #tpu.memory_space<vmem>>, vector<2x128xf32>
    tpu.vector_store %arg5[%c0_53, %c256], %123 {strides = array<i32>} : memref<2x384xf32, #tpu.memory_space<vmem>>, vector<2x128xf32>,
    return
  }
  func.func @transform_0(%arg0: i32) -> (i32, i32, i32) {
    %c0_i32 = arith.constant 0 : i32
    %c0_i32_0 = arith.constant 0 : i32
    %c0_i32_1 = arith.constant 0 : i32
    %c0_i32_2 = arith.constant 0 : i32
    return %c0_i32, %c0_i32_0, %c0_i32_1 : i32, i32, i32
  }
  func.func @transform_1(%arg0: i32) -> (i32, i32, i32) {
    %c0_i32 = arith.constant 0 : i32
    %c0_i32_0 = arith.constant 0 : i32
    %c0_i32_1 = arith.constant 0 : i32
    %c0_i32_2 = arith.constant 0 : i32
    return %c0_i32, %c0_i32_0, %c0_i32_1 : i32, i32, i32
  }
  func.func @transform_2(%arg0: i32) -> (i32, i32, i32) {
    %c0_i32 = arith.constant 0 : i32
    %c0_i32_0 = arith.constant 0 : i32
    %c0_i32_1 = arith.constant 0 : i32
    %c0_i32_2 = arith.constant 0 : i32
    return %c0_i32, %c0_i32_0, %c0_i32_1 : i32, i32, i32
  }
  func.func @transform_3(%arg0: i32) -> (i32, i32, i32) {
    %c0_i32 = arith.constant 0 : i32
    %c0_i32_0 = arith.constant 0 : i32
    %c0_i32_1 = arith.constant 0 : i32
    %c0_i32_2 = arith.constant 0 : i32
    return %c0_i32, %c0_i32_0, %c0_i32_1 : i32, i32, i32
  }
  func.func @transform_4(%arg0: i32) -> (i32, i32) {
    %c0_i32 = arith.constant 0 : i32
    %c0_i32_0 = arith.constant 0 : i32
    %c0_i32_1 = arith.constant 0 : i32
    return %c0_i32, %c0_i32_0 : i32, i32
  }
}

</mosaic_0001>

<bundles_post_ra>
// kernel: fused_gcn_forward.1
= control target key start
LH: loop header
LB: loop body
LE: loop exit
PB: predicated region body
PF: predicated region fallthrough
CT: control target
= control target key end

     0   :  { %9 = vsyncpa [#allocation3], 0  ;;  %s5563_s0 = inlined_call_operand.hbm [shape: bf16[2,128,128], index: 0, kind: input, shape index: {}]   ;;  %s5564_s1 = inlined_call_operand.hbm [shape: bf16[2,128,128], index: 1, kind: input, shape index: {}]   ;;  %s5565_s2 = inlined_call_operand.hbm [shape: bf16[3,128,128], index: 2, kind: input, shape index: {}]   ;;  %s5566_s3 = inlined_call_operand.vmem [shape: f32[3,1,128], index: 3, kind: input, shape index: {}]   ;;  %s5567_s4 = inlined_call_operand.vmem [shape: f32[2,384], index: 4, kind: output, shape index: {}]  }
   0x1   :  { %10 = vsyncpa [#allocation5], 0  ;;  %s4291_s15 = smov [#allocation4]   ;;  %s4292_s17 = smov [#allocation2]  }
   0x2   :  { %s28_s16 = sshll.u32 %s4291_s15, 4  ;;  %s16_s18 = sshll.u32 %s4292_s17, 4  ;;  %s29_s16 = int_to_ptr.vmem [resolvable:$true] %s28_s16  ;;  %s4322_s18 = int_to_ptr.vmem [resolvable:$true] %s16_s18 }
   0x3   :  { %s4221_s21 = scalar_lea.hbm %s5564_s1, 2048 }
   0x4   :  { %p4222_p0 = scmp.ne.s32.totalorder %s5564_s1, %s4221_s21  ;;  %p4225_p1 = scmp.lt.u32.totalorder %s4221_s21, %s5564_s1 }
   0x6   :  { %p4227_p2 = pnand %p4225_p1, %p4222_p0 }
   0x8   :  { %4230 = shalt.err (!%p4227_p2)
}
   0x9   :  { %s4231_s26 = scalar_lea.vmem %s29_s16, 2048  ;;  %p4236_p4 = scmp.lt.s32.totalorder %s29_s16, %s29_s16 }
   0xa   :  { %p4232_p3 = scmp.ne.s32.totalorder %s29_s16, %s4231_s26  ;;  %p4237_p5 = scmp.lt.s32.totalorder %s4231_s26, %s4231_s26 }
   0xc   :  { %p4238_p6 = por %p4237_p5, %p4236_p4 }
   0xe   :  { %p4239_p7 = pnand %p4238_p6, %p4232_p3 }
  0x10   :  { %4242 = shalt.err (!%p4239_p7)
}
  0x11   :  { %s4293_s27 = smov 64   ;;  %s4294_s28 = smov 4  }
  0x12   :  { %34 = dma.hbm_to_vmem [thread:$0]  %s5564_s1, 2048, %s29_s16, [#allocation5], %s4293_s27, %s4293_s27, %s4294_s28  }
  0x13   :  { %s4243_s7 = scalar_lea.hbm %s5563_s0, 2048 }
  0x14   :  { %p4244_p8 = scmp.ne.s32.totalorder %s5563_s0, %s4243_s7  ;;  %p4247_p9 = scmp.lt.u32.totalorder %s4243_s7, %s5563_s0 }
  0x16   :  { %p4249_p10 = pnand %p4247_p9, %p4244_p8 }
  0x18   :  { %4252 = shalt.err (!%p4249_p10)
}
  0x19   :  { %s4253_s12 = scalar_lea.vmem %s4322_s18, 2048  ;;  %p4258_p12 = scmp.lt.s32.totalorder %s4322_s18, %s4322_s18 }
  0x1a   :  { %p4254_p11 = scmp.ne.s32.totalorder %s4322_s18, %s4253_s12  ;;  %p4259_p13 = scmp.lt.s32.totalorder %s4253_s12, %s4253_s12 }
  0x1c   :  { %p4260_p0 = por %p4259_p13, %p4258_p12 }
  0x1e   :  { %p4261_p1 = pnand %p4260_p0, %p4254_p11 }
  0x20   :  { %4264 = shalt.err (!%p4261_p1)
}
  0x21   :  { %22 = dma.hbm_to_vmem [thread:$0]  %s5563_s0, 2048, %s4322_s18, [#allocation3], %s4293_s27, %s4293_s27, %s4294_s28  }
  0x22   :  { %s4295_s14 = smov [#allocation6]   ;;  %s4265_s19 = scalar_lea.hbm %s5565_s2, 3072 }
  0x23   :  { %s40_s15 = sshll.u32 %s4295_s14, 4  ;;  %p4266_p2 = scmp.ne.s32.totalorder %s5565_s2, %s4265_s19  ;;  %s41_s15 = int_to_ptr.vmem [resolvable:$true] %s40_s15 }
  0x24   :  { %p4269_p3 = scmp.lt.u32.totalorder %s4265_s19, %s5565_s2 }
  0x26   :  { %p4271_p4 = pnand %p4269_p3, %p4266_p2 }
  0x28   :  { %4274 = shalt.err (!%p4271_p4)
}
  0x29   :  { %s4275_s24 = scalar_lea.vmem %s41_s15, 3072  ;;  %p4280_p6 = scmp.lt.s32.totalorder %s41_s15, %s41_s15 }
  0x2a   :  { %p4276_p5 = scmp.ne.s32.totalorder %s41_s15, %s4275_s24  ;;  %p4281_p7 = scmp.lt.s32.totalorder %s4275_s24, %s4275_s24 }
  0x2c   :  { %p4282_p8 = por %p4281_p7, %p4280_p6 }
  0x2e   :  { %p4283_p9 = pnand %p4282_p8, %p4276_p5 }
  0x30   :  { %4286 = shalt.err (!%p4283_p9)
}
  0x31   :  { %46 = dma.hbm_to_vmem [thread:$0]  %s5565_s2, 3072, %s41_s15, [#allocation5], %s4293_s27, %s4293_s27, %s4294_s28  }
  0x32   :  { %4287 = dma.done.wait [#allocation3], 2048  }
  0x33   :  { %4288 = vsyncadd [#allocation3], 4294965248 }
  0x34   :  { %4289 = dma.done.wait [#allocation5], 5120  }
  0x35   :  { %4290 = vsyncadd [#allocation5], 4294962176  ;;  %v3934_v0 = vld [vmem:[#allocation4] sm:$0xff]   ;;  %v3935_v1 = vld [vmem:[#allocation4 + $0x8] sm:$0xff]   ;;  %vm1461_vm0 = vcmask 1041409   ;;  %vm1463_vm1 = vcmask 1043459  }
  0x36   :  { %3592 = vmatprep.subr.bf16.mxu1 %v3934_v0  ;;  %v3936_v2 = vld [vmem:[#allocation4 + $0x10] sm:$0xff]   ;;  %v3937_v3 = vld [vmem:[#allocation4 + $0x18] sm:$0xff]   ;;  %v4374_v4 = vld [vmem:[#allocation2] sm:$0xff]   ;;  %vm1465_vm2 = vcmask 1045509   ;;  %vm1467_vm3 = vcmask 1047559  }
  0x37   :  { %3593 = vmatpush3.bf16.msra.mxu1 %v3934_v0  ;;  %3608 = vmatprep.mubr.bf16.mxu1 %v4374_v4  ;;  %v3938_v5 = vld [vmem:[#allocation4 + $0x20] sm:$0xff]   ;;  %v3939_v6 = vld [vmem:[#allocation4 + $0x28] sm:$0xff]   ;;  %v3940_v7 = vld [vmem:[#allocation4 + $0x30] sm:$0xff]  }
  0x38   :  { %3594 = vmatprep.subr.bf16.mxu1 %v3935_v1  ;;  %v3941_v8 = vld [vmem:[#allocation4 + $0x38] sm:$0xff]   ;;  %v3944_v9 = vld [vmem:[#allocation4 + $0x40] sm:$0xff]   ;;  %v3943_v10 = vld [vmem:[#allocation2 + $0x8] sm:$0xff]  }
  0x39   :  { %v3945_v11 = vld [vmem:[#allocation4 + $0x48] sm:$0xff]   ;;  %v3946_v12 = vld [vmem:[#allocation2 + $0x10] sm:$0xff]   ;;  %v3966_v13 = vld [vmem:[#allocation6] sm:$0xff]  }
  0x3a   :  { %v3967_v14 = vld [vmem:[#allocation6 + $0x8] sm:$0xff]   ;;  %3656 = vmatprep.subr.bf16.mxu0 %v3966_v13  ;;  %v3947_v15 = vld [vmem:[#allocation2 + $0x18] sm:$0xff]   ;;  %v3948_v16 = vld [vmem:[#allocation4 + $0x50] sm:$0xff]  }
  0x3b   :  { %3595 = vmatpush3.bf16.msra.mxu1 %v3935_v1  ;;  %3657 = vmatpush3.bf16.msra.mxu0 %v3966_v13  ;;  %v3968_v17 = vld [vmem:[#allocation6 + $0x10] sm:$0xff]   ;;  %v3949_v18 = vld [vmem:[#allocation4 + $0x58] sm:$0xff]   ;;  %v3950_v19 = vld [vmem:[#allocation2 + $0x20] sm:$0xff]  }
  0x3c   :  { %3596 = vmatprep.subr.bf16.mxu1 %v3936_v2  ;;  %3658 = vmatprep.subr.bf16.mxu0 %v3967_v14  ;;  %v3969_v20 = vld [vmem:[#allocation6 + $0x18] sm:$0xff]   ;;  %v3952_v21 = vld [vmem:[#allocation4 + $0x60] sm:$0xff]   ;;  %v3951_v23 = vld [vmem:[#allocation2 + $0x28] sm:$0xff]  }
  0x3d   :  { %v3970_v22 = vld [vmem:[#allocation6 + $0x20] sm:$0xff]   ;;  %v3954_v24 = vld [vmem:[#allocation2 + $0x30] sm:$0xff]   ;;  %v3953_v25 = vld [vmem:[#allocation4 + $0x68] sm:$0xff]  }
  0x3e   :  { %v3971_v26 = vld [vmem:[#allocation6 + $0x28] sm:$0xff]   ;;  %v3956_v27 = vld [vmem:[#allocation4 + $0x70] sm:$0xff]   ;;  %v3955_v29 = vld [vmem:[#allocation2 + $0x38] sm:$0xff]  }
  0x3f   :  { %3597 = vmatpush3.bf16.msra.mxu1 %v3936_v2  ;;  %3659 = vmatpush3.bf16.msra.mxu0 %v3967_v14  ;;  %v3972_v28 = vld [vmem:[#allocation6 + $0x30] sm:$0xff]   ;;  %v3958_v30 = vld [vmem:[#allocation2 + $0x40] sm:$0xff]   ;;  %v3957_v31 = vld [vmem:[#allocation4 + $0x78] sm:$0xff]  }
  0x40   :  { %3598 = vmatprep.subr.bf16.mxu1 %v3937_v3  ;;  %3660 = vmatprep.subr.bf16.mxu0 %v3968_v17  ;;  %v3959_v32 = vld [vmem:[#allocation2 + $0x48] sm:$0xff]   ;;  %v3960_v33 = vld [vmem:[#allocation2 + $0x50] sm:$0xff]   ;;  %v3961_v34 = vld [vmem:[#allocation2 + $0x58] sm:$0xff]  }
  0x41   :  { %v3962_v35 = vld [vmem:[#allocation2 + $0x60] sm:$0xff]   ;;  %v3963_v36 = vld [vmem:[#allocation2 + $0x68] sm:$0xff]   ;;  %v3964_v37 = vld [vmem:[#allocation2 + $0x70] sm:$0xff]  }
  0x42   :  { %v3965_v38 = vld [vmem:[#allocation2 + $0x78] sm:$0xff]  }
  0x43   :  { %3599 = vmatpush3.bf16.msra.mxu1 %v3937_v3  ;;  %3661 = vmatpush3.bf16.msra.mxu0 %v3968_v17  ;;  %v3973_v39 = vld [vmem:[#allocation6 + $0x38] sm:$0xff]  }
  0x44   :  { %3600 = vmatprep.subr.bf16.mxu1 %v3938_v5  ;;  %3662 = vmatprep.subr.bf16.mxu0 %v3969_v20 }
  0x47   :  { %3601 = vmatpush3.bf16.msra.mxu1 %v3938_v5  ;;  %3663 = vmatpush3.bf16.msra.mxu0 %v3969_v20 }
  0x48   :  { %3602 = vmatprep.subr.bf16.mxu1 %v3939_v6  ;;  %3664 = vmatprep.subr.bf16.mxu0 %v3970_v22 }
  0x4b   :  { %3603 = vmatpush3.bf16.msra.mxu1 %v3939_v6  ;;  %3665 = vmatpush3.bf16.msra.mxu0 %v3970_v22 }
  0x4c   :  { %3604 = vmatprep.subr.bf16.mxu1 %v3940_v7  ;;  %3666 = vmatprep.subr.bf16.mxu0 %v3971_v26 }
  0x4f   :  { %3605 = vmatpush3.bf16.msra.mxu1 %v3940_v7  ;;  %3667 = vmatpush3.bf16.msra.mxu0 %v3971_v26 }
  0x50   :  { %3606 = vmatprep.subr.bf16.mxu1 %v3941_v8  ;;  %3668 = vmatprep.subr.bf16.mxu0 %v3972_v28 }
  0x53   :  { %3607 = vmatpush3.bf16.msra.mxu1 %v3941_v8  ;;  %3669 = vmatpush3.bf16.msra.mxu0 %v3972_v28 }
  0x54   :  { %3624 = vmatprep.subr.bf16.mxu1 %v3944_v9  ;;  %3670 = vmatprep.subr.bf16.mxu0 %v3973_v39 }
  0x56   :  { %3609 = vmatmul.mubr.bf16.vlgmr.msra.gmra.mrb[0].mxu1 %v3943_v10 }
  0x57   :  { %3625 = vmatpush3.bf16.msra.mxu1 %v3944_v9  ;;  %3612 = vmatprep.mubr.bf16.mxu1 %v3946_v12 }
  0x58   :  { %3626 = vmatprep.subr.bf16.mxu1 %v3945_v11  ;;  %3671 = vmatpush3.bf16.msra.mxu0 %v3973_v39 }
  0x5b   :  { %3627 = vmatpush3.bf16.msra.mxu1 %v3945_v11 }
  0x5c   :  { %3628 = vmatprep.subr.bf16.mxu1 %v3948_v16 }
  0x5e   :  { %3613 = vmatmul.mubr.bf16.gmra.mrb[4].mxu1 %v3947_v15 }
  0x5f   :  { %3629 = vmatpush3.bf16.msra.mxu1 %v3948_v16  ;;  %3616 = vmatprep.mubr.bf16.mxu1 %v3950_v19 }
  0x60   :  { %3630 = vmatprep.subr.bf16.mxu1 %v3949_v18 }
  0x63   :  { %3631 = vmatpush3.bf16.msra.mxu1 %v3949_v18 }
  0x64   :  { %3632 = vmatprep.subr.bf16.mxu1 %v3952_v21 }
  0x66   :  { %3617 = vmatmul.mubr.bf16.gmra.mrb[8].mxu1 %v3951_v23 }
  0x67   :  { %3633 = vmatpush3.bf16.msra.mxu1 %v3952_v21  ;;  %3620 = vmatprep.mubr.bf16.mxu1 %v3954_v24  ;;  %v4381_v24 = vld [vmem:[%s5566_s3] ss:$0 sm:$0xff] }
  0x68   :  { %3634 = vmatprep.subr.bf16.mxu1 %v3953_v25 }
  0x6b   :  { %3635 = vmatpush3.bf16.msra.mxu1 %v3953_v25 }
  0x6c   :  { %3636 = vmatprep.subr.bf16.mxu1 %v3956_v27 }
  0x6e   :  { %3621 = vmatmul.mubr.bf16.gmra.mrb[12].mxu1 %v3955_v29 }
  0x6f   :  { %3637 = vmatpush3.bf16.msra.mxu1 %v3956_v27  ;;  %3640 = vmatprep.mubr.bf16.mxu1 %v3958_v30 }
  0x70   :  { %3638 = vmatprep.subr.bf16.mxu1 %v3957_v31 }
  0x73   :  { %3639 = vmatpush3.bf16.msra.mxu1 %v3957_v31 }
  0x76   :  { %3641 = vmatmul.mubr.bf16.vlgmr.msra.gmra.mrb[16].mxu1 %v3959_v32 }
  0x77   :  { %3644 = vmatprep.mubr.bf16.mxu1 %v3960_v33 }
  0x7e   :  { %3645 = vmatmul.mubr.bf16.gmra.mrb[20].mxu1 %v3961_v34 }
  0x7f   :  { %3648 = vmatprep.mubr.bf16.mxu1 %v3962_v35 }
  0x86   :  { %3649 = vmatmul.mubr.bf16.gmra.mrb[24].mxu1 %v3963_v36 }
  0x87   :  { %3652 = vmatprep.mubr.bf16.mxu1 %v3964_v37 }
  0x8e   :  { %3653 = vmatmul.mubr.bf16.gmra.mrb[28].mxu1 %v3965_v38 }
  0x8f   :  { %3720 = vmatprep.mubr.bf16.mxu1 %v4374_v4 }
 0x129   :  { %v3610_v40 = vpop.f32.mrb[0].mxu1 }
 0x12a   :  { %v303_v41 = vpop.f32.mrb[1].mxu1 }
 0x12b   :  { %v3611_v42 = vpop.f32.mrb[2].mxu1 }
 0x12c   :  { %v560_v43 = vpack.c.bf16 %v3611_v42, %v3610_v40  ;;  %v306_v44 = vpop.f32.mrb[3].mxu1 }
 0x12d   :  { %v559_v45 = vpack.c.bf16 %v306_v44, %v303_v41 }
 0x12f   :  { %3672 = vmatprep.mubr.bf16.mxu0 %v559_v45 }
 0x130   :  { %3673 = vmatmul.mubr.bf16.vlgmr.msra.gmra.mrb[0].mxu0 %v560_v43 }
 0x131   :  { %v3614_v46 = vpop.f32.mrb[4].mxu1 }
 0x132   :  { %v319_v47 = vpop.f32.mrb[5].mxu1 }
 0x133   :  { %v3615_v48 = vpop.f32.mrb[6].mxu1 }
 0x134   :  { %v562_v49 = vpack.c.bf16 %v3615_v48, %v3614_v46  ;;  %v322_v50 = vpop.f32.mrb[7].mxu1 }
 0x135   :  { %v561_v51 = vpack.c.bf16 %v322_v50, %v319_v47 }
 0x137   :  { %3676 = vmatprep.mubr.bf16.mxu0 %v561_v51 }
 0x138   :  { %3677 = vmatmul.mubr.bf16.gmra.mrb[4].mxu0 %v562_v49 }
 0x139   :  { %v3618_v52 = vpop.f32.mrb[8].mxu1 }
 0x13a   :  { %v335_v53 = vpop.f32.mrb[9].mxu1 }
 0x13b   :  { %v3619_v54 = vpop.f32.mrb[10].mxu1 }
 0x13c   :  { %v564_v55 = vpack.c.bf16 %v3619_v54, %v3618_v52  ;;  %v338_v56 = vpop.f32.mrb[11].mxu1 }
 0x13d   :  { %v563_v57 = vpack.c.bf16 %v338_v56, %v335_v53 }
 0x13f   :  { %3680 = vmatprep.mubr.bf16.mxu0 %v563_v57 }
 0x140   :  { %3681 = vmatmul.mubr.bf16.gmra.mrb[8].mxu0 %v564_v55 }
 0x141   :  { %v3622_v58 = vpop.f32.mrb[12].mxu1 }
 0x142   :  { %v351_v59 = vpop.f32.mrb[13].mxu1 }
 0x143   :  { %v3623_v60 = vpop.f32.mrb[14].mxu1 }
 0x144   :  { %v566_v61 = vpack.c.bf16 %v3623_v60, %v3622_v58  ;;  %v354_v62 = vpop.f32.mrb[15].mxu1 }
 0x145   :  { %v565_v63 = vpack.c.bf16 %v354_v62, %v351_v59 }
 0x147   :  { %3684 = vmatprep.mubr.bf16.mxu0 %v565_v63 }
 0x148   :  { %3685 = vmatmul.mubr.bf16.gmra.mrb[12].mxu0 %v566_v61 }
 0x149   :  { %v3642_v0 = vpop.f32.mrb[16].mxu1 }
 0x14a   :  { %v496_v1 = vpop.f32.mrb[17].mxu1 }
 0x14b   :  { %v3643_v2 = vpop.f32.mrb[18].mxu1 }
 0x14c   :  { %v568_v3 = vpack.c.bf16 %v3643_v2, %v3642_v0  ;;  %v499_v4 = vpop.f32.mrb[19].mxu1 }
 0x14d   :  { %v567_v5 = vpack.c.bf16 %v499_v4, %v496_v1 }
 0x14f   :  { %3688 = vmatprep.mubr.bf16.mxu0 %v567_v5 }
 0x150   :  { %3689 = vmatmul.mubr.bf16.gmra.mrb[16].mxu0 %v568_v3 }
 0x151   :  { %v3646_v6 = vpop.f32.mrb[20].mxu1 }
 0x152   :  { %v512_v7 = vpop.f32.mrb[21].mxu1 }
 0x153   :  { %v3647_v8 = vpop.f32.mrb[22].mxu1 }
 0x154   :  { %v570_v9 = vpack.c.bf16 %v3647_v8, %v3646_v6  ;;  %v515_v10 = vpop.f32.mrb[23].mxu1 }
 0x155   :  { %v569_v11 = vpack.c.bf16 %v515_v10, %v512_v7 }
 0x157   :  { %3692 = vmatprep.mubr.bf16.mxu0 %v569_v11 }
 0x158   :  { %3693 = vmatmul.mubr.bf16.gmra.mrb[20].mxu0 %v570_v9 }
 0x159   :  { %v3650_v12 = vpop.f32.mrb[24].mxu1 }
 0x15a   :  { %v528_v13 = vpop.f32.mrb[25].mxu1 }
 0x15b   :  { %v3651_v14 = vpop.f32.mrb[26].mxu1 }
 0x15c   :  { %v572_v15 = vpack.c.bf16 %v3651_v14, %v3650_v12  ;;  %v531_v16 = vpop.f32.mrb[27].mxu1 }
 0x15d   :  { %v571_v17 = vpack.c.bf16 %v531_v16, %v528_v13 }
 0x15f   :  { %3696 = vmatprep.mubr.bf16.mxu0 %v571_v17 }
 0x160   :  { %3697 = vmatmul.mubr.bf16.gmra.mrb[24].mxu0 %v572_v15 }
 0x161   :  { %v3654_v18 = vpop.f32.mrb[28].mxu1 }
 0x162   :  { %v544_v19 = vpop.f32.mrb[29].mxu1 }
 0x163   :  { %v3655_v20 = vpop.f32.mrb[30].mxu1 }
 0x164   :  { %v574_v21 = vpack.c.bf16 %v3655_v20, %v3654_v18  ;;  %v547_v22 = vpop.f32.mrb[31].mxu1 }
 0x165   :  { %v573_v23 = vpack.c.bf16 %v547_v22, %v544_v19 }
 0x167   :  { %3700 = vmatprep.mubr.bf16.mxu0 %v573_v23 }
 0x168   :  { %3701 = vmatmul.mubr.bf16.gmra.mrb[28].mxu0 %v574_v21 }
 0x203   :  { %v3674_v25 = vpop.f32.mrb[0].mxu0 }
 0x204   :  { %v4384_v26 = vadd.f32 %v3674_v25, %v4381_v24  ;;  %v657_v27 = vpop.f32.mrb[1].mxu0 }
 0x205   :  { %v3675_v28 = vpop.f32.mrb[2].mxu0  ;;  %v4387_v29 = vadd.f32 %v4381_v24, %v657_v27 }
 0x206   :  { %v4390_v30 = vadd.f32 %v3675_v28, %v4381_v24  ;;  %v660_v31 = vpop.f32.mrb[3].mxu0  ;;  %v824_v32 = vmul.f32 %v4384_v26, %v4384_v26 }
 0x207   :  { %v4397_v34 = vadd.f32 %v4381_v24, %v660_v31  ;;  %v822_v35 = vmul.f32 %v4387_v29, %v4387_v29 }
 0x208   :  { %858 = vadd.xlane.f32.xlu0 %v824_v32  ;;  %v825_v33 = vmul.f32 %v4390_v30, %v4390_v30 }
 0x209   :  { %v823_v42 = vmul.f32 %v4397_v34, %v4397_v34 }
 0x20a   :  { %860 = vadd.xlane.f32.xlu1 %v825_v33 }
 0x20b   :  { %v3678_v36 = vpop.f32.mrb[4].mxu0 }
 0x20c   :  { %854 = vadd.xlane.f32.xlu0 %v822_v35  ;;  %v673_v37 = vpop.f32.mrb[5].mxu0  ;;  %v4402_v39 = vadd.f32 %v3678_v36, %v4381_v24 }
 0x20d   :  { %v3679_v38 = vpop.f32.mrb[6].mxu0  ;;  %v4415_v45 = vadd.f32 %v4381_v24, %v673_v37 }
 0x20e   :  { %v4405_v40 = vadd.f32 %v3679_v38, %v4381_v24  ;;  %v676_v41 = vpop.f32.mrb[7].mxu0  ;;  %v828_v46 = vmul.f32 %v4402_v39, %v4402_v39 }
 0x20f   :  { %v4410_v43 = vadd.f32 %v4381_v24, %v676_v41  ;;  %v826_v54 = vmul.f32 %v4415_v45, %v4415_v45 }
 0x210   :  { %856 = vadd.xlane.f32.xlu0 %v823_v42  ;;  %v829_v44 = vmul.f32 %v4405_v40, %v4405_v40 }
 0x211   :  { %v827_v49 = vmul.f32 %v4410_v43, %v4410_v43 }
 0x212   :  { %868 = vadd.xlane.f32.xlu1 %v829_v44 }
 0x213   :  { %v3682_v47 = vpop.f32.mrb[8].mxu0 }
 0x214   :  { %866 = vadd.xlane.f32.xlu0 %v828_v46  ;;  %v689_v48 = vpop.f32.mrb[9].mxu0  ;;  %v4422_v51 = vadd.f32 %v3682_v47, %v4381_v24 }
 0x215   :  { %v3683_v50 = vpop.f32.mrb[10].mxu0  ;;  %v4435_v57 = vadd.f32 %v4381_v24, %v689_v48 }
 0x216   :  { %v4425_v52 = vadd.f32 %v3683_v50, %v4381_v24  ;;  %864 = vadd.xlane.f32.xlu1 %v827_v49  ;;  %v692_v53 = vpop.f32.mrb[11].mxu0  ;;  %v832_v58 = vmul.f32 %v4422_v51, %v4422_v51 }
 0x217   :  { %v4430_v55 = vadd.f32 %v4381_v24, %v692_v53  ;;  %v830_v1 = vmul.f32 %v4435_v57, %v4435_v57 }
 0x218   :  { %862 = vadd.xlane.f32.xlu0 %v826_v54  ;;  %v833_v56 = vmul.f32 %v4425_v52, %v4425_v52 }
 0x219   :  { %v831_v61 = vmul.f32 %v4430_v55, %v4430_v55 }
 0x21a   :  { %876 = vadd.xlane.f32.xlu1 %v833_v56 }
 0x21b   :  { %v3686_v59 = vpop.f32.mrb[12].mxu0 }
 0x21c   :  { %874 = vadd.xlane.f32.xlu0 %v832_v58  ;;  %v705_v60 = vpop.f32.mrb[13].mxu0  ;;  %v4514_v49 = vadd.f32 %v3686_v59, %v4381_v24 }
 0x21d   :  { %v4441_v62 = vpop.f32.mrb[14].mxu0  ;;  %v4444_v63 = vadd.f32 %v4381_v24, %v705_v60 }
 0x21e   :  { %872 = vadd.xlane.f32.xlu1 %v831_v61  ;;  %v708_v0 = vpop.f32.mrb[15].mxu0  ;;  %v836_v61 = vmul.f32 %v4514_v49, %v4514_v49 }
 0x21f   :  { %v4449_v2 = vadd.f32 %v4381_v24, %v708_v0  ;;  %v834_v4 = vmul.f32 %v4444_v63, %v4444_v63 }
 0x220   :  { %870 = vadd.xlane.f32.xlu0 %v830_v1  ;;  %v4531_v1 = vadd.f32 %v4441_v62, %v4381_v24 }
 0x221   :  { %v835_v3 = vmul.f32 %v4449_v2, %v4449_v2 }
 0x223   :  { %880 = vadd.xlane.f32.xlu1 %v835_v3  ;;  %v3690_v5 = vpop.f32.mrb[16].mxu0 }
 0x224   :  { %v4456_v6 = vadd.f32 %v3690_v5, %v4381_v24  ;;  %878 = vadd.xlane.f32.xlu0 %v834_v4  ;;  %v721_v7 = vpop.f32.mrb[17].mxu0  ;;  %v837_v5 = vmul.f32 %v4531_v1, %v4531_v1 }
 0x225   :  { %v4459_v8 = vadd.f32 %v4381_v24, %v721_v7  ;;  %v3691_v9 = vpop.f32.mrb[18].mxu0 }
 0x226   :  { %v724_v10 = vpop.f32.mrb[19].mxu0  ;;  %v840_v11 = vmul.f32 %v4456_v6, %v4456_v6  ;;  %v4464_v12 = vadd.f32 %v3691_v9, %v4381_v24 }
 0x227   :  { %v838_v13 = vmul.f32 %v4459_v8, %v4459_v8  ;;  %v4469_v14 = vadd.f32 %v4381_v24, %v724_v10 }
 0x228   :  { %890 = vadd.xlane.f32.xlu0 %v840_v11  ;;  %v841_v16 = vmul.f32 %v4464_v12, %v4464_v12 }
 0x229   :  { %886 = vadd.xlane.f32.xlu1 %v838_v13  ;;  %v839_v25 = vmul.f32 %v4469_v14, %v4469_v14 }
 0x22b   :  { %v3694_v15 = vpop.f32.mrb[20].mxu0 }
 0x22c   :  { %v4474_v17 = vadd.f32 %v3694_v15, %v4381_v24  ;;  %v737_v18 = vpop.f32.mrb[21].mxu0 }
 0x22d   :  { %892 = vadd.xlane.f32.xlu1 %v841_v16  ;;  %v4477_v19 = vadd.f32 %v4381_v24, %v737_v18  ;;  %v3695_v20 = vpop.f32.mrb[22].mxu0 }
 0x22e   :  { %v844_v21 = vmul.f32 %v4474_v17, %v4474_v17  ;;  %v4482_v22 = vadd.f32 %v3695_v20, %v4381_v24  ;;  %v740_v23 = vpop.f32.mrb[23].mxu0 }
 0x22f   :  { %v842_v27 = vmul.f32 %v4477_v19, %v4477_v19  ;;  %v4491_v31 = vadd.f32 %v4381_v24, %v740_v23 }
 0x230   :  { %898 = vadd.xlane.f32.xlu0 %v844_v21  ;;  %v845_v28 = vmul.f32 %v4482_v22, %v4482_v22 }
 0x231   :  { %888 = vadd.xlane.f32.xlu1 %v839_v25  ;;  %v843_v44 = vmul.f32 %v4491_v31, %v4491_v31 }
 0x233   :  { %v3698_v32 = vpop.f32.mrb[24].mxu0 }
 0x234   :  { %v4494_v33 = vadd.f32 %v3698_v32, %v4381_v24  ;;  %894 = vadd.xlane.f32.xlu0 %v842_v27  ;;  %v753_v35 = vpop.f32.mrb[25].mxu0 }
 0x235   :  { %900 = vadd.xlane.f32.xlu1 %v845_v28  ;;  %v4497_v36 = vadd.f32 %v4381_v24, %v753_v35  ;;  %v3699_v37 = vpop.f32.mrb[26].mxu0 }
 0x236   :  { %v848_v38 = vmul.f32 %v4494_v33, %v4494_v33  ;;  %v4502_v41 = vadd.f32 %v3699_v37, %v4381_v24  ;;  %v756_v42 = vpop.f32.mrb[27].mxu0 }
 0x237   :  { %v846_v46 = vmul.f32 %v4497_v36, %v4497_v36  ;;  %v4509_v47 = vadd.f32 %v4381_v24, %v756_v42 }
 0x238   :  { %906 = vadd.xlane.f32.xlu0 %v848_v38  ;;  %v849_v48 = vmul.f32 %v4502_v41, %v4502_v41 }
 0x239   :  { %896 = vadd.xlane.f32.xlu1 %v843_v44  ;;  %v847_v58 = vmul.f32 %v4509_v47, %v4509_v47 }
 0x23b   :  { %v3702_v50 = vpop.f32.mrb[28].mxu0 }
 0x23c   :  { %902 = vadd.xlane.f32.xlu0 %v846_v46  ;;  %v4517_v53 = vadd.f32 %v3702_v50, %v4381_v24  ;;  %v769_v54 = vpop.f32.mrb[29].mxu0 }
 0x23d   :  { %908 = vadd.xlane.f32.xlu1 %v849_v48  ;;  %v4520_v56 = vadd.f32 %v4381_v24, %v769_v54  ;;  %v3703_v60 = vpop.f32.mrb[30].mxu0 }
 0x23e   :  { %v4527_v59 = vadd.f32 %v3703_v60, %v4381_v24  ;;  %v772_v0 = vpop.f32.mrb[31].mxu0  ;;  %v852_v7 = vmul.f32 %v4517_v53, %v4517_v53 }
 0x23f   :  { %v4534_v3 = vadd.f32 %v4381_v24, %v772_v0  ;;  %v850_v4 = vmul.f32 %v4520_v56, %v4520_v56 }
 0x240   :  { %882 = vadd.xlane.f32.xlu0 %v836_v61  ;;  %v853_v24 = vmul.f32 %v4527_v59, %v4527_v59 }
 0x241   :  { %904 = vadd.xlane.f32.xlu1 %v847_v58  ;;  %v851_v62 = vmul.f32 %v4534_v3, %v4534_v3 }
 0x244   :  { %910 = vadd.xlane.f32.xlu0 %v850_v4 }
 0x245   :  { %884 = vadd.xlane.f32.xlu1 %v837_v5 }
 0x248   :  { %914 = vadd.xlane.f32.xlu0 %v852_v7 }
 0x249   :  { %912 = vadd.xlane.f32.xlu1 %v851_v62 }
 0x24d   :  { %916 = vadd.xlane.f32.xlu1 %v853_v24 }
 0x295   :  { %v859_v9 = vpop.xlane.xlu0 %858 }
 0x296   :  { %v920_v28 = vmax.f32 %v859_v9, 1e-24 }
 0x297   :  { %v861_v11 = vpop.xlane.xlu1 %860 }
 0x298   :  { %v921_v35 = vmax.f32 %v861_v11, 1e-24  ;;  %3990 = vrsqrt.f32 %v920_v28 }
 0x299   :  { %v855_v10 = vpop.xlane.xlu0 %854 }
 0x29a   :  { %v918_v38 = vmax.f32 %v855_v10, 1e-24  ;;  %3992 = vrsqrt.f32 %v921_v35 }
 0x29c   :  { %3994 = vrsqrt.f32 %v918_v38 }
 0x29d   :  { %v857_v13 = vpop.xlane.xlu0 %856 }
 0x29e   :  { %v919_v50 = vmax.f32 %v857_v13, 1e-24 }
 0x29f   :  { %v4546_v15 = vpop.xlane.xlu1 %868 }
 0x2a1   :  { %v867_v16 = vpop.xlane.xlu0 %866 }
 0x2a2   :  { %v3991_v61 = vpop.eup %3990  ;;  %v924_v62 = vmax.f32 %v867_v16, 1e-24 }
 0x2a3   :  { %v4548_v18 = vpop.xlane.xlu1 %864  ;;  %v984_v10 = vmul.f32 %v3991_v61, %v4384_v26 }
 0x2a4   :  { %v3993_v7 = vpop.eup %3992 }
 0x2a5   :  { %v863_v20 = vpop.xlane.xlu0 %862  ;;  %v985_v61 = vmul.f32 %v3993_v7, %v4390_v30 }
 0x2a6   :  { %v3995_v24 = vpop.eup %3994 }
 0x2a7   :  { %v4550_v21 = vpop.xlane.xlu1 %876  ;;  %v982_v26 = vmul.f32 %v3995_v24, %v4387_v29  ;;  %v4580_v30 = vmax.f32 %v985_v61, 0.0 }
 0x2a9   :  { %v4552_v23 = vpop.xlane.xlu0 %874 }
 0x2ab   :  { %v4554_v25 = vpop.xlane.xlu1 %872 }
 0x2ad   :  { %v4556_v27 = vpop.xlane.xlu0 %870 }
 0x2b0   :  { %v4560_v37 = vpop.xlane.xlu1 %880 }
 0x2b1   :  { %v4558_v32 = vpop.xlane.xlu0 %878 }
 0x2b5   :  { %v891_v42 = vpop.xlane.xlu0 %890 }
 0x2b6   :  { %v936_v44 = vmax.f32 %v891_v42, 1e-24  ;;  %v887_v46 = vpop.xlane.xlu1 %886 }
 0x2b7   :  { %v934_v48 = vmax.f32 %v887_v46, 1e-24 }
 0x2b8   :  { %3996 = vrsqrt.f32 %v936_v44  ;;  %v922_v44 = vmax.f32 %v863_v20, 1e-24 }
 0x2b9   :  { %3998 = vrsqrt.f32 %v934_v48  ;;  %v925_v48 = vmax.f32 %v4546_v15, 1e-24 }
 0x2ba   :  { %v893_v54 = vpop.xlane.xlu1 %892  ;;  %4000 = vrsqrt.f32 %v919_v50  ;;  %v4566_v50 = vmax.f32 %v984_v10, 0.0 }
 0x2bb   :  { %v937_v58 = vmax.f32 %v893_v54, 1e-24 }
 0x2bd   :  { %4002 = vrsqrt.f32 %v937_v58  ;;  %v899_v60 = vpop.xlane.xlu0 %898 }
 0x2be   :  { %v940_v0 = vmax.f32 %v899_v60, 1e-24  ;;  %v889_v4 = vpop.xlane.xlu1 %888 }
 0x2bf   :  { %v935_v5 = vmax.f32 %v889_v4, 1e-24  ;;  %v923_v4 = vmax.f32 %v4548_v18, 1e-24 }
 0x2c1   :  { %4004 = vrsqrt.f32 %v935_v5  ;;  %v895_v9 = vpop.xlane.xlu0 %894  ;;  %v4578_v5 = vmax.f32 %v982_v26, 0.0 }
 0x2c2   :  { %v3997_v11 = vpop.eup %3996  ;;  %4006 = vrsqrt.f32 %v940_v0  ;;  %v938_v13 = vmax.f32 %v895_v9, 1e-24  ;;  %v901_v28 = vpop.xlane.xlu1 %900 }
 0x2c3   :  { %v3999_v35 = vpop.eup %3998  ;;  %v941_v38 = vmax.f32 %v901_v28, 1e-24  ;;  %v1000_v42 = vmul.f32 %v3997_v11, %v4456_v6  ;;  %4008 = vrsqrt.f32 %v924_v62  ;;  %v928_v28 = vmax.f32 %v4552_v23, 1e-24 }
 0x2c4   :  { %v998_v46 = vmul.f32 %v3999_v35, %v4459_v8  ;;  %v4001_v58 = vpop.eup %4000  ;;  %4010 = vrsqrt.f32 %v938_v13 }
 0x2c5   :  { %v907_v16 = vpop.xlane.xlu0 %906  ;;  %v4568_v54 = vmax.f32 %v1000_v42, 0.0  ;;  %4012 = vrsqrt.f32 %v941_v38  ;;  %v983_v24 = vmul.f32 %v4001_v58, %v4397_v34  ;;  %v1112_v34 = vmul.f32 %v4566_v50, %v4566_v50 }
 0x2c6   :  { %v897_v60 = vpop.xlane.xlu1 %896  ;;  %v4574_v20 = vmax.f32 %v998_v46, 0.0  ;;  %4014 = vrsqrt.f32 %v922_v44  ;;  %v944_v38 = vmax.f32 %v907_v16, 1e-24 }
 0x2c7   :  { %v4003_v0 = vpop.eup %4002  ;;  %v939_v6 = vmax.f32 %v897_v60, 1e-24  ;;  %v1052_v8 = vadd.f32 %v4568_v54, %v4566_v50  ;;  %4016 = vrsqrt.f32 %v925_v48  ;;  %v4595_v44 = vmax.f32 %v983_v24, 0.0 }
 0x2c8   :  { %v1001_v15 = vmul.f32 %v4003_v0, %v4464_v12  ;;  %v1046_v10 = vadd.f32 %v4574_v20, %v4578_v5  ;;  %v1128_v12 = vmul.f32 %v4568_v54, %v4568_v54  ;;  %v1110_v0 = vmul.f32 %v4578_v5, %v4578_v5 }
 0x2c9   :  { %v903_v29 = vpop.xlane.xlu0 %902  ;;  %1053 = vadd.xlane.f32.xlu0 %v1052_v8  ;;  %4018 = vrsqrt.f32 %v939_v6 }
 0x2ca   :  { %v909_v62 = vpop.xlane.xlu1 %908  ;;  %v4582_v7 = vmax.f32 %v1001_v15, 0.0  ;;  %4020 = vrsqrt.f32 %v923_v4  ;;  %v1148_v26 = vadd.f32 %v1128_v12, %v1112_v34  ;;  %v942_v15 = vmax.f32 %v903_v29, 1e-24 }
 0x2cb   :  { %v4005_v9 = vpop.eup %4004  ;;  %4022 = vrsqrt.f32 %v928_v28  ;;  %v945_v24 = vmax.f32 %v909_v62, 1e-24  ;;  %v929_v34 = vmax.f32 %v4550_v21, 1e-24 }
 0x2cc   :  { %v4007_v18 = vpop.eup %4006  ;;  %v1055_v11 = vadd.f32 %v4582_v7, %v4580_v30  ;;  %v999_v13 = vmul.f32 %v4005_v9, %v4469_v14  ;;  %v1126_v14 = vmul.f32 %v4574_v20, %v4574_v20  ;;  %v1129_v16 = vmul.f32 %v4582_v7, %v4582_v7 }
 0x2cd   :  { %1047 = vadd.xlane.f32.xlu0 %v1046_v10  ;;  %v4009_v35 = vpop.eup %4008  ;;  %v4599_v48 = vpop.xlane.xlu0 %882  ;;  %v1004_v23 = vmul.f32 %v4007_v18, %v4474_v17  ;;  %4024 = vrsqrt.f32 %v944_v38  ;;  %v1113_v17 = vmul.f32 %v4580_v30, %v4580_v30  ;;  %v926_v18 = vmax.f32 %v4556_v27, 1e-24 }
 0x2ce   :  { %v905_v42 = vpop.xlane.xlu1 %904  ;;  %1056 = vadd.xlane.f32.xlu1 %v1055_v11  ;;  %v4597_v46 = vmax.f32 %v999_v13, 0.0  ;;  %v4011_v58 = vpop.eup %4010  ;;  %v988_v6 = vmul.f32 %v4009_v35, %v4402_v39  ;;  %v1142_v9 = vadd.f32 %v1126_v14, %v1110_v0  ;;  %4026 = vrsqrt.f32 %v942_v15 }
 0x2cf   :  { %v4013_v61 = vpop.eup %4012  ;;  %v4613_v10 = vmax.f32 %v1004_v23, 0.0  ;;  %v1002_v12 = vmul.f32 %v4011_v58, %v4477_v19  ;;  %v1151_v13 = vadd.f32 %v1129_v16, %v1113_v17  ;;  %v1111_v27 = vmul.f32 %v4595_v44, %v4595_v44 }
 0x2d0   :  { %v1049_v60 = vadd.f32 %v4597_v46, %v4595_v44  ;;  %v4015_v8 = vpop.eup %4014  ;;  %v1127_v39 = vmul.f32 %v4597_v46, %v4597_v46  ;;  %v1005_v29 = vmul.f32 %v4013_v61, %v4482_v22  ;;  %v4625_v62 = vmax.f32 %v988_v6, 0.0 }
 0x2d1   :  { %1149 = vadd.xlane.f32.xlu0 %v1148_v26  ;;  %v4017_v4 = vpop.eup %4016  ;;  %v4623_v35 = vpop.xlane.xlu0 %910  ;;  %v986_v19 = vmul.f32 %v4015_v8, %v4415_v45  ;;  %4028 = vrsqrt.f32 %v945_v24  ;;  %v943_v22 = vmax.f32 %v905_v42, 1e-24  ;;  %v4633_v14 = vmax.f32 %v1002_v12, 0.0 }
 0x2d2   :  { %1050 = vadd.xlane.f32.xlu1 %v1049_v60  ;;  %v4617_v11 = vpop.xlane.xlu1 %884  ;;  %v989_v38 = vmul.f32 %v4017_v4, %v4405_v40  ;;  %v1064_v21 = vadd.f32 %v4613_v10, %v4625_v62  ;;  %4030 = vrsqrt.f32 %v926_v18  ;;  %v1145_v23 = vadd.f32 %v1127_v39, %v1111_v27 }
 0x2d3   :  { %v4019_v28 = vpop.eup %4018  ;;  %v4635_v58 = vmax.f32 %v1005_v29, 0.0  ;;  %4032 = vrsqrt.f32 %v929_v34  ;;  %v927_v60 = vmax.f32 %v4554_v25, 1e-24  ;;  %v4639_v16 = vmax.f32 %v986_v19, 0.0 }
 0x2d4   :  { %v4021_v26 = vpop.eup %4020  ;;  %v1003_v45 = vmul.f32 %v4019_v28, %v4491_v31  ;;  %v4643_v42 = vmax.f32 %v989_v38, 0.0  ;;  %4034 = vrsqrt.f32 %v943_v22  ;;  %v1132_v31 = vmul.f32 %v4613_v10, %v4613_v10 }
 0x2d5   :  { %1143 = vadd.xlane.f32.xlu0 %v1142_v9  ;;  %v987_v61 = vmul.f32 %v4021_v26, %v4410_v43  ;;  %v4023_v0 = vpop.eup %4022  ;;  %v915_v6 = vpop.xlane.xlu0 %914  ;;  %v1058_v8 = vadd.f32 %v4633_v14, %v4639_v16  ;;  %4036 = vrsqrt.f32 %v927_v60  ;;  %v1116_v43 = vmul.f32 %v4625_v62, %v4625_v62 }
 0x2d6   :  { %1152 = vadd.xlane.f32.xlu1 %v1151_v13  ;;  %v4641_v40 = vpop.xlane.xlu1 %912  ;;  %v1067_v15 = vadd.f32 %v4635_v58, %v4643_v42  ;;  %v4652_v17 = vmax.f32 %v1003_v45, 0.0  ;;  %v948_v4 = vmax.f32 %v915_v6, 1e-24  ;;  %v1130_v12 = vmul.f32 %v4633_v14, %v4633_v14 }
 0x2d7   :  { %v4025_v25 = vpop.eup %4024  ;;  %v4656_v24 = vmax.f32 %v987_v61, 0.0  ;;  %v1160_v9 = vadd.f32 %v1132_v31, %v1116_v43  ;;  %v932_v39 = vmax.f32 %v4599_v48, 1e-24  ;;  %v1133_v34 = vmul.f32 %v4635_v58, %v4635_v58 }
 0x2d8   :  { %v1008_v18 = vmul.f32 %v4025_v25, %v4494_v33  ;;  %v4027_v13 = vpop.eup %4026  ;;  %v1114_v27 = vmul.f32 %v4639_v16, %v4639_v16  ;;  %v992_v38 = vmul.f32 %v4023_v0, %v4422_v51  ;;  %v930_v33 = vmax.f32 %v4558_v32, 1e-24 }
 0x2d9   :  { %1065 = vadd.xlane.f32.xlu0 %v1064_v21  ;;  %v1061_v28 = vadd.f32 %v4652_v17, %v4656_v24  ;;  %v946_v22 = vmax.f32 %v4623_v35, 1e-24  ;;  %4038 = vrsqrt.f32 %v948_v4  ;;  %v1117_v48 = vmul.f32 %v4643_v42, %v4643_v42 }
 0x2da   :  { %1146 = vadd.xlane.f32.xlu1 %v1145_v23  ;;  %v917_v29 = vpop.xlane.xlu1 %916  ;;  %v1154_v45 = vadd.f32 %v1130_v12, %v1114_v27  ;;  %v4673_v60 = vmax.f32 %v1008_v18, 0.0  ;;  %v1006_v61 = vmul.f32 %v4027_v13, %v4497_v36  ;;  %4040 = vrsqrt.f32 %v932_v39 }
 0x2db   :  { %v4029_v19 = vpop.eup %4028  ;;  %v949_v23 = vmax.f32 %v917_v29, 1e-24  ;;  %v1163_v6 = vadd.f32 %v1133_v34, %v1117_v48  ;;  %v1131_v51 = vmul.f32 %v4652_v17, %v4652_v17  ;;  %v933_v0 = vmax.f32 %v4617_v11, 1e-24 }
 0x2dc   :  { %v4031_v26 = vpop.eup %4030  ;;  %v1009_v32 = vmul.f32 %v4029_v19, %v4502_v41  ;;  %4042 = vrsqrt.f32 %v946_v22  ;;  %v1115_v36 = vmul.f32 %v4656_v24, %v4656_v24  ;;  %v947_v43 = vmax.f32 %v4641_v40, 1e-24 }
 0x2dd   :  { %1059 = vadd.xlane.f32.xlu0 %v1058_v8  ;;  %v4033_v21 = vpop.eup %4032  ;;  %v4680_v8 = vmax.f32 %v992_v38, 0.0  ;;  %v990_v31 = vmul.f32 %v4031_v26, %v4435_v57  ;;  %4044 = vrsqrt.f32 %v949_v23  ;;  %v4689_v11 = vmax.f32 %v1006_v61, 0.0 }
 0x2de   :  { %1068 = vadd.xlane.f32.xlu1 %v1067_v15  ;;  %v4035_v35 = vpop.eup %4034  ;;  %v993_v25 = vmul.f32 %v4033_v21, %v4425_v52  ;;  %4046 = vrsqrt.f32 %v930_v33  ;;  %v1157_v4 = vadd.f32 %v1131_v51, %v1115_v36  ;;  %v931_v12 = vmax.f32 %v4560_v37, 1e-24 }
 0x2df   :  { %v4037_v15 = vpop.eup %4036  ;;  %v1076_v41 = vadd.f32 %v4673_v60, %v4680_v8  ;;  %v1007_v57 = vmul.f32 %v4035_v35, %v4509_v47  ;;  %4048 = vrsqrt.f32 %v933_v0  ;;  %v4695_v52 = vmax.f32 %v990_v31, 0.0 }
 0x2e0   :  { %v4697_v40 = vmax.f32 %v993_v25, 0.0  ;;  %v991_v18 = vmul.f32 %v4037_v15, %v4430_v55  ;;  %4050 = vrsqrt.f32 %v947_v43  ;;  %v1136_v39 = vmul.f32 %v4673_v60, %v4673_v60 }
 0x2e1   :  { %1161 = vadd.xlane.f32.xlu0 %v1160_v9  ;;  %v4691_v9 = vmax.f32 %v1009_v32, 0.0  ;;  %v1070_v13 = vadd.f32 %v4689_v11, %v4695_v52  ;;  %v4706_v37 = vmax.f32 %v1007_v57, 0.0  ;;  %4052 = vrsqrt.f32 %v931_v12 }
 0x2e2   :  { %1062 = vadd.xlane.f32.xlu1 %v1061_v28  ;;  %v1120_v28 = vmul.f32 %v4680_v8, %v4680_v8  ;;  %v4710_v55 = vmax.f32 %v991_v18, 0.0  ;;  %v1134_v27 = vmul.f32 %v4689_v11, %v4689_v11  ;;  %v1118_v21 = vmul.f32 %v4695_v52, %v4695_v52 }
 0x2e3   :  { %v4039_v29 = vpop.eup %4038  ;;  %v1079_v47 = vadd.f32 %v4691_v9, %v4697_v40  ;;  %v1137_v22 = vmul.f32 %v4691_v9, %v4691_v9  ;;  %v1121_v61 = vmul.f32 %v4697_v40, %v4697_v40  ;;  %v1135_v0 = vmul.f32 %v4706_v37, %v4706_v37 }
 0x2e4   :  { %v4041_v34 = vpop.eup %4040  ;;  %v1172_v19 = vadd.f32 %v1136_v39, %v1120_v28  ;;  %v1012_v38 = vmul.f32 %v4039_v29, %v4517_v53  ;;  %v1073_v33 = vadd.f32 %v4706_v37, %v4710_v55  ;;  %v1119_v15 = vmul.f32 %v4710_v55, %v4710_v55 }
 0x2e5   :  { %1155 = vadd.xlane.f32.xlu0 %v1154_v45  ;;  %v996_v23 = vmul.f32 %v4041_v34, %v4514_v49  ;;  %v1175_v35 = vadd.f32 %v1137_v22, %v1121_v61 }
 0x2e6   :  { %1164 = vadd.xlane.f32.xlu1 %v1163_v6  ;;  %v4043_v26 = vpop.eup %4042  ;;  %v1166_v6 = vadd.f32 %v1134_v27, %v1118_v21  ;;  %v4724_v51 = vmax.f32 %v1012_v38, 0.0  ;;  %v1169_v57 = vadd.f32 %v1135_v0, %v1119_v15 }
 0x2e7   :  { %v4045_v48 = vpop.eup %4044  ;;  %v1010_v32 = vmul.f32 %v4043_v26, %v4520_v56  ;;  %v4730_v49 = vmax.f32 %v996_v23, 0.0 }
 0x2e8   :  { %v4047_v45 = vpop.eup %4046  ;;  %5571 = vst [vmem:[#allocation9_spill] sm:$0xff] %v4724_v51  ;;  %v1013_v31 = vmul.f32 %v4045_v48, %v4527_v59 }
 0x2e9   :  { %1077 = vadd.xlane.f32.xlu0 %v1076_v41  ;;  %v4049_v53 = vpop.eup %4048  ;;  %v994_v25 = vmul.f32 %v4047_v45, %v4444_v63  ;;  %v1088_v56 = vadd.f32 %v4724_v51, %v4730_v49  ;;  %v1124_v38 = vmul.f32 %v4730_v49, %v4730_v49 }
 0x2ea   :  { %1158 = vadd.xlane.f32.xlu1 %v1157_v4  ;;  %v4051_v36 = vpop.eup %4050  ;;  %v997_v43 = vmul.f32 %v4049_v53, %v4531_v1  ;;  %v4738_v4 = vmax.f32 %v1010_v32, 0.0  ;;  %v4740_v59 = vmax.f32 %v1013_v31, 0.0 }
 0x2eb   :  { %v4053_v41 = vpop.eup %4052  ;;  %v1011_v12 = vmul.f32 %v4051_v36, %v4534_v3  ;;  %v4743_v18 = vmax.f32 %v994_v25, 0.0 }
 0x2ec   :  { %v4745_v63 = vmax.f32 %v997_v43, 0.0  ;;  %v1138_v39 = vmul.f32 %v4738_v4, %v4738_v4  ;;  %v1141_v48 = vmul.f32 %v4740_v59, %v4740_v59 }
 0x2ed   :  { %1071 = vadd.xlane.f32.xlu0 %v1070_v13  ;;  %v995_v13 = vmul.f32 %v4053_v41, %v4449_v2  ;;  %v1082_v1 = vadd.f32 %v4738_v4, %v4743_v18  ;;  %v1122_v3 = vmul.f32 %v4743_v18, %v4743_v18  ;;  %v1140_v2 = vmul.f32 %v4724_v51, %v4724_v51 }
 0x2ee   :  { %1080 = vadd.xlane.f32.xlu1 %v1079_v47  ;;  %v1091_v29 = vadd.f32 %v4740_v59, %v4745_v63  ;;  %v4754_v47 = vmax.f32 %v1011_v12, 0.0  ;;  %v1125_v21 = vmul.f32 %v4745_v63, %v4745_v63 }
 0x2ef   :  { %v4758_v28 = vmax.f32 %v995_v13, 0.0  ;;  %v1178_v34 = vadd.f32 %v1138_v39, %v1122_v3 }
 0x2f0   :  { %v1139_v27 = vmul.f32 %v4754_v47, %v4754_v47  ;;  %v1187_v23 = vadd.f32 %v1141_v48, %v1125_v21 }
 0x2f1   :  { %1173 = vadd.xlane.f32.xlu0 %v1172_v19  ;;  %v1085_v19 = vadd.f32 %v4754_v47, %v4758_v28  ;;  %v1123_v26 = vmul.f32 %v4758_v28, %v4758_v28 }
 0x2f2   :  { %1074 = vadd.xlane.f32.xlu1 %v1073_v33  ;;  %v1184_v33 = vadd.f32 %v1140_v2, %v1124_v38 }
 0x2f3   :  { %v1181_v22 = vadd.f32 %v1139_v27, %v1123_v26 }
 0x2f5   :  { %1167 = vadd.xlane.f32.xlu0 %v1166_v6 }
 0x2f6   :  { %1176 = vadd.xlane.f32.xlu1 %v1175_v35 }
 0x2f9   :  { %1089 = vadd.xlane.f32.xlu0 %v1088_v56 }
 0x2fa   :  { %1170 = vadd.xlane.f32.xlu1 %v1169_v57 }
 0x2fd   :  { %1083 = vadd.xlane.f32.xlu0 %v1082_v1 }
 0x2fe   :  { %1092 = vadd.xlane.f32.xlu1 %v1091_v29 }
 0x301   :  { %1179 = vadd.xlane.f32.xlu0 %v1178_v34 }
 0x302   :  { %1086 = vadd.xlane.f32.xlu1 %v1085_v19 }
 0x305   :  { %1185 = vadd.xlane.f32.xlu0 %v1184_v33  ;;  %v3974_v33 = vld [vmem:[#allocation6 + $0x40] sm:$0xff]  }
 0x306   :  { %1182 = vadd.xlane.f32.xlu1 %v1181_v22  ;;  %v3975_v22 = vld [vmem:[#allocation6 + $0x48] sm:$0xff]   ;;  %3768 = vmatprep.subr.bf16.mxu0 %v3974_v33 }
 0x307   :  { %3769 = vmatpush3.bf16.msra.mxu0 %v3974_v33 }
 0x308   :  { %3770 = vmatprep.subr.bf16.mxu0 %v3975_v22 }
 0x30a   :  { %1188 = vadd.xlane.f32.xlu1 %v1187_v23 }
 0x30b   :  { %3771 = vmatpush3.bf16.msra.mxu0 %v3975_v22 }
 0x356   :  { %v1054_v45 = vpop.xlane.xlu0 %1053 }
 0x357   :  { %v4774_v53 = vmul.f32 0.015625, %v1054_v45 }
 0x359   :  { %v1208_v0 = vmul.f32 %v4774_v53, %v4774_v53 }
 0x35a   :  { %v1048_v61 = vpop.xlane.xlu0 %1047 }
 0x35b   :  { %v1057_v6 = vpop.xlane.xlu1 %1056  ;;  %v4776_v35 = vmul.f32 0.015625, %v1048_v61 }
 0x35c   :  { %v4780_v25 = vmul.f32 0.015625, %v1057_v6  ;;  %v3976_v6 = vld [vmem:[#allocation6 + $0x50] sm:$0xff]  }
 0x35d   :  { %v1206_v41 = vmul.f32 %v4776_v35, %v4776_v35  ;;  %3772 = vmatprep.subr.bf16.mxu0 %v3976_v6 }
 0x35e   :  { %v1150_v32 = vpop.xlane.xlu0 %1149  ;;  %v1209_v1 = vmul.f32 %v4780_v25, %v4780_v25  ;;  %3773 = vmatpush3.bf16.msra.mxu0 %v3976_v6 }
 0x35f   :  { %v1192_v31 = vmul.f32 0.015625, %v1150_v32  ;;  %v1051_v36 = vpop.xlane.xlu1 %1050 }
 0x360   :  { %v4784_v13 = vmul.f32 0.015625, %v1051_v36 }
 0x361   :  { %v1224_v15 = vsub.f32 %v1192_v31, %v1208_v0 }
 0x362   :  { %v1144_v43 = vpop.xlane.xlu0 %1143  ;;  %v1207_v38 = vmul.f32 %v4784_v13, %v4784_v13  ;;  %v1239_v6 = vsub.f32 %v4595_v44, %v4784_v13 }
 0x363   :  { %v1190_v56 = vmul.f32 0.015625, %v1144_v43  ;;  %v1153_v57 = vpop.xlane.xlu1 %1152  ;;  %v1272_v12 = vadd.f32 1e-05, %v1224_v15 }
 0x364   :  { %v1193_v39 = vmul.f32 0.015625, %v1153_v57  ;;  %v1256_v57 = vsub.f32 %v4568_v54, %v4774_v53 }
 0x365   :  { %v1222_v29 = vsub.f32 %v1190_v56, %v1206_v41  ;;  %4054 = vrsqrt.f32 %v1272_v12  ;;  %v3977_v41 = vld [vmem:[#allocation6 + $0x58] sm:$0xff]   ;;  %v1238_v12 = vsub.f32 %v4578_v5, %v4776_v35  ;;  %v1240_v5 = vsub.f32 %v4566_v50, %v4774_v53 }
 0x366   :  { %v1225_v3 = vsub.f32 %v1193_v39, %v1209_v1  ;;  %v1066_v34 = vpop.xlane.xlu0 %1065  ;;  %v1257_v1 = vsub.f32 %v4582_v7, %v4780_v25  ;;  %3774 = vmatprep.subr.bf16.mxu0 %v3977_v41 }
 0x367   :  { %v1270_v2 = vadd.f32 1e-05, %v1222_v29  ;;  %v1147_v19 = vpop.xlane.xlu1 %1146  ;;  %v4790_v61 = vmul.f32 0.015625, %v1066_v34  ;;  %3775 = vmatpush3.bf16.msra.mxu0 %v3977_v41 }
 0x368   :  { %v1273_v27 = vadd.f32 1e-05, %v1225_v3  ;;  %v1191_v26 = vmul.f32 0.015625, %v1147_v19 }
 0x369   :  { %4056 = vrsqrt.f32 %v1270_v2  ;;  %v1212_v43 = vmul.f32 %v4790_v61, %v4790_v61 }
 0x36a   :  { %4058 = vrsqrt.f32 %v1273_v27  ;;  %v1223_v48 = vsub.f32 %v1191_v26, %v1207_v38  ;;  %v1060_v21 = vpop.xlane.xlu0 %1059 }
 0x36b   :  { %v1069_v23 = vpop.xlane.xlu1 %1068  ;;  %v4792_v0 = vmul.f32 0.015625, %v1060_v21  ;;  %v3978_v21 = vld [vmem:[#allocation6 + $0x60] sm:$0xff]  }
 0x36c   :  { %v1271_v45 = vadd.f32 1e-05, %v1223_v48  ;;  %v4794_v15 = vmul.f32 0.015625, %v1069_v23  ;;  %v1254_v23 = vsub.f32 %v4574_v20, %v4776_v35  ;;  %3776 = vmatprep.subr.bf16.mxu0 %v3978_v21 }
 0x36d   :  { %v1210_v2 = vmul.f32 %v4792_v0, %v4792_v0  ;;  %3777 = vmatpush3.bf16.msra.mxu0 %v3978_v21 }
 0x36e   :  { %4060 = vrsqrt.f32 %v1271_v45  ;;  %v1162_v32 = vpop.xlane.xlu0 %1161  ;;  %v1213_v54 = vmul.f32 %v4794_v15, %v4794_v15  ;;  %v1241_v45 = vsub.f32 %v4580_v30, %v4780_v25  ;;  %v1255_v30 = vsub.f32 %v4597_v46, %v4784_v13 }
 0x36f   :  { %v1196_v31 = vmul.f32 0.015625, %v1162_v32  ;;  %v1063_v36 = vpop.xlane.xlu1 %1062  ;;  %v4055_v56 = vpop.eup %4054 }
 0x370   :  { %v4804_v34 = vmul.f32 0.015625, %v1063_v36  ;;  %v1320_v22 = vmul.f32 %v4055_v56, %v1256_v57 }
 0x371   :  { %v1228_v3 = vsub.f32 %v1196_v31, %v1212_v43 }
 0x372   :  { %v1156_v39 = vpop.xlane.xlu0 %1155  ;;  %v1211_v50 = vmul.f32 %v4804_v34, %v4804_v34 }
 0x373   :  { %v4057_v29 = vpop.eup %4056  ;;  %v1194_v19 = vmul.f32 0.015625, %v1156_v39  ;;  %v1165_v27 = vpop.xlane.xlu1 %1164  ;;  %v1276_v43 = vadd.f32 1e-05, %v1228_v3  ;;  %v3979_v3 = vld [vmem:[#allocation6 + $0x68] sm:$0xff]  }
 0x374   :  { %v4059_v38 = vpop.eup %4058  ;;  %v1197_v26 = vmul.f32 0.015625, %v1165_v27  ;;  %v1302_v33 = vmul.f32 %v4057_v29, %v1238_v12  ;;  %v4822_v35 = vmul.f32 %v4057_v29, %v1254_v23  ;;  %3778 = vmatprep.subr.bf16.mxu0 %v3979_v3  ;;  %v3980_v23 = vld [vmem:[#allocation6 + $0x70] sm:$0xff]  }
 0x375   :  { %v1226_v7 = vsub.f32 %v1194_v19, %v1210_v2  ;;  %v1321_v48 = vmul.f32 %v4059_v38, %v1257_v1  ;;  %v1305_v44 = vmul.f32 %v4059_v38, %v1241_v45  ;;  %4062 = vrsqrt.f32 %v1276_v43  ;;  %3779 = vmatpush3.bf16.msra.mxu0 %v3979_v3 }
 0x376   :  { %v1229_v32 = vsub.f32 %v1197_v26, %v1213_v54  ;;  %v1078_v31 = vpop.xlane.xlu0 %1077  ;;  %v1398_v36 = vmax.f32 %v1302_v33, -1e+30  ;;  %v1304_v26 = vmul.f32 %v4055_v56, %v1240_v5  ;;  %v1419_v46 = vmax.f32 %v4822_v35, -1e+30  ;;  %3780 = vmatprep.subr.bf16.mxu0 %v3980_v23 }
 0x377   :  { %v1159_v53 = vpop.xlane.xlu1 %1158  ;;  %v4820_v57 = vpack.c.bf16 %v1321_v48, %v1320_v22  ;;  %v1274_v1 = vadd.f32 1e-05, %v1226_v7  ;;  %v4829_v45 = vmul.f32 0.015625, %v1078_v31  ;;  %v3981_v31 = vld [vmem:[#allocation6 + $0x78] sm:$0xff]  }
 0x378   :  { %v4061_v12 = vpop.eup %4060  ;;  %v1195_v39 = vmul.f32 0.015625, %v1159_v53  ;;  %v1400_v20 = vmax.f32 %v1398_v36, -1e+30  ;;  %v1277_v25 = vadd.f32 1e-05, %v1229_v32  ;;  %v1472_v38 = vpack.c.bf16 %v1305_v44, %v1304_v26 }
 0x379   :  { %v1303_v2 = vmul.f32 %v4061_v12, %v1239_v6  ;;  %v4826_v36 = vmul.f32 %v4061_v12, %v1255_v30  ;;  %4064 = vrsqrt.f32 %v1274_v1  ;;  %3781 = vmatpush3.bf16.msra.mxu0 %v3980_v23  ;;  %v1245_v23 = vsub.f32 %v4643_v42, %v4794_v15 }
 0x37a   :  { %v1227_v19 = vsub.f32 %v1195_v39, %v1211_v50  ;;  %v1072_v27 = vpop.xlane.xlu0 %1071  ;;  %v1402_v54 = vmax.f32 %v1400_v20, -1e+30  ;;  %4066 = vrsqrt.f32 %v1277_v25  ;;  %v1421_v50 = vmax.f32 %v1419_v46, -1e+30  ;;  %3782 = vmatprep.subr.bf16.mxu0 %v3981_v31 }
 0x37b   :  { %v1081_v22 = vpop.xlane.xlu1 %1080  ;;  %v1399_v7 = vmax.f32 %v1303_v2, -1e+30  ;;  %v1471_v48 = vpack.c.bf16 %v1303_v2, %v1302_v33  ;;  %v4831_v33 = vmul.f32 0.015625, %v1072_v27  ;;  %v1420_v21 = vmax.f32 %v4826_v36, -1e+30 }
 0x37c   :  { %v1275_v41 = vadd.f32 1e-05, %v1227_v19  ;;  %v1404_v29 = vmax.f32 %v1402_v54, -1e+30  ;;  %v4833_v32 = vmul.f32 0.015625, %v1081_v22  ;;  %v1216_v20 = vmul.f32 %v4829_v45, %v4829_v45 }
 0x37d   :  { %v1401_v13 = vmax.f32 %v1399_v7, -1e+30  ;;  %3704 = vmatprep.subr.bf16.mxu1 %v1471_v48  ;;  %v1422_v1 = vmax.f32 %v1420_v21, -1e+30  ;;  %v1214_v2 = vmul.f32 %v4831_v33, %v4831_v33  ;;  %v1423_v26 = vmax.f32 %v1421_v50, -1e+30  ;;  %3783 = vmatpush3.bf16.msra.mxu0 %v3981_v31 }
 0x37e   :  { %4068 = vrsqrt.f32 %v1275_v41  ;;  %v1406_v56 = vmax.f32 %v1404_v29, -1e+30  ;;  %v1174_v5 = vpop.xlane.xlu0 %1173  ;;  %3705 = vmatpush3.bf16.msra.mxu1 %v1471_v48  ;;  %v1217_v19 = vmul.f32 %v4833_v32, %v4833_v32 }
 0x37f   :  { %v1403_v6 = vmax.f32 %v1401_v13, -1e+30  ;;  %3706 = vmatprep.subr.bf16.mxu1 %v1472_v38  ;;  %v1075_v43 = vpop.xlane.xlu1 %1074  ;;  %v1200_v12 = vmul.f32 0.015625, %v1174_v5  ;;  %v1424_v22 = vmax.f32 %v1422_v1, -1e+30  ;;  %v4844_v7 = vpop.eup %4062  ;;  %v1242_v13 = vsub.f32 %v4639_v16, %v4792_v0 }
 0x380   :  { %v1408_v39 = vmax.f32 %v1406_v56, -1e+30  ;;  %v4842_v27 = vmul.f32 0.015625, %v1075_v43 }
 0x381   :  { %v1405_v53 = vmax.f32 %v1403_v6, -1e+30  ;;  %v1232_v41 = vsub.f32 %v1200_v12, %v1216_v20  ;;  %v1425_v6 = vmax.f32 %v1423_v26, -1e+30  ;;  %v1426_v12 = vmax.f32 %v1424_v22, -1e+30 }
 0x382   :  { %v1168_v30 = vpop.xlane.xlu0 %1167  ;;  %3707 = vmatpush3.bf16.msra.mxu1 %v1472_v38  ;;  %v1410_v38 = vmax.f32 %v1408_v39, -1e+30  ;;  %v1243_v20 = vsub.f32 %v4656_v24, %v4804_v34  ;;  %v1215_v16 = vmul.f32 %v4842_v27, %v4842_v27 }
 0x383   :  { %v1407_v25 = vmax.f32 %v1405_v53, -1e+30  ;;  %v1198_v44 = vmul.f32 0.015625, %v1168_v30  ;;  %v1177_v3 = vpop.xlane.xlu1 %1176  ;;  %v4846_v46 = vpop.eup %4064  ;;  %v1280_v42 = vadd.f32 1e-05, %v1232_v41 }
 0x384   :  { %v1201_v54 = vmul.f32 0.015625, %v1177_v3  ;;  %v4850_v43 = vpop.eup %4066  ;;  %v1428_v31 = vmax.f32 %v1426_v12, -1e+30 }
 0x385   :  { %v1409_v48 = vmax.f32 %v1407_v25, -1e+30  ;;  %v1230_v29 = vsub.f32 %v1198_v44, %v1214_v2  ;;  %v1244_v25 = vsub.f32 %v4625_v62, %v4790_v61  ;;  %v1427_v44 = vmax.f32 %v1425_v6, -1e+30 }
 0x386   :  { %v1233_v56 = vsub.f32 %v1201_v54, %v1217_v19  ;;  %v1090_v5 = vpop.xlane.xlu0 %1089  ;;  %v1306_v54 = vmul.f32 %v4846_v46, %v1242_v13  ;;  %v1309_v24 = vmul.f32 %v4850_v43, %v1245_v23 }
 0x387   :  { %v1411_v21 = vmax.f32 %v1409_v48, -1e+30  ;;  %v1278_v50 = vadd.f32 1e-05, %v1230_v29  ;;  %v1171_v53 = vpop.xlane.xlu1 %1170  ;;  %v1308_v41 = vmul.f32 %v4844_v7, %v1244_v25  ;;  %v4868_v6 = vmul.f32 0.015625, %v1090_v5 }
 0x388   :  { %v4854_v1 = vpop.eup %4068  ;;  %v1281_v30 = vadd.f32 1e-05, %v1233_v56  ;;  %v1199_v39 = vmul.f32 0.015625, %v1171_v53 }
 0x389   :  { %v1412_v2 = vmax.f32 %v1410_v38, %v1411_v21  ;;  %v1307_v26 = vmul.f32 %v4854_v1, %v1243_v20  ;;  %4070 = vrsqrt.f32 %v1278_v50  ;;  %v1429_v38 = vmax.f32 %v1427_v44, -1e+30 }
 0x38a   :  { %v1231_v19 = vsub.f32 %v1199_v39, %v1215_v16  ;;  %v1084_v3 = vpop.xlane.xlu0 %1083  ;;  %4072 = vrsqrt.f32 %v1281_v30  ;;  %v1474_v21 = vpack.c.bf16 %v1309_v24, %v1308_v41  ;;  %v1430_v20 = vmax.f32 %v1428_v31, -1e+30 }
 0x38b   :  { %v1413_v22 = vrot.slane %v1412_v2, 4  ;;  %v4865_v48 = vmul.f32 0.015625, %v1084_v3  ;;  %v1093_v29 = vpop.xlane.xlu1 %1092  ;;  %v1473_v62 = vpack.c.bf16 %v1307_v26, %v1306_v54  ;;  %4074 = vrsqrt.f32 %v1280_v42 }
 0x38c   :  { %v1279_v56 = vadd.f32 1e-05, %v1231_v19  ;;  %v4296_v16 = vmov 1983009808   ;;  %v1431_v5 = vmax.f32 %v1429_v38, -1e+30  ;;  %v1445_v38 = vlaneseq }
 0x38d   :  { %3708 = vmatprep.subr.bf16.mxu1 %v1473_v62  ;;  %v1414_v23 = vmax.f32 %v1412_v2, %v1413_v22  ;;  %v1218_v50 = vmul.f32 %v4865_v48, %v4865_v48  ;;  %v1443_v39 = vunpack.c.l.s4 %v4296_v16  ;;  %v1432_v42 = vmax.f32 %v1430_v20, -1e+30 }
 0x38e   :  { %4076 = vrsqrt.f32 %v1279_v56  ;;  %v1180_v13 = vpop.xlane.xlu0 %1179  ;;  %3709 = vmatpush3.bf16.msra.mxu1 %v1473_v62  ;;  %v4874_v44 = vmul.f32 0.015625, %v1093_v29  ;;  %v1220_v2 = vmul.f32 %v4868_v6, %v4868_v6 }
 0x38f   :  { %v1202_v53 = vmul.f32 0.015625, %v1180_v13  ;;  %v1087_v12 = vpop.xlane.xlu1 %1086  ;;  %3710 = vmatprep.subr.bf16.mxu1 %v1474_v21  ;;  %v1415_v3 = vrot.slane %v1414_v23, 2  ;;  %v1433_v22 = vmax.f32 %v1431_v5, %v1432_v42  ;;  %v1444_v41 = vunpack.c.0.s8 %v1443_v39 }
 0x390   :  { %v4872_v30 = vmul.f32 0.015625, %v1087_v12  ;;  %v1221_v39 = vmul.f32 %v4874_v44, %v4874_v44 }
 0x391   :  { %v1234_v25 = vsub.f32 %v1202_v53, %v1218_v50  ;;  %v1246_v50 = vsub.f32 %v4695_v52, %v4831_v33  ;;  %v1249_v53 = vsub.f32 %v4697_v40, %v4833_v32  ;;  %v1434_v12 = vrot.slane %v1433_v22, 4 }
 0x392   :  { %v1186_v19 = vpop.xlane.xlu0 %1185  ;;  %3711 = vmatpush3.bf16.msra.mxu1 %v1474_v21  ;;  %v1219_v31 = vmul.f32 %v4872_v30, %v4872_v30  ;;  %v1416_v16 = vmax.f32 %v1414_v23, %v1415_v3  ;;  %v1248_v40 = vsub.f32 %v4680_v8, %v4829_v45  ;;  %v1446_v3 = vshrl.u32 %v1445_v38, 7 }
 0x393   :  { %v1282_v54 = vadd.f32 1e-05, %v1234_v25  ;;  %v1204_v26 = vmul.f32 0.015625, %v1186_v19  ;;  %v1183_v24 = vpop.xlane.xlu1 %1182  ;;  %v4880_v62 = vpop.eup %4070  ;;  %v1247_v25 = vsub.f32 %v4710_v55, %v4842_v27 }
 0x394   :  { %v1203_v56 = vmul.f32 0.015625, %v1183_v24  ;;  %v4882_v13 = vpop.eup %4072  ;;  %v1310_v24 = vmul.f32 %v4880_v62, %v1246_v50  ;;  %v4902_v8 = vsub.s32 %v1444_v41, %v1446_v3 }
 0x395   :  { %v1236_v29 = vsub.f32 %v1204_v26, %v1220_v2  ;;  %v4888_v20 = vpop.eup %4074  ;;  %4078 = vrsqrt.f32 %v1282_v54  ;;  %v1435_v26 = vmax.f32 %v1433_v22, %v1434_v12  ;;  %v1313_v55 = vmul.f32 %v4882_v13, %v1249_v53 }
 0x396   :  { %v1235_v21 = vsub.f32 %v1203_v56, %v1219_v31  ;;  %v1312_v51 = vmul.f32 %v4888_v20, %v1248_v40 }
 0x397   :  { %v1189_v5 = vpop.xlane.xlu1 %1188  ;;  %v1284_v2 = vadd.f32 1e-05, %v1236_v29  ;;  %v1436_v31 = vrot.slane %v1435_v26, 2  ;;  %v1417_v29 = vrot.slane %v1416_v16, 1 }
 0x398   :  { %v4894_v42 = vpop.eup %4076  ;;  %v1283_v52 = vadd.f32 1e-05, %v1235_v21  ;;  %v1205_v19 = vmul.f32 0.015625, %v1189_v5  ;;  %v1476_v12 = vpack.c.bf16 %v1313_v55, %v1312_v51  ;;  %v1250_v5 = vsub.f32 %v4743_v18, %v4865_v48 }
 0x399   :  { %v1311_v23 = vmul.f32 %v4894_v42, %v1247_v25  ;;  %v1437_v22 = vmax.f32 %v1435_v26, %v1436_v31  ;;  %v1418_v53 = vmax.f32 %v1416_v16, %v1417_v29  ;;  %v1252_v18 = vsub.f32 %v4730_v49, %v4868_v6 }
 0x39a   :  { %4080 = vrsqrt.f32 %v1283_v52  ;;  %v1237_v54 = vsub.f32 %v1205_v19, %v1221_v39  ;;  %v1259_v29 = vsub.f32 %v4652_v17, %v4804_v34  ;;  %v1260_v17 = vsub.f32 %v4613_v10, %v4790_v61  ;;  %v4193_v10 = vld [vmem:[#allocation2 + $0x20] sm:$0xff]  }
 0x39b   :  { %v1475_v56 = vpack.c.bf16 %v1311_v23, %v1310_v24  ;;  %4082 = vrsqrt.f32 %v1284_v2  ;;  %v1438_v50 = vrot.slane %v1437_v22, 1  ;;  %v1251_v2 = vsub.f32 %v4758_v28, %v4872_v30 }
 0x39c   :  { %v1285_v21 = vadd.f32 1e-05, %v1237_v54  ;;  %v1448_v41 = vrot.slane %v1418_v53, %v4902_v8  ;;  %v1253_v28 = vsub.f32 %v4745_v63, %v4874_v44  ;;  %v1479_v63 = vpack.c.bf16 %v4826_v36, %v4822_v35 }
 0x39d   :  { %3712 = vmatprep.subr.bf16.mxu1 %v1475_v56  ;;  %v1439_v38 = vmax.f32 %v1437_v22, %v1438_v50  ;;  %v4190_v22 = vld [vmem:[#allocation2 + $0x8] sm:$0xff]   ;;  %v4191_v50 = vld [vmem:[#allocation2 + $0x10] sm:$0xff]   ;;  %v1261_v53 = vsub.f32 %v4635_v58, %v4794_v15  ;;  %v1324_v36 = vmul.f32 %v4844_v7, %v1260_v17  ;;  %v1262_v58 = vsub.f32 %v4689_v11, %v4831_v33  ;;  %v4192_v15 = vld [vmem:[#allocation2 + $0x18] sm:$0xff]  }
 0x39e   :  { %4084 = vrsqrt.f32 %v1285_v21  ;;  %3713 = vmatpush3.bf16.msra.mxu1 %v1475_v56  ;;  %v1258_v21 = vsub.f32 %v4633_v14, %v4792_v0  ;;  %v1263_v0 = vsub.f32 %v4706_v37, %v4842_v27  ;;  %v1265_v61 = vsub.f32 %v4691_v9, %v4833_v32  ;;  %v4194_v9 = vld [vmem:[#allocation2 + $0x28] sm:$0xff]  }
 0x39f   :  { %3714 = vmatprep.subr.bf16.mxu1 %v1476_v12  ;;  %v4904_v25 = vpop.eup %4078  ;;  %v1455_v39 = vrot.slane %v1439_v38, %v4902_v8  ;;  %v1325_v14 = vmul.f32 %v4850_v43, %v1261_v53  ;;  %v1326_v37 = vmul.f32 %v4880_v62, %v1262_v58  ;;  %v1267_v33 = vsub.f32 %v4754_v47, %v4872_v30  ;;  %v5572_v30 = vld [vmem:[#allocation9_spill] sm:$0xff] }
 0x3a0   :  { %v1314_v16 = vmul.f32 %v4904_v25, %v1250_v5  ;;  %v1322_v35 = vmul.f32 %v4846_v46, %v1258_v21  ;;  %v1329_v11 = vmul.f32 %v4882_v13, %v1265_v61  ;;  %v1266_v43 = vsub.f32 %v4738_v4, %v4865_v48  ;;  %v4196_v48 = vld [vmem:[#allocation2 + $0x38] sm:$0xff]   ;;  %v4202_v5 = vld [vmem:[#allocation2 + $0x68] sm:$0xff]  }
 0x3a1   :  { %v1460_v52 = vrot.slane %v1455_v39, 7  ;;  %v1482_v46 = vpack.c.bf16 %v1325_v14, %v1324_v36  ;;  %v1268_v13 = vsub.f32 %v5572_v30, %v4868_v6  ;;  %v4197_v39 = vld [vmem:[#allocation2 + $0x40] sm:$0xff]  }
 0x3a2   :  { %3715 = vmatpush3.bf16.msra.mxu1 %v1476_v12  ;;  %v1323_v12 = vmul.f32 %v4854_v1, %v1259_v29  ;;  %v1327_v1 = vmul.f32 %v4894_v42, %v1263_v0  ;;  %v1330_v47 = vmul.f32 %v4904_v25, %v1266_v43  ;;  %v4200_v25 = vld [vmem:[#allocation2 + $0x58] sm:$0xff]   ;;  %v4201_v6 = vld [vmem:[#allocation2 + $0x60] sm:$0xff]  }
 0x3a3   :  { %v1462_v40 = vsel %vm1461_vm0, %v1460_v52, %v1448_v41  ;;  %v4205_v41 = vld [vmem:[#allocation2] sm:$0xff]  }
 0x3a4   :  { %v4911_v51 = vpop.eup %4080  ;;  %v1464_v23 = vsel %vm1463_vm1, %v1460_v52, %v1462_v40  ;;  %v1481_v34 = vpack.c.bf16 %v1323_v12, %v1322_v35  ;;  %v1483_v27 = vpack.c.bf16 %v1327_v1, %v1326_v37 }
 0x3a5   :  { %v1315_v19 = vmul.f32 %v4911_v51, %v1251_v2  ;;  %v4916_v26 = vpop.eup %4082  ;;  %v1466_v3 = vsel %vm1465_vm2, %v1460_v52, %v1464_v23  ;;  %v1331_v62 = vmul.f32 %v4911_v51, %v1267_v33  ;;  %v4203_v2 = vld [vmem:[#allocation2 + $0x70] sm:$0xff]   ;;  %v4204_v51 = vld [vmem:[#allocation2 + $0x78] sm:$0xff]  }
 0x3a6   :  { %v1316_v54 = vmul.f32 %v4916_v26, %v1252_v18  ;;  %v1468_v56 = vsel %vm1467_vm3, %v1460_v52, %v1466_v3  ;;  %v1332_v4 = vmul.f32 %v4916_v26, %v1268_v13  ;;  %v4972_v13 = vld [vmem:[%s5566_s3 + $0x1] ss:$0 sm:$0xff] }
 0x3a7   :  { %v1477_v24 = vpack.c.bf16 %v1315_v19, %v1314_v16  ;;  %1470 = vst [vmem:[%s5567_s4] sm:$0x3] %v1468_v56 }
 0x3a8   :  { %v4085_v55 = vpop.eup %4084 }
 0x3a9   :  { %3716 = vmatprep.subr.bf16.mxu1 %v1477_v24  ;;  %v1317_v31 = vmul.f32 %v4085_v55, %v1253_v28 }
 0x3aa   :  { %3717 = vmatpush3.bf16.msra.mxu1 %v1477_v24 }
 0x3ab   :  { %v1478_v49 = vpack.c.bf16 %v1317_v31, %v1316_v54 }
 0x3ad   :  { %3718 = vmatprep.subr.bf16.mxu1 %v1478_v49 }
 0x3ae   :  { %3719 = vmatpush3.bf16.msra.mxu1 %v1478_v49 }
 0x3af   :  { %3736 = vmatprep.subr.bf16.mxu1 %v1479_v63 }
 0x3b1   :  { %3721 = vmatmul.mubr.bf16.vlgmr.msra.gmra.mrb[32].mxu1 %v4190_v22 }
 0x3b2   :  { %3737 = vmatpush3.bf16.msra.mxu1 %v1479_v63  ;;  %3724 = vmatprep.mubr.bf16.mxu1 %v4191_v50 }
 0x3b3   :  { %3738 = vmatprep.subr.bf16.mxu1 %v4820_v57 }
 0x3b6   :  { %3739 = vmatpush3.bf16.msra.mxu1 %v4820_v57  ;;  %v1264_v57 = vsub.f32 %v4673_v60, %v4829_v45  ;;  %v4195_v60 = vld [vmem:[#allocation2 + $0x30] sm:$0xff]   ;;  %v1269_v45 = vsub.f32 %v4740_v59, %v4874_v44  ;;  %v4198_v59 = vld [vmem:[#allocation2 + $0x48] sm:$0xff]  }
 0x3b7   :  { %3740 = vmatprep.subr.bf16.mxu1 %v1481_v34  ;;  %v4199_v44 = vld [vmem:[#allocation2 + $0x50] sm:$0xff]  }
 0x3b8   :  { %v1328_v7 = vmul.f32 %v4888_v20, %v1264_v57  ;;  %v1485_v20 = vpack.c.bf16 %v1331_v62, %v1330_v47  ;;  %v1333_v42 = vmul.f32 %v4085_v55, %v1269_v45 }
 0x3b9   :  { %3725 = vmatmul.mubr.bf16.gmra.mrb[36].mxu1 %v4192_v15 }
 0x3ba   :  { %3741 = vmatpush3.bf16.msra.mxu1 %v1481_v34  ;;  %3728 = vmatprep.mubr.bf16.mxu1 %v4193_v10  ;;  %v1484_v32 = vpack.c.bf16 %v1329_v11, %v1328_v7  ;;  %v1486_v38 = vpack.c.bf16 %v1333_v42, %v1332_v4 }
 0x3bb   :  { %3742 = vmatprep.subr.bf16.mxu1 %v1482_v46 }
 0x3be   :  { %3743 = vmatpush3.bf16.msra.mxu1 %v1482_v46 }
 0x3bf   :  { %3744 = vmatprep.subr.bf16.mxu1 %v1483_v27 }
 0x3c1   :  { %3729 = vmatmul.mubr.bf16.gmra.mrb[40].mxu1 %v4194_v9 }
 0x3c2   :  { %3745 = vmatpush3.bf16.msra.mxu1 %v1483_v27  ;;  %3732 = vmatprep.mubr.bf16.mxu1 %v4195_v60 }
 0x3c3   :  { %3746 = vmatprep.subr.bf16.mxu1 %v1484_v32 }
 0x3c6   :  { %3747 = vmatpush3.bf16.msra.mxu1 %v1484_v32 }
 0x3c7   :  { %3748 = vmatprep.subr.bf16.mxu1 %v1485_v20 }
 0x3c9   :  { %3733 = vmatmul.mubr.bf16.gmra.mrb[44].mxu1 %v4196_v48 }
 0x3ca   :  { %3749 = vmatpush3.bf16.msra.mxu1 %v1485_v20  ;;  %3752 = vmatprep.mubr.bf16.mxu1 %v4197_v39 }
 0x3cb   :  { %3750 = vmatprep.subr.bf16.mxu1 %v1486_v38 }
 0x3ce   :  { %3751 = vmatpush3.bf16.msra.mxu1 %v1486_v38 }
 0x3d1   :  { %3753 = vmatmul.mubr.bf16.vlgmr.msra.gmra.mrb[48].mxu1 %v4198_v59 }
 0x3d2   :  { %3756 = vmatprep.mubr.bf16.mxu1 %v4199_v44 }
 0x3d9   :  { %3757 = vmatmul.mubr.bf16.gmra.mrb[52].mxu1 %v4200_v25 }
 0x3da   :  { %3760 = vmatprep.mubr.bf16.mxu1 %v4201_v6 }
 0x3e1   :  { %3761 = vmatmul.mubr.bf16.gmra.mrb[56].mxu1 %v4202_v5 }
 0x3e2   :  { %3764 = vmatprep.mubr.bf16.mxu1 %v4203_v2 }
 0x3e9   :  { %3765 = vmatmul.mubr.bf16.gmra.mrb[60].mxu1 %v4204_v51 }
 0x3ea   :  { %3832 = vmatprep.mubr.bf16.mxu1 %v4205_v41 }
 0x484   :  { %v3722_v52 = vpop.f32.mrb[32].mxu1 }
 0x485   :  { %v1540_v16 = vpop.f32.mrb[33].mxu1 }
 0x486   :  { %v3723_v19 = vpop.f32.mrb[34].mxu1 }
 0x487   :  { %v1701_v26 = vpack.c.bf16 %v3723_v19, %v3722_v52  ;;  %v1543_v40 = vpop.f32.mrb[35].mxu1 }
 0x488   :  { %v1700_v18 = vpack.c.bf16 %v1543_v40, %v1540_v16 }
 0x48a   :  { %3784 = vmatprep.mubr.bf16.mxu0 %v1700_v18 }
 0x48b   :  { %3785 = vmatmul.mubr.bf16.vlgmr.msra.gmra.mrb[32].mxu0 %v1701_v26 }
 0x48c   :  { %v3726_v28 = vpop.f32.mrb[36].mxu1 }
 0x48d   :  { %v1556_v24 = vpop.f32.mrb[37].mxu1 }
 0x48e   :  { %v3727_v23 = vpop.f32.mrb[38].mxu1 }
 0x48f   :  { %v1703_v55 = vpack.c.bf16 %v3727_v23, %v3726_v28  ;;  %v1559_v3 = vpop.f32.mrb[39].mxu1 }
 0x490   :  { %v1702_v54 = vpack.c.bf16 %v1559_v3, %v1556_v24 }
 0x492   :  { %3788 = vmatprep.mubr.bf16.mxu0 %v1702_v54 }
 0x493   :  { %3789 = vmatmul.mubr.bf16.gmra.mrb[36].mxu0 %v1703_v55 }
 0x494   :  { %v3730_v31 = vpop.f32.mrb[40].mxu1 }
 0x495   :  { %v1572_v56 = vpop.f32.mrb[41].mxu1 }
 0x496   :  { %v3731_v49 = vpop.f32.mrb[42].mxu1 }
 0x497   :  { %v1705_v63 = vpack.c.bf16 %v3731_v49, %v3730_v31  ;;  %v1575_v29 = vpop.f32.mrb[43].mxu1 }
 0x498   :  { %v1704_v21 = vpack.c.bf16 %v1575_v29, %v1572_v56 }
 0x49a   :  { %3792 = vmatprep.mubr.bf16.mxu0 %v1704_v21 }
 0x49b   :  { %3793 = vmatmul.mubr.bf16.gmra.mrb[40].mxu0 %v1705_v63 }
 0x49c   :  { %v3734_v22 = vpop.f32.mrb[44].mxu1 }
 0x49d   :  { %v1588_v12 = vpop.f32.mrb[45].mxu1 }
 0x49e   :  { %v3735_v50 = vpop.f32.mrb[46].mxu1 }
 0x49f   :  { %v1707_v53 = vpack.c.bf16 %v3735_v50, %v3734_v22  ;;  %v1591_v35 = vpop.f32.mrb[47].mxu1 }
 0x4a0   :  { %v1706_v17 = vpack.c.bf16 %v1591_v35, %v1588_v12 }
 0x4a2   :  { %3796 = vmatprep.mubr.bf16.mxu0 %v1706_v17 }
 0x4a3   :  { %3797 = vmatmul.mubr.bf16.gmra.mrb[44].mxu0 %v1707_v53 }
 0x4a4   :  { %v3754_v34 = vpop.f32.mrb[48].mxu1 }
 0x4a5   :  { %v1637_v14 = vpop.f32.mrb[49].mxu1 }
 0x4a6   :  { %v3755_v0 = vpop.f32.mrb[50].mxu1 }
 0x4a7   :  { %v1709_v36 = vpack.c.bf16 %v3755_v0, %v3754_v34  ;;  %v1640_v58 = vpop.f32.mrb[51].mxu1 }
 0x4a8   :  { %v1708_v15 = vpack.c.bf16 %v1640_v58, %v1637_v14 }
 0x4aa   :  { %3800 = vmatprep.mubr.bf16.mxu0 %v1708_v15 }
 0x4ab   :  { %3801 = vmatmul.mubr.bf16.gmra.mrb[48].mxu0 %v1709_v36 }
 0x4ac   :  { %v3758_v46 = vpop.f32.mrb[52].mxu1 }
 0x4ad   :  { %v1653_v1 = vpop.f32.mrb[53].mxu1 }
 0x4ae   :  { %v3759_v10 = vpop.f32.mrb[54].mxu1 }
 0x4af   :  { %v1711_v61 = vpack.c.bf16 %v3759_v10, %v3758_v46  ;;  %v1656_v37 = vpop.f32.mrb[55].mxu1 }
 0x4b0   :  { %v1710_v57 = vpack.c.bf16 %v1656_v37, %v1653_v1 }
 0x4b2   :  { %3804 = vmatprep.mubr.bf16.mxu0 %v1710_v57 }
 0x4b3   :  { %3805 = vmatmul.mubr.bf16.gmra.mrb[52].mxu0 %v1711_v61 }
 0x4b4   :  { %v3762_v27 = vpop.f32.mrb[56].mxu1 }
 0x4b5   :  { %v1669_v11 = vpop.f32.mrb[57].mxu1 }
 0x4b6   :  { %v3763_v33 = vpop.f32.mrb[58].mxu1 }
 0x4b7   :  { %v1713_v7 = vpack.c.bf16 %v3763_v33, %v3762_v27  ;;  %v1672_v43 = vpop.f32.mrb[59].mxu1 }
 0x4b8   :  { %v1712_v9 = vpack.c.bf16 %v1672_v43, %v1669_v11 }
 0x4ba   :  { %3808 = vmatprep.mubr.bf16.mxu0 %v1712_v9 }
 0x4bb   :  { %3809 = vmatmul.mubr.bf16.gmra.mrb[56].mxu0 %v1713_v7 }
 0x4bc   :  { %v3766_v32 = vpop.f32.mrb[60].mxu1 }
 0x4bd   :  { %v1685_v62 = vpop.f32.mrb[61].mxu1 }
 0x4be   :  { %v3767_v60 = vpop.f32.mrb[62].mxu1 }
 0x4bf   :  { %v1715_v45 = vpack.c.bf16 %v3767_v60, %v3766_v32  ;;  %v1688_v47 = vpop.f32.mrb[63].mxu1 }
 0x4c0   :  { %v1714_v30 = vpack.c.bf16 %v1688_v47, %v1685_v62 }
 0x4c2   :  { %3812 = vmatprep.mubr.bf16.mxu0 %v1714_v30 }
 0x4c3   :  { %3813 = vmatmul.mubr.bf16.gmra.mrb[60].mxu0 %v1715_v45 }
 0x55e   :  { %v3786_v20 = vpop.f32.mrb[32].mxu0 }
 0x55f   :  { %v4975_v42 = vadd.f32 %v3786_v20, %v4972_v13  ;;  %v1798_v4 = vpop.f32.mrb[33].mxu0 }
 0x560   :  { %v3787_v48 = vpop.f32.mrb[34].mxu0  ;;  %v4978_v38 = vadd.f32 %v4972_v13, %v1798_v4 }
 0x561   :  { %v4981_v39 = vadd.f32 %v3787_v48, %v4972_v13  ;;  %v1801_v59 = vpop.f32.mrb[35].mxu0  ;;  %v1965_v44 = vmul.f32 %v4975_v42, %v4975_v42 }
 0x562   :  { %v4986_v25 = vadd.f32 %v4972_v13, %v1801_v59  ;;  %v1963_v5 = vmul.f32 %v4978_v38, %v4978_v38 }
 0x563   :  { %1999 = vadd.xlane.f32.xlu0 %v1965_v44  ;;  %v1966_v6 = vmul.f32 %v4981_v39, %v4981_v39 }
 0x564   :  { %v1964_v52 = vmul.f32 %v4986_v25, %v4986_v25 }
 0x565   :  { %2001 = vadd.xlane.f32.xlu1 %v1966_v6 }
 0x566   :  { %v3790_v2 = vpop.f32.mrb[36].mxu0 }
 0x567   :  { %v4993_v51 = vadd.f32 %v3790_v2, %v4972_v13  ;;  %1995 = vadd.xlane.f32.xlu0 %v1963_v5  ;;  %v1814_v41 = vpop.f32.mrb[37].mxu0 }
 0x568   :  { %v3791_v16 = vpop.f32.mrb[38].mxu0  ;;  %v4998_v19 = vadd.f32 %v4972_v13, %v1814_v41 }
 0x569   :  { %v5001_v26 = vadd.f32 %v3791_v16, %v4972_v13  ;;  %1997 = vadd.xlane.f32.xlu1 %v1964_v52  ;;  %v1817_v40 = vpop.f32.mrb[39].mxu0  ;;  %v1969_v18 = vmul.f32 %v4993_v51, %v4993_v51 }
 0x56a   :  { %v5006_v28 = vadd.f32 %v4972_v13, %v1817_v40  ;;  %v1967_v23 = vmul.f32 %v4998_v19, %v4998_v19 }
 0x56b   :  { %2007 = vadd.xlane.f32.xlu0 %v1969_v18  ;;  %v1970_v24 = vmul.f32 %v5001_v26, %v5001_v26 }
 0x56c   :  { %v1968_v31 = vmul.f32 %v5006_v28, %v5006_v28 }
 0x56d   :  { %2009 = vadd.xlane.f32.xlu1 %v1970_v24 }
 0x56e   :  { %v3794_v55 = vpop.f32.mrb[40].mxu0 }
 0x56f   :  { %v5013_v3 = vadd.f32 %v3794_v55, %v4972_v13  ;;  %2003 = vadd.xlane.f32.xlu0 %v1967_v23  ;;  %v1830_v54 = vpop.f32.mrb[41].mxu0 }
 0x570   :  { %v3795_v56 = vpop.f32.mrb[42].mxu0  ;;  %v5018_v49 = vadd.f32 %v4972_v13, %v1830_v54 }
 0x571   :  { %v5021_v63 = vadd.f32 %v3795_v56, %v4972_v13  ;;  %2005 = vadd.xlane.f32.xlu1 %v1968_v31  ;;  %v1833_v29 = vpop.f32.mrb[43].mxu0  ;;  %v1973_v21 = vmul.f32 %v5013_v3, %v5013_v3 }
 0x572   :  { %v5026_v22 = vadd.f32 %v4972_v13, %v1833_v29  ;;  %v1971_v50 = vmul.f32 %v5018_v49, %v5018_v49 }
 0x573   :  { %2015 = vadd.xlane.f32.xlu0 %v1973_v21  ;;  %v1974_v12 = vmul.f32 %v5021_v63, %v5021_v63 }
 0x574   :  { %v1972_v17 = vmul.f32 %v5026_v22, %v5026_v22 }
 0x575   :  { %2017 = vadd.xlane.f32.xlu1 %v1974_v12 }
 0x576   :  { %v3798_v53 = vpop.f32.mrb[44].mxu0 }
 0x577   :  { %2011 = vadd.xlane.f32.xlu0 %v1971_v50  ;;  %v1846_v35 = vpop.f32.mrb[45].mxu0  ;;  %v5103_v31 = vadd.f32 %v3798_v53, %v4972_v13 }
 0x578   :  { %v5035_v34 = vadd.f32 %v4972_v13, %v1846_v35  ;;  %v3799_v14 = vpop.f32.mrb[46].mxu0 }
 0x579   :  { %2013 = vadd.xlane.f32.xlu1 %v1972_v17  ;;  %v1849_v0 = vpop.f32.mrb[47].mxu0  ;;  %v5108_v21 = vadd.f32 %v3799_v14, %v4972_v13  ;;  %v1977_v53 = vmul.f32 %v5103_v31, %v5103_v31 }
 0x57a   :  { %v5038_v36 = vadd.f32 %v4972_v13, %v1849_v0  ;;  %v1975_v58 = vmul.f32 %v5035_v34, %v5035_v34 }
 0x57c   :  { %2019 = vadd.xlane.f32.xlu0 %v1975_v58  ;;  %v1976_v15 = vmul.f32 %v5038_v36, %v5038_v36 }
 0x57e   :  { %2021 = vadd.xlane.f32.xlu1 %v1976_v15  ;;  %v3802_v46 = vpop.f32.mrb[48].mxu0  ;;  %v1978_v15 = vmul.f32 %v5108_v21, %v5108_v21 }
 0x57f   :  { %v5045_v1 = vadd.f32 %v3802_v46, %v4972_v13  ;;  %v1862_v10 = vpop.f32.mrb[49].mxu0 }
 0x580   :  { %v3803_v61 = vpop.f32.mrb[50].mxu0  ;;  %v5048_v37 = vadd.f32 %v4972_v13, %v1862_v10 }
 0x581   :  { %v5051_v57 = vadd.f32 %v3803_v61, %v4972_v13  ;;  %v1865_v27 = vpop.f32.mrb[51].mxu0  ;;  %v1981_v11 = vmul.f32 %v5045_v1, %v5045_v1 }
 0x582   :  { %v5056_v33 = vadd.f32 %v4972_v13, %v1865_v27  ;;  %v1979_v43 = vmul.f32 %v5048_v37, %v5048_v37 }
 0x583   :  { %2031 = vadd.xlane.f32.xlu0 %v1981_v11  ;;  %v1982_v7 = vmul.f32 %v5051_v57, %v5051_v57 }
 0x584   :  { %v1980_v60 = vmul.f32 %v5056_v33, %v5056_v33 }
 0x585   :  { %2033 = vadd.xlane.f32.xlu1 %v1982_v7 }
 0x586   :  { %v3806_v9 = vpop.f32.mrb[52].mxu0 }
 0x587   :  { %v5063_v32 = vadd.f32 %v3806_v9, %v4972_v13  ;;  %2027 = vadd.xlane.f32.xlu0 %v1979_v43  ;;  %v1878_v62 = vpop.f32.mrb[53].mxu0 }
 0x588   :  { %v5068_v45 = vadd.f32 %v4972_v13, %v1878_v62  ;;  %v3807_v47 = vpop.f32.mrb[54].mxu0 }
 0x589   :  { %v5071_v30 = vadd.f32 %v3807_v47, %v4972_v13  ;;  %2029 = vadd.xlane.f32.xlu1 %v1980_v60  ;;  %v1881_v20 = vpop.f32.mrb[55].mxu0  ;;  %v1985_v4 = vmul.f32 %v5063_v32, %v5063_v32 }
 0x58a   :  { %v5076_v48 = vadd.f32 %v4972_v13, %v1881_v20  ;;  %v1983_v44 = vmul.f32 %v5068_v45, %v5068_v45 }
 0x58b   :  { %2039 = vadd.xlane.f32.xlu0 %v1985_v4  ;;  %v1986_v59 = vmul.f32 %v5071_v30, %v5071_v30 }
 0x58c   :  { %v1984_v41 = vmul.f32 %v5076_v48, %v5076_v48 }
 0x58d   :  { %2041 = vadd.xlane.f32.xlu1 %v1986_v59 }
 0x58e   :  { %v3810_v6 = vpop.f32.mrb[56].mxu0 }
 0x58f   :  { %v5083_v5 = vadd.f32 %v3810_v6, %v4972_v13  ;;  %2035 = vadd.xlane.f32.xlu0 %v1983_v44  ;;  %v1894_v2 = vpop.f32.mrb[57].mxu0 }
 0x590   :  { %v5088_v52 = vadd.f32 %v4972_v13, %v1894_v2  ;;  %v3811_v16 = vpop.f32.mrb[58].mxu0 }
 0x591   :  { %v5091_v40 = vadd.f32 %v3811_v16, %v4972_v13  ;;  %2037 = vadd.xlane.f32.xlu1 %v1984_v41  ;;  %v1989_v18 = vmul.f32 %v5083_v5, %v5083_v5  ;;  %v1897_v24 = vpop.f32.mrb[59].mxu0 }
 0x592   :  { %v5096_v23 = vadd.f32 %v4972_v13, %v1897_v24  ;;  %v1987_v54 = vmul.f32 %v5088_v52, %v5088_v52 }
 0x593   :  { %2047 = vadd.xlane.f32.xlu0 %v1989_v18  ;;  %v1990_v55 = vmul.f32 %v5091_v40, %v5091_v40 }
 0x594   :  { %v1988_v56 = vmul.f32 %v5096_v23, %v5096_v23 }
 0x595   :  { %2049 = vadd.xlane.f32.xlu1 %v1990_v55 }
 0x596   :  { %v3814_v29 = vpop.f32.mrb[60].mxu0 }
 0x597   :  { %2043 = vadd.xlane.f32.xlu0 %v1987_v54  ;;  %v5111_v12 = vadd.f32 %v3814_v29, %v4972_v13  ;;  %v1910_v50 = vpop.f32.mrb[61].mxu0 }
 0x598   :  { %v5114_v35 = vadd.f32 %v4972_v13, %v1910_v50  ;;  %v3815_v17 = vpop.f32.mrb[62].mxu0 }
 0x599   :  { %2045 = vadd.xlane.f32.xlu1 %v1988_v56  ;;  %v5119_v0 = vadd.f32 %v3815_v17, %v4972_v13  ;;  %v1913_v58 = vpop.f32.mrb[63].mxu0  ;;  %v1993_v61 = vmul.f32 %v5111_v12, %v5111_v12 }
 0x59a   :  { %v5122_v14 = vadd.f32 %v4972_v13, %v1913_v58  ;;  %v1991_v46 = vmul.f32 %v5114_v35, %v5114_v35 }
 0x59b   :  { %2023 = vadd.xlane.f32.xlu0 %v1977_v53  ;;  %v1994_v13 = vmul.f32 %v5119_v0, %v5119_v0 }
 0x59c   :  { %v1992_v10 = vmul.f32 %v5122_v14, %v5122_v14 }
 0x59d   :  { %2025 = vadd.xlane.f32.xlu1 %v1978_v15 }
 0x59f   :  { %2051 = vadd.xlane.f32.xlu0 %v1991_v46 }
 0x5a1   :  { %2053 = vadd.xlane.f32.xlu1 %v1992_v10 }
 0x5a3   :  { %2055 = vadd.xlane.f32.xlu0 %v1993_v61 }
 0x5a5   :  { %2057 = vadd.xlane.f32.xlu1 %v1994_v13 }
 0x5f0   :  { %v2000_v27 = vpop.xlane.xlu0 %1999 }
 0x5f1   :  { %v2061_v6 = vmax.f32 %v2000_v27, 1e-24 }
 0x5f2   :  { %v2002_v11 = vpop.xlane.xlu1 %2001 }
 0x5f3   :  { %v2062_v2 = vmax.f32 %v2002_v11, 1e-24  ;;  %4086 = vrsqrt.f32 %v2061_v6 }
 0x5f4   :  { %v1996_v7 = vpop.xlane.xlu0 %1995 }
 0x5f5   :  { %v2059_v16 = vmax.f32 %v1996_v7, 1e-24  ;;  %4088 = vrsqrt.f32 %v2062_v2 }
 0x5f6   :  { %v1998_v43 = vpop.xlane.xlu1 %1997 }
 0x5f7   :  { %v2060_v24 = vmax.f32 %v1998_v43, 1e-24  ;;  %4090 = vrsqrt.f32 %v2059_v16 }
 0x5f8   :  { %v2008_v9 = vpop.xlane.xlu0 %2007 }
 0x5f9   :  { %v2065_v58 = vmax.f32 %v2008_v9, 1e-24 }
 0x5fa   :  { %v2010_v62 = vpop.xlane.xlu1 %2009 }
 0x5fb   :  { %v2066_v46 = vmax.f32 %v2010_v62, 1e-24 }
 0x5fc   :  { %v2004_v60 = vpop.xlane.xlu0 %2003 }
 0x5fd   :  { %v4087_v61 = vpop.eup %4086  ;;  %v2063_v11 = vmax.f32 %v2004_v60, 1e-24 }
 0x5fe   :  { %v5134_v47 = vpop.xlane.xlu1 %2005  ;;  %v2125_v16 = vmul.f32 %v4087_v61, %v4975_v42 }
 0x5ff   :  { %v4089_v27 = vpop.eup %4088 }
 0x600   :  { %v5136_v20 = vpop.xlane.xlu0 %2015 }
 0x601   :  { %v4091_v6 = vpop.eup %4090 }
 0x602   :  { %v5138_v4 = vpop.xlane.xlu1 %2017 }
 0x604   :  { %v5140_v59 = vpop.xlane.xlu0 %2011 }
 0x606   :  { %v5142_v44 = vpop.xlane.xlu1 %2013 }
 0x609   :  { %v5144_v41 = vpop.xlane.xlu0 %2019 }
 0x60b   :  { %v5146_v18 = vpop.xlane.xlu1 %2021 }
 0x610   :  { %v2032_v55 = vpop.xlane.xlu0 %2031 }
 0x611   :  { %v2077_v54 = vmax.f32 %v2032_v55, 1e-24  ;;  %v2126_v55 = vmul.f32 %v4089_v27, %v4981_v39  ;;  %v2064_v39 = vmax.f32 %v5134_v47, 1e-24 }
 0x612   :  { %v2034_v56 = vpop.xlane.xlu1 %2033 }
 0x613   :  { %4092 = vrsqrt.f32 %v2077_v54  ;;  %v2078_v29 = vmax.f32 %v2034_v56, 1e-24 }
 0x614   :  { %4094 = vrsqrt.f32 %v2060_v24  ;;  %v2028_v50 = vpop.xlane.xlu0 %2027 }
 0x615   :  { %4096 = vrsqrt.f32 %v2078_v29  ;;  %v2075_v17 = vmax.f32 %v2028_v50, 1e-24 }
 0x616   :  { %v2030_v53 = vpop.xlane.xlu1 %2029 }
 0x617   :  { %4098 = vrsqrt.f32 %v2075_v17  ;;  %v2076_v15 = vmax.f32 %v2030_v53, 1e-24  ;;  %v5151_v17 = vmax.f32 %v2125_v16, 0.0 }
 0x618   :  { %v2040_v10 = vpop.xlane.xlu0 %2039 }
 0x619   :  { %4100 = vrsqrt.f32 %v2076_v15  ;;  %v2081_v13 = vmax.f32 %v2040_v10, 1e-24 }
 0x61a   :  { %v2042_v7 = vpop.xlane.xlu1 %2041  ;;  %4102 = vrsqrt.f32 %v2065_v58  ;;  %v2123_v58 = vmul.f32 %v4091_v6, %v4978_v38 }
 0x61b   :  { %v2082_v43 = vmax.f32 %v2042_v7, 1e-24  ;;  %4104 = vrsqrt.f32 %v2066_v46  ;;  %v5158_v46 = vmax.f32 %v2126_v55, 0.0 }
 0x61c   :  { %v2036_v2 = vpop.xlane.xlu0 %2035  ;;  %4106 = vrsqrt.f32 %v2081_v13  ;;  %v5170_v47 = vmax.f32 %v2123_v58, 0.0 }
 0x61d   :  { %v4093_v24 = vpop.eup %4092  ;;  %v2079_v9 = vmax.f32 %v2036_v2, 1e-24  ;;  %4108 = vrsqrt.f32 %v2063_v11 }
 0x61e   :  { %v4095_v62 = vpop.eup %4094  ;;  %v2038_v54 = vpop.xlane.xlu1 %2037  ;;  %v2141_v56 = vmul.f32 %v4093_v24, %v5045_v1  ;;  %4110 = vrsqrt.f32 %v2082_v43 }
 0x61f   :  { %v4097_v29 = vpop.eup %4096  ;;  %v2080_v60 = vmax.f32 %v2038_v54, 1e-24  ;;  %4112 = vrsqrt.f32 %v2079_v9  ;;  %v2124_v27 = vmul.f32 %v4095_v62, %v4986_v25 }
 0x620   :  { %v2048_v50 = vpop.xlane.xlu0 %2047  ;;  %v5153_v53 = vmax.f32 %v2141_v56, 0.0  ;;  %v2142_v42 = vmul.f32 %v4097_v29, %v5051_v57  ;;  %v2067_v56 = vmax.f32 %v5140_v59, 1e-24  ;;  %v2253_v29 = vmul.f32 %v5151_v17, %v5151_v17 }
 0x621   :  { %v4099_v15 = vpop.eup %4098  ;;  %4114 = vrsqrt.f32 %v2080_v60  ;;  %v5178_v24 = vmax.f32 %v2124_v27, 0.0  ;;  %v2085_v58 = vmax.f32 %v2048_v50, 1e-24  ;;  %v2254_v59 = vmul.f32 %v5158_v46, %v5158_v46 }
 0x622   :  { %v2050_v10 = vpop.xlane.xlu1 %2049  ;;  %v2193_v1 = vadd.f32 %v5153_v53, %v5151_v17  ;;  %v5162_v61 = vmax.f32 %v2142_v42, 0.0  ;;  %v2139_v13 = vmul.f32 %v4099_v15, %v5048_v37  ;;  %4116 = vrsqrt.f32 %v2064_v39 }
 0x623   :  { %v4101_v11 = vpop.eup %4100  ;;  %v2069_v37 = vmax.f32 %v5136_v20, 1e-24  ;;  %v2269_v55 = vmul.f32 %v5153_v53, %v5153_v53  ;;  %v2086_v27 = vmax.f32 %v2050_v10, 1e-24  ;;  %v2252_v10 = vmul.f32 %v5178_v24, %v5178_v24 }
 0x624   :  { %v5166_v57 = vpop.xlane.xlu0 %2043  ;;  %2194 = vadd.xlane.f32.xlu0 %v2193_v1  ;;  %v2196_v38 = vadd.f32 %v5162_v61, %v5158_v46  ;;  %v5172_v7 = vmax.f32 %v2139_v13, 0.0  ;;  %v2140_v43 = vmul.f32 %v4101_v11, %v5056_v33  ;;  %v4103_v6 = vpop.eup %4102  ;;  %v2070_v33 = vmax.f32 %v5138_v4, 1e-24 }
 0x625   :  { %v4105_v2 = vpop.eup %4104  ;;  %v2270_v60 = vmul.f32 %v5162_v61, %v5162_v61  ;;  %4118 = vrsqrt.f32 %v2069_v37  ;;  %v2289_v4 = vadd.f32 %v2269_v55, %v2253_v29  ;;  %v2251_v11 = vmul.f32 %v5170_v47, %v5170_v47 }
 0x626   :  { %v2046_v25 = vpop.xlane.xlu1 %2045  ;;  %2197 = vadd.xlane.f32.xlu1 %v2196_v38  ;;  %v2187_v16 = vadd.f32 %v5172_v7, %v5170_v47  ;;  %v5180_v9 = vmax.f32 %v2140_v43, 0.0  ;;  %v4107_v62 = vpop.eup %4106  ;;  %v2267_v39 = vmul.f32 %v5172_v7, %v5172_v7  ;;  %4120 = vrsqrt.f32 %v2070_v33 }
 0x627   :  { %v4109_v54 = vpop.eup %4108  ;;  %v2145_v1 = vmul.f32 %v4107_v62, %v5063_v32  ;;  %v2129_v50 = vmul.f32 %v4103_v6, %v4993_v51  ;;  %4122 = vrsqrt.f32 %v2067_v56  ;;  %v2292_v43 = vadd.f32 %v2270_v60, %v2254_v59 }
 0x628   :  { %2188 = vadd.xlane.f32.xlu0 %v2187_v16  ;;  %v2190_v20 = vadd.f32 %v5180_v9, %v5178_v24  ;;  %v4111_v42 = vpop.eup %4110  ;;  %v5192_v15 = vpop.xlane.xlu0 %2023  ;;  %v2268_v37 = vmul.f32 %v5180_v9, %v5180_v9  ;;  %4124 = vrsqrt.f32 %v2085_v58  ;;  %v2083_v32 = vmax.f32 %v5166_v57, 1e-24 }
 0x629   :  { %v4113_v13 = vpop.eup %4112  ;;  %v2146_v16 = vmul.f32 %v4111_v42, %v5071_v30  ;;  %v2283_v62 = vadd.f32 %v2267_v39, %v2251_v11  ;;  %v5210_v51 = vmax.f32 %v2145_v1, 0.0  ;;  %v2130_v6 = vmul.f32 %v4105_v2, %v5001_v26 }
 0x62a   :  { %2191 = vadd.xlane.f32.xlu1 %v2190_v20  ;;  %v5202_v38 = vpop.xlane.xlu1 %2025  ;;  %v2143_v33 = vmul.f32 %v4113_v13, %v5068_v45  ;;  %4126 = vrsqrt.f32 %v2086_v27  ;;  %v2084_v20 = vmax.f32 %v2046_v25, 1e-24  ;;  %v5214_v29 = vmax.f32 %v2129_v50, 0.0 }
 0x62b   :  { %v4115_v55 = vpop.eup %4114  ;;  %v2286_v57 = vadd.f32 %v2268_v37, %v2252_v10  ;;  %v5218_v60 = vmax.f32 %v2146_v16, 0.0  ;;  %v2127_v42 = vmul.f32 %v4109_v54, %v4998_v19  ;;  %4128 = vrsqrt.f32 %v2083_v32 }
 0x62c   :  { %2290 = vadd.xlane.f32.xlu0 %v2289_v4  ;;  %v4117_v56 = vpop.eup %4116  ;;  %v5216_v30 = vpop.xlane.xlu0 %2051  ;;  %v2144_v58 = vmul.f32 %v4115_v55, %v5076_v48  ;;  %v2068_v4 = vmax.f32 %v5142_v44, 1e-24  ;;  %v2205_v45 = vadd.f32 %v5210_v51, %v5214_v29  ;;  %v5227_v2 = vmax.f32 %v2130_v6, 0.0 }
 0x62d   :  { %v5229_v25 = vmax.f32 %v2143_v33, 0.0  ;;  %v2128_v59 = vmul.f32 %v4117_v56, %v5006_v28  ;;  %4130 = vrsqrt.f32 %v2084_v20  ;;  %v5234_v48 = vmax.f32 %v2127_v42, 0.0 }
 0x62e   :  { %2293 = vadd.xlane.f32.xlu1 %v2292_v43  ;;  %v5223_v26 = vpop.xlane.xlu1 %2053  ;;  %v2208_v19 = vadd.f32 %v5218_v60, %v5227_v2  ;;  %v5236_v44 = vmax.f32 %v2144_v58, 0.0  ;;  %4132 = vrsqrt.f32 %v2068_v4  ;;  %v2273_v28 = vmul.f32 %v5210_v51, %v5210_v51 }
 0x62f   :  { %v4119_v39 = vpop.eup %4118  ;;  %v2199_v27 = vadd.f32 %v5229_v25, %v5234_v48  ;;  %v5240_v11 = vmax.f32 %v2128_v59, 0.0  ;;  %v2071_v43 = vmax.f32 %v5144_v41, 1e-24  ;;  %v2257_v55 = vmul.f32 %v5214_v29, %v5214_v29 }
 0x630   :  { %2284 = vadd.xlane.f32.xlu0 %v2283_v62  ;;  %v4121_v54 = vpop.eup %4120  ;;  %v2056_v13 = vpop.xlane.xlu0 %2055  ;;  %v2274_v32 = vmul.f32 %v5218_v60, %v5218_v60  ;;  %v2258_v6 = vmul.f32 %v5227_v2, %v5227_v2  ;;  %v2073_v33 = vmax.f32 %v5192_v15, 1e-24  ;;  %v2271_v56 = vmul.f32 %v5229_v25, %v5229_v25 }
 0x631   :  { %v4123_v1 = vpop.eup %4122  ;;  %v2202_v16 = vadd.f32 %v5236_v44, %v5240_v11  ;;  %v2089_v62 = vmax.f32 %v2056_v13, 1e-24  ;;  %v2301_v41 = vadd.f32 %v2273_v28, %v2257_v55  ;;  %4134 = vrsqrt.f32 %v2071_v43 }
 0x632   :  { %2287 = vadd.xlane.f32.xlu1 %v2286_v57  ;;  %v4125_v50 = vpop.eup %4124  ;;  %v2058_v37 = vpop.xlane.xlu1 %2057  ;;  %v2255_v58 = vmul.f32 %v5234_v48, %v5234_v48  ;;  %v2133_v4 = vmul.f32 %v4119_v39, %v5013_v3  ;;  %v2304_v59 = vadd.f32 %v2274_v32, %v2258_v6  ;;  %v2272_v15 = vmul.f32 %v5236_v44, %v5236_v44 }
 0x633   :  { %v2149_v20 = vmul.f32 %v4125_v50, %v5083_v5  ;;  %v2090_v42 = vmax.f32 %v2058_v37, 1e-24  ;;  %v2087_v5 = vmax.f32 %v5216_v30, 1e-24  ;;  %4136 = vrsqrt.f32 %v2089_v62 }
 0x634   :  { %2206 = vadd.xlane.f32.xlu0 %v2205_v45  ;;  %v4127_v10 = vpop.eup %4126  ;;  %v2074_v45 = vmax.f32 %v5202_v38, 1e-24  ;;  %v2134_v28 = vmul.f32 %v4121_v54, %v5021_v63  ;;  %4138 = vrsqrt.f32 %v2073_v33  ;;  %v2295_v3 = vadd.f32 %v2271_v56, %v2255_v58 }
 0x635   :  { %v4129_v57 = vpop.eup %4128  ;;  %v5268_v38 = vmax.f32 %v2149_v20, 0.0  ;;  %v2088_v43 = vmax.f32 %v5223_v26, 1e-24  ;;  %4140 = vrsqrt.f32 %v2090_v42  ;;  %v2131_v30 = vmul.f32 %v4123_v1, %v5018_v49 }
 0x636   :  { %2209 = vadd.xlane.f32.xlu1 %v2208_v19  ;;  %v2150_v19 = vmul.f32 %v4127_v10, %v5091_v40  ;;  %v2147_v39 = vmul.f32 %v4129_v57, %v5088_v52  ;;  %v5272_v40 = vmax.f32 %v2133_v4, 0.0  ;;  %4142 = vrsqrt.f32 %v2074_v45 }
 0x637   :  { %v4131_v13 = vpop.eup %4130  ;;  %v2072_v54 = vmax.f32 %v5146_v18, 1e-24  ;;  %4144 = vrsqrt.f32 %v2087_v5  ;;  %v5281_v26 = vmax.f32 %v2134_v28, 0.0  ;;  %v5288_v32 = vmax.f32 %v2131_v30, 0.0 }
 0x638   :  { %2200 = vadd.xlane.f32.xlu0 %v2199_v27  ;;  %v2256_v27 = vmul.f32 %v5240_v11, %v5240_v11  ;;  %v4133_v50 = vpop.eup %4132  ;;  %v2148_v63 = vmul.f32 %v4131_v13, %v5096_v23  ;;  %v2217_v52 = vadd.f32 %v5268_v38, %v5272_v40  ;;  %v5283_v55 = vmax.f32 %v2147_v39, 0.0 }
 0x639   :  { %v2132_v49 = vmul.f32 %v4133_v50, %v5026_v22  ;;  %4146 = vrsqrt.f32 %v2088_v43  ;;  %v2277_v22 = vmul.f32 %v5268_v38, %v5268_v38  ;;  %v2261_v56 = vmul.f32 %v5272_v40, %v5272_v40 }
 0x63a   :  { %2203 = vadd.xlane.f32.xlu1 %v2202_v16  ;;  %v2298_v37 = vadd.f32 %v2272_v15, %v2256_v27  ;;  %v5275_v16 = vmax.f32 %v2150_v19, 0.0  ;;  %v5290_v23 = vmax.f32 %v2148_v63, 0.0  ;;  %4148 = vrsqrt.f32 %v2072_v54 }
 0x63b   :  { %v4135_v18 = vpop.eup %4134  ;;  %v2211_v10 = vadd.f32 %v5283_v55, %v5288_v32  ;;  %v5294_v62 = vmax.f32 %v2132_v49, 0.0  ;;  %v2313_v58 = vadd.f32 %v2277_v22, %v2261_v56  ;;  %v2262_v4 = vmul.f32 %v5281_v26, %v5281_v26 }
 0x63c   :  { %2302 = vadd.xlane.f32.xlu0 %v2301_v41  ;;  %v2220_v1 = vadd.f32 %v5275_v16, %v5281_v26  ;;  %v2278_v20 = vmul.f32 %v5275_v16, %v5275_v16  ;;  %v2275_v45 = vmul.f32 %v5283_v55, %v5283_v55  ;;  %v2259_v19 = vmul.f32 %v5288_v32, %v5288_v32 }
 0x63d   :  { %v4137_v6 = vpop.eup %4136  ;;  %v2214_v41 = vadd.f32 %v5290_v23, %v5294_v62  ;;  %v2276_v5 = vmul.f32 %v5290_v23, %v5290_v23  ;;  %v2260_v39 = vmul.f32 %v5294_v62, %v5294_v62  ;;  %v2135_v63 = vmul.f32 %v4135_v18, %v5035_v34 }
 0x63e   :  { %2305 = vadd.xlane.f32.xlu1 %v2304_v59  ;;  %v4139_v33 = vpop.eup %4138  ;;  %v2153_v59 = vmul.f32 %v4137_v6, %v5111_v12  ;;  %v2316_v13 = vadd.f32 %v2278_v20, %v2262_v4  ;;  %v2307_v50 = vadd.f32 %v2275_v45, %v2259_v19  ;;  %v3982_v19 = vld [vmem:[#allocation6 + $0x80] sm:$0xff]  }
 0x63f   :  { %v4141_v57 = vpop.eup %4140  ;;  %v2137_v27 = vmul.f32 %v4139_v33, %v5103_v31  ;;  %v2310_v54 = vadd.f32 %v2276_v5, %v2260_v39  ;;  %v5336_v18 = vmax.f32 %v2135_v63, 0.0  ;;  %3880 = vmatprep.subr.bf16.mxu0 %v3982_v19  ;;  %v3984_v5 = vld [vmem:[#allocation6 + $0x90] sm:$0xff]  }
 0x640   :  { %2296 = vadd.xlane.f32.xlu0 %v2295_v3  ;;  %v4143_v42 = vpop.eup %4142  ;;  %v2154_v28 = vmul.f32 %v4141_v57, %v5119_v0  ;;  %v5317_v12 = vmax.f32 %v2153_v59, 0.0  ;;  %3881 = vmatpush3.bf16.msra.mxu0 %v3982_v19 }
 0x641   :  { %v4145_v15 = vpop.eup %4144  ;;  %v2138_v43 = vmul.f32 %v4143_v42, %v5108_v21  ;;  %v5322_v31 = vmax.f32 %v2137_v27, 0.0  ;;  %v2263_v33 = vmul.f32 %v5336_v18, %v5336_v18 }
 0x642   :  { %2299 = vadd.xlane.f32.xlu1 %v2298_v37  ;;  %5573 = vst [vmem:[#allocation9_spill] sm:$0xff] %v5317_v12  ;;  %v2151_v30 = vmul.f32 %v4145_v15, %v5114_v35  ;;  %v5324_v0 = vmax.f32 %v2154_v28, 0.0  ;;  %v2281_v57 = vmul.f32 %v5317_v12, %v5317_v12  ;;  %v3985_v28 = vld [vmem:[#allocation6 + $0x98] sm:$0xff]  }
 0x643   :  { %v4147_v3 = vpop.eup %4146  ;;  %v2229_v49 = vadd.f32 %v5317_v12, %v5322_v31 }
 0x644   :  { %2218 = vadd.xlane.f32.xlu0 %v2217_v52  ;;  %v4149_v37 = vpop.eup %4148  ;;  %5574 = vst [vmem:[#allocation10_spill] sm:$0xff] %v5324_v0  ;;  %v2152_v52 = vmul.f32 %v4147_v3, %v5122_v14  ;;  %v5331_v21 = vmax.f32 %v2151_v30, 0.0  ;;  %v2282_v4 = vmul.f32 %v5324_v0, %v5324_v0 }
 0x645   :  { %v2136_v35 = vmul.f32 %v4149_v37, %v5038_v36 }
 0x646   :  { %2221 = vadd.xlane.f32.xlu1 %v2220_v1  ;;  %v5329_v1 = vmax.f32 %v2138_v43, 0.0  ;;  %v2223_v14 = vadd.f32 %v5331_v21, %v5336_v18  ;;  %v2279_v6 = vmul.f32 %v5331_v21, %v5331_v21 }
 0x647   :  { %v5342_v22 = vmax.f32 %v2136_v35, 0.0 }
 0x648   :  { %2212 = vadd.xlane.f32.xlu0 %v2211_v10  ;;  %v2232_v34 = vadd.f32 %v5324_v0, %v5329_v1  ;;  %v5338_v10 = vmax.f32 %v2152_v52, 0.0  ;;  %v2319_v56 = vadd.f32 %v2279_v6, %v2263_v33  ;;  %v2266_v59 = vmul.f32 %v5329_v1, %v5329_v1 }
 0x649   :  { %v2264_v20 = vmul.f32 %v5342_v22, %v5342_v22 }
 0x64a   :  { %2215 = vadd.xlane.f32.xlu1 %v2214_v41  ;;  %v2226_v36 = vadd.f32 %v5338_v10, %v5342_v22  ;;  %v2280_v41 = vmul.f32 %v5338_v10, %v5338_v10  ;;  %v2328_v15 = vadd.f32 %v2282_v4, %v2266_v59 }
 0x64c   :  { %2314 = vadd.xlane.f32.xlu0 %v2313_v58  ;;  %v2322_v42 = vadd.f32 %v2280_v41, %v2264_v20  ;;  %v2265_v58 = vmul.f32 %v5322_v31, %v5322_v31 }
 0x64e   :  { %2317 = vadd.xlane.f32.xlu1 %v2316_v13  ;;  %v2325_v45 = vadd.f32 %v2281_v57, %v2265_v58  ;;  %v3983_v13 = vld [vmem:[#allocation6 + $0x88] sm:$0xff]  }
 0x64f   :  { %3882 = vmatprep.subr.bf16.mxu0 %v3983_v13 }
 0x650   :  { %2308 = vadd.xlane.f32.xlu0 %v2307_v50  ;;  %3883 = vmatpush3.bf16.msra.mxu0 %v3983_v13  ;;  %v3986_v50 = vld [vmem:[#allocation6 + $0xa0] sm:$0xff]  }
 0x651   :  { %3884 = vmatprep.subr.bf16.mxu0 %v3984_v5 }
 0x652   :  { %2311 = vadd.xlane.f32.xlu1 %v2310_v54  ;;  %v3987_v54 = vld [vmem:[#allocation6 + $0xa8] sm:$0xff]  }
 0x654   :  { %2230 = vadd.xlane.f32.xlu0 %v2229_v49  ;;  %3885 = vmatpush3.bf16.msra.mxu0 %v3984_v5  ;;  %v3989_v5 = vld [vmem:[#allocation6 + $0xb8] sm:$0xff]  }
 0x655   :  { %3886 = vmatprep.subr.bf16.mxu0 %v3985_v28 }
 0x656   :  { %2233 = vadd.xlane.f32.xlu1 %v2232_v34 }
 0x658   :  { %2224 = vadd.xlane.f32.xlu0 %v2223_v14  ;;  %3887 = vmatpush3.bf16.msra.mxu0 %v3985_v28 }
 0x659   :  { %3888 = vmatprep.subr.bf16.mxu0 %v3986_v50 }
 0x65a   :  { %2227 = vadd.xlane.f32.xlu1 %v2226_v36 }
 0x65c   :  { %2320 = vadd.xlane.f32.xlu0 %v2319_v56  ;;  %3889 = vmatpush3.bf16.msra.mxu0 %v3986_v50  ;;  %v3988_v56 = vld [vmem:[#allocation6 + $0xb0] sm:$0xff]  }
 0x65d   :  { %3890 = vmatprep.subr.bf16.mxu0 %v3987_v54 }
 0x65e   :  { %2323 = vadd.xlane.f32.xlu1 %v2322_v42 }
 0x660   :  { %2326 = vadd.xlane.f32.xlu0 %v2325_v45  ;;  %3891 = vmatpush3.bf16.msra.mxu0 %v3987_v54 }
 0x661   :  { %3892 = vmatprep.subr.bf16.mxu0 %v3988_v56 }
 0x662   :  { %2329 = vadd.xlane.f32.xlu1 %v2328_v15 }
 0x664   :  { %3893 = vmatpush3.bf16.msra.mxu0 %v3988_v56 }
 0x665   :  { %3894 = vmatprep.subr.bf16.mxu0 %v3989_v5 }
 0x668   :  { %3895 = vmatpush3.bf16.msra.mxu0 %v3989_v5 }
 0x6b1   :  { %v2195_v27 = vpop.xlane.xlu0 %2194 }
 0x6b2   :  { %v5362_v43 = vmul.f32 0.015625, %v2195_v27 }
 0x6b3   :  { %v2198_v3 = vpop.xlane.xlu1 %2197 }
 0x6b4   :  { %v5364_v37 = vmul.f32 0.015625, %v2198_v3  ;;  %v2349_v49 = vmul.f32 %v5362_v43, %v5362_v43  ;;  %v2381_v54 = vsub.f32 %v5151_v17, %v5362_v43 }
 0x6b5   :  { %v2189_v39 = vpop.xlane.xlu0 %2188 }
 0x6b6   :  { %v5366_v52 = vmul.f32 0.015625, %v2189_v39  ;;  %v2350_v36 = vmul.f32 %v5364_v37, %v5364_v37  ;;  %v2382_v56 = vsub.f32 %v5158_v46, %v5364_v37 }
 0x6b7   :  { %v2192_v30 = vpop.xlane.xlu1 %2191 }
 0x6b8   :  { %v5370_v34 = vmul.f32 0.015625, %v2192_v30  ;;  %v2347_v42 = vmul.f32 %v5366_v52, %v5366_v52 }
 0x6b9   :  { %v2291_v63 = vpop.xlane.xlu0 %2290 }
 0x6ba   :  { %v2333_v35 = vmul.f32 0.015625, %v2291_v63  ;;  %v2348_v4 = vmul.f32 %v5370_v34, %v5370_v34 }
 0x6bb   :  { %v2294_v14 = vpop.xlane.xlu1 %2293 }
 0x6bc   :  { %v2365_v6 = vsub.f32 %v2333_v35, %v2349_v49  ;;  %v2334_v33 = vmul.f32 0.015625, %v2294_v14 }
 0x6bd   :  { %v2285_v41 = vpop.xlane.xlu0 %2284 }
 0x6be   :  { %v2413_v20 = vadd.f32 1e-05, %v2365_v6  ;;  %v2366_v57 = vsub.f32 %v2334_v33, %v2350_v36  ;;  %v2331_v58 = vmul.f32 0.015625, %v2285_v41  ;;  %v2397_v6 = vsub.f32 %v5153_v53, %v5362_v43 }
 0x6bf   :  { %v2288_v45 = vpop.xlane.xlu1 %2287  ;;  %v2395_v53 = vsub.f32 %v5172_v7, %v5366_v52  ;;  %v2380_v43 = vsub.f32 %v5178_v24, %v5370_v34 }
 0x6c0   :  { %4150 = vrsqrt.f32 %v2413_v20  ;;  %v2414_v59 = vadd.f32 1e-05, %v2366_v57  ;;  %v2363_v15 = vsub.f32 %v2331_v58, %v2347_v42  ;;  %v2332_v19 = vmul.f32 0.015625, %v2288_v45 }
 0x6c1   :  { %v2207_v13 = vpop.xlane.xlu0 %2206  ;;  %v2398_v20 = vsub.f32 %v5162_v61, %v5364_v37  ;;  %v2379_v57 = vsub.f32 %v5170_v47, %v5366_v52  ;;  %v2396_v61 = vsub.f32 %v5180_v9, %v5370_v34 }
 0x6c2   :  { %4152 = vrsqrt.f32 %v2414_v59  ;;  %v2411_v27 = vadd.f32 1e-05, %v2363_v15  ;;  %v2364_v28 = vsub.f32 %v2332_v19, %v2348_v4  ;;  %v5378_v30 = vmul.f32 0.015625, %v2207_v13 }
 0x6c3   :  { %v2210_v3 = vpop.xlane.xlu1 %2209 }
 0x6c4   :  { %4154 = vrsqrt.f32 %v2411_v27  ;;  %v2412_v39 = vadd.f32 1e-05, %v2364_v28  ;;  %v5380_v49 = vmul.f32 0.015625, %v2210_v3  ;;  %v2353_v17 = vmul.f32 %v5378_v30, %v5378_v30 }
 0x6c5   :  { %v2201_v50 = vpop.xlane.xlu0 %2200 }
 0x6c6   :  { %4156 = vrsqrt.f32 %v2412_v39  ;;  %v5386_v36 = vmul.f32 0.015625, %v2201_v50  ;;  %v2354_v46 = vmul.f32 %v5380_v49, %v5380_v49 }
 0x6c7   :  { %v2204_v63 = vpop.xlane.xlu1 %2203 }
 0x6c8   :  { %v5388_v33 = vmul.f32 0.015625, %v2204_v63  ;;  %v2351_v13 = vmul.f32 %v5386_v36, %v5386_v36 }
 0x6c9   :  { %v2303_v35 = vpop.xlane.xlu0 %2302 }
 0x6ca   :  { %v4151_v14 = vpop.eup %4150  ;;  %v2337_v41 = vmul.f32 0.015625, %v2303_v35  ;;  %v2352_v24 = vmul.f32 %v5388_v33, %v5388_v33 }
 0x6cb   :  { %v2306_v42 = vpop.xlane.xlu1 %2305  ;;  %v2461_v45 = vmul.f32 %v4151_v14, %v2397_v6  ;;  %v2445_v27 = vmul.f32 %v4151_v14, %v2381_v54 }
 0x6cc   :  { %v4153_v58 = vpop.eup %4152  ;;  %v2338_v4 = vmul.f32 0.015625, %v2306_v42  ;;  %v2369_v37 = vsub.f32 %v2337_v41, %v2353_v17 }
 0x6cd   :  { %v2297_v47 = vpop.xlane.xlu0 %2296  ;;  %v2462_v59 = vmul.f32 %v4153_v58, %v2398_v20  ;;  %v2446_v63 = vmul.f32 %v4153_v58, %v2382_v56 }
 0x6ce   :  { %v4155_v15 = vpop.eup %4154  ;;  %v2370_v19 = vsub.f32 %v2338_v4, %v2354_v46  ;;  %v2335_v7 = vmul.f32 0.015625, %v2297_v47  ;;  %v2417_v35 = vadd.f32 1e-05, %v2369_v37 }
 0x6cf   :  { %v2300_v52 = vpop.xlane.xlu1 %2299  ;;  %v2443_v5 = vmul.f32 %v4155_v15, %v2379_v57  ;;  %v5410_v28 = vmul.f32 %v4155_v15, %v2395_v53  ;;  %v5412_v3 = vpack.c.bf16 %v2462_v59, %v2461_v45 }
 0x6d0   :  { %v4157_v9 = vpop.eup %4156  ;;  %v2418_v34 = vadd.f32 1e-05, %v2370_v19  ;;  %v2367_v39 = vsub.f32 %v2335_v7, %v2351_v13  ;;  %v2336_v50 = vmul.f32 0.015625, %v2300_v52 }
 0x6d1   :  { %v2219_v6 = vpop.xlane.xlu0 %2218  ;;  %v2444_v41 = vmul.f32 %v4157_v9, %v2380_v43  ;;  %v2507_v20 = vmax.f32 %v2443_v5, -1e+30  ;;  %v5414_v17 = vmul.f32 %v4157_v9, %v2396_v61  ;;  %v2528_v54 = vmax.f32 %v5410_v28, -1e+30 }
 0x6d2   :  { %4158 = vrsqrt.f32 %v2418_v34  ;;  %v2415_v42 = vadd.f32 1e-05, %v2367_v39  ;;  %v2368_v46 = vsub.f32 %v2336_v50, %v2352_v24  ;;  %v2575_v61 = vpack.c.bf16 %v2446_v63, %v2445_v27 }
 0x6d3   :  { %v2222_v14 = vpop.xlane.xlu1 %2221  ;;  %v2508_v57 = vmax.f32 %v2444_v41, -1e+30  ;;  %v2509_v53 = vmax.f32 %v2507_v20, -1e+30  ;;  %v2574_v4 = vpack.c.bf16 %v2444_v41, %v2443_v5  ;;  %v2529_v47 = vmax.f32 %v5414_v17, -1e+30 }
 0x6d4   :  { %4160 = vrsqrt.f32 %v2415_v42  ;;  %v2416_v45 = vadd.f32 1e-05, %v2368_v46  ;;  %v5418_v37 = vmul.f32 0.015625, %v2219_v6  ;;  %v2530_v59 = vmax.f32 %v2528_v54, -1e+30 }
 0x6d5   :  { %4162 = vrsqrt.f32 %v2417_v35  ;;  %v2213_v56 = vpop.xlane.xlu0 %2212  ;;  %v2510_v58 = vmax.f32 %v2508_v57, -1e+30  ;;  %v2511_v43 = vmax.f32 %v2509_v53, -1e+30  ;;  %3816 = vmatprep.subr.bf16.mxu1 %v2574_v4  ;;  %v2531_v7 = vmax.f32 %v2529_v47, -1e+30 }
 0x6d6   :  { %4164 = vrsqrt.f32 %v2416_v45  ;;  %3817 = vmatpush3.bf16.msra.mxu1 %v2574_v4  ;;  %v5420_v24 = vmul.f32 0.015625, %v2222_v14  ;;  %v5422_v52 = vmul.f32 0.015625, %v2213_v56  ;;  %v2385_v9 = vsub.f32 %v5214_v29, %v5378_v30 }
 0x6d7   :  { %v2512_v15 = vmax.f32 %v2510_v58, -1e+30  ;;  %v2513_v19 = vmax.f32 %v2511_v43, -1e+30  ;;  %3818 = vmatprep.subr.bf16.mxu1 %v2575_v61  ;;  %v2216_v13 = vpop.xlane.xlu1 %2215  ;;  %v2532_v50 = vmax.f32 %v2530_v59, -1e+30  ;;  %v2386_v63 = vsub.f32 %v5227_v2, %v5380_v49 }
 0x6d8   :  { %v5424_v5 = vmul.f32 0.015625, %v2216_v13  ;;  %v2383_v35 = vsub.f32 %v5234_v48, %v5386_v36  ;;  %v2357_v6 = vmul.f32 %v5418_v37, %v5418_v37  ;;  %v2384_v20 = vsub.f32 %v5240_v11, %v5388_v33 }
 0x6d9   :  { %v2514_v27 = vmax.f32 %v2512_v15, -1e+30  ;;  %v2515_v34 = vmax.f32 %v2513_v19, -1e+30  ;;  %v2315_v39 = vpop.xlane.xlu0 %2314  ;;  %v2533_v54 = vmax.f32 %v2531_v7, -1e+30  ;;  %v2358_v2 = vmul.f32 %v5420_v24, %v5420_v24 }
 0x6da   :  { %v2341_v41 = vmul.f32 0.015625, %v2315_v39  ;;  %3819 = vmatpush3.bf16.msra.mxu1 %v2575_v61  ;;  %v2534_v48 = vmax.f32 %v2532_v50, -1e+30  ;;  %v2355_v47 = vmul.f32 %v5422_v52, %v5422_v52  ;;  %v2356_v11 = vmul.f32 %v5424_v5, %v5424_v5 }
 0x6db   :  { %v2516_v42 = vmax.f32 %v2514_v27, -1e+30  ;;  %v2517_v29 = vmax.f32 %v2515_v34, -1e+30  ;;  %v2318_v46 = vpop.xlane.xlu1 %2317  ;;  %v2535_v56 = vmax.f32 %v2533_v54, -1e+30 }
 0x6dc   :  { %v5436_v14 = vpop.eup %4158  ;;  %v2373_v57 = vsub.f32 %v2341_v41, %v2357_v6  ;;  %v2342_v53 = vmul.f32 0.015625, %v2318_v46  ;;  %v2536_v15 = vmax.f32 %v2534_v48, -1e+30 }
 0x6dd   :  { %v2518_v4 = vmax.f32 %v2516_v42, -1e+30  ;;  %v2309_v45 = vpop.xlane.xlu0 %2308  ;;  %v2519_v43 = vmax.f32 %v2517_v29, -1e+30  ;;  %v2450_v34 = vmul.f32 %v5436_v14, %v2386_v63  ;;  %v2537_v39 = vmax.f32 %v2535_v56, -1e+30 }
 0x6de   :  { %v5444_v58 = vpop.eup %4160  ;;  %v2374_v61 = vsub.f32 %v2342_v53, %v2358_v2  ;;  %v2339_v59 = vmul.f32 0.015625, %v2309_v45  ;;  %v2421_v7 = vadd.f32 1e-05, %v2373_v57  ;;  %v2538_v53 = vmax.f32 %v2536_v15, -1e+30 }
 0x6df   :  { %v5446_v19 = vpop.eup %4162  ;;  %v2520_v13 = vmax.f32 %v2518_v4, -1e+30  ;;  %v2312_v27 = vpop.xlane.xlu1 %2311  ;;  %v2447_v46 = vmul.f32 %v5444_v58, %v2383_v35  ;;  %v2539_v48 = vmax.f32 %v2537_v39, -1e+30 }
 0x6e0   :  { %v5449_v50 = vpop.eup %4164  ;;  %v2422_v6 = vadd.f32 1e-05, %v2374_v61  ;;  %v2371_v41 = vsub.f32 %v2339_v59, %v2355_v47  ;;  %v2340_v42 = vmul.f32 0.015625, %v2312_v27  ;;  %v2449_v45 = vmul.f32 %v5446_v19, %v2385_v9 }
 0x6e1   :  { %v2521_v54 = vmax.f32 %v2519_v43, %v2520_v13  ;;  %v2231_v29 = vpop.xlane.xlu0 %2230  ;;  %v2448_v2 = vmul.f32 %v5449_v50, %v2384_v20  ;;  %v2540_v0 = vmax.f32 %v2538_v53, -1e+30  ;;  %v2541_v61 = vmax.f32 %v2539_v48, -1e+30 }
 0x6e2   :  { %4166 = vrsqrt.f32 %v2422_v6  ;;  %v2419_v4 = vadd.f32 1e-05, %v2371_v41  ;;  %v2372_v57 = vsub.f32 %v2340_v42, %v2356_v11  ;;  %v2577_v43 = vpack.c.bf16 %v2450_v34, %v2449_v45 }
 0x6e3   :  { %v2522_v63 = vrot.slane %v2521_v54, 4  ;;  %v2234_v56 = vpop.xlane.xlu1 %2233  ;;  %v2576_v12 = vpack.c.bf16 %v2448_v2, %v2447_v46  ;;  %v2542_v20 = vmax.f32 %v2540_v0, %v2541_v61  ;;  %v5458_v6 = vmul.f32 0.015625, %v2231_v29 }
 0x6e4   :  { %4168 = vrsqrt.f32 %v2419_v4  ;;  %v2420_v47 = vadd.f32 1e-05, %v2372_v57  ;;  %v5462_v0 = vmul.f32 0.015625, %v2234_v56  ;;  %v2389_v29 = vsub.f32 %v5272_v40, %v5418_v37 }
 0x6e5   :  { %v2523_v59 = vmax.f32 %v2521_v54, %v2522_v63  ;;  %4170 = vrsqrt.f32 %v2421_v7  ;;  %v2225_v35 = vpop.xlane.xlu0 %2224  ;;  %3820 = vmatprep.subr.bf16.mxu1 %v2576_v12  ;;  %v2543_v39 = vrot.slane %v2542_v20, 4  ;;  %v2390_v48 = vsub.f32 %v5281_v26, %v5420_v24 }
 0x6e6   :  { %4172 = vrsqrt.f32 %v2420_v47  ;;  %v5454_v15 = vmul.f32 0.015625, %v2225_v35  ;;  %3821 = vmatpush3.bf16.msra.mxu1 %v2576_v12  ;;  %v2387_v4 = vsub.f32 %v5288_v32, %v5422_v52  ;;  %v2361_v47 = vmul.f32 %v5458_v6, %v5458_v6 }
 0x6e7   :  { %v2524_v11 = vrot.slane %v2523_v59, 2  ;;  %3822 = vmatprep.subr.bf16.mxu1 %v2577_v43  ;;  %v2228_v9 = vpop.xlane.xlu1 %2227  ;;  %v2544_v46 = vmax.f32 %v2542_v20, %v2543_v39  ;;  %v2388_v40 = vsub.f32 %v5294_v62, %v5424_v5  ;;  %v2362_v26 = vmul.f32 %v5462_v0, %v5462_v0 }
 0x6e8   :  { %v5456_v13 = vmul.f32 0.015625, %v2228_v9  ;;  %v2359_v7 = vmul.f32 %v5454_v15, %v5454_v15 }
 0x6e9   :  { %v2321_v27 = vpop.xlane.xlu0 %2320  ;;  %v2525_v34 = vmax.f32 %v2523_v59, %v2524_v11  ;;  %v2545_v45 = vrot.slane %v2544_v46, 2 }
 0x6ea   :  { %v2343_v41 = vmul.f32 0.015625, %v2321_v27  ;;  %3823 = vmatpush3.bf16.msra.mxu1 %v2577_v43  ;;  %v2360_v2 = vmul.f32 %v5456_v13, %v5456_v13 }
 0x6eb   :  { %v2324_v42 = vpop.xlane.xlu1 %2323  ;;  %v2526_v43 = vrot.slane %v2525_v34, 1  ;;  %v2546_v20 = vmax.f32 %v2544_v46, %v2545_v45 }
 0x6ec   :  { %v5464_v12 = vpop.eup %4166  ;;  %v2375_v54 = vsub.f32 %v2343_v41, %v2359_v7  ;;  %v2344_v53 = vmul.f32 0.015625, %v2324_v42 }
 0x6ed   :  { %v2327_v57 = vpop.xlane.xlu0 %2326  ;;  %v2454_v42 = vmul.f32 %v5464_v12, %v2390_v48 }
 0x6ee   :  { %v5474_v63 = vpop.eup %4168  ;;  %v2423_v56 = vadd.f32 1e-05, %v2375_v54  ;;  %v2376_v61 = vsub.f32 %v2344_v53, %v2360_v2  ;;  %v2345_v59 = vmul.f32 0.015625, %v2327_v57  ;;  %v2547_v54 = vrot.slane %v2546_v20, 1 }
 0x6ef   :  { %v5478_v35 = vpop.eup %4170  ;;  %v2330_v32 = vpop.xlane.xlu1 %2329  ;;  %v2451_v7 = vmul.f32 %v5474_v63, %v2387_v4  ;;  %v2527_v53 = vmax.f32 %v2525_v34, %v2526_v43  ;;  %v2392_v43 = vsub.f32 %v5342_v22, %v5456_v13  ;;  %v2394_v22 = vsub.f32 %v5329_v1, %v5462_v0  ;;  %v4206_v1 = vld [vmem:[#allocation2 + $0x8] sm:$0xff]  }
 0x6f0   :  { %v5484_v11 = vpop.eup %4172  ;;  %4174 = vrsqrt.f32 %v2423_v56  ;;  %v2424_v9 = vadd.f32 1e-05, %v2376_v61  ;;  %v2377_v27 = vsub.f32 %v2345_v59, %v2361_v47  ;;  %v2346_v39 = vmul.f32 0.015625, %v2330_v32 }
 0x6f1   :  { %v2452_v41 = vmul.f32 %v5484_v11, %v2388_v40  ;;  %v2453_v46 = vmul.f32 %v5478_v35, %v2389_v29  ;;  %v2548_v45 = vmax.f32 %v2546_v20, %v2547_v54  ;;  %v2557_v4 = vrot.slane %v2527_v53, %v4902_v8 }
 0x6f2   :  { %4176 = vrsqrt.f32 %v2424_v9  ;;  %v2425_v62 = vadd.f32 1e-05, %v2377_v27  ;;  %v2378_v2 = vsub.f32 %v2346_v39, %v2362_v26  ;;  %v2391_v29 = vsub.f32 %v5336_v18, %v5454_v15 }
 0x6f3   :  { %v2578_v57 = vpack.c.bf16 %v2452_v41, %v2451_v7  ;;  %v2579_v61 = vpack.c.bf16 %v2454_v42, %v2453_v46  ;;  %v2564_v47 = vrot.slane %v2548_v45, %v4902_v8  ;;  %v2393_v18 = vsub.f32 %v5322_v31, %v5458_v6  ;;  %v4207_v46 = vld [vmem:[#allocation2 + $0x10] sm:$0xff]  }
 0x6f4   :  { %4178 = vrsqrt.f32 %v2425_v62  ;;  %v2426_v56 = vadd.f32 1e-05, %v2378_v2  ;;  %v2582_v2 = vpack.c.bf16 %v5414_v17, %v5410_v28  ;;  %v2400_v53 = vsub.f32 %v5236_v44, %v5388_v33 }
 0x6f5   :  { %3824 = vmatprep.subr.bf16.mxu1 %v2578_v57  ;;  %v2567_v48 = vrot.slane %v2564_v47, 7  ;;  %v2399_v31 = vsub.f32 %v5229_v25, %v5386_v36  ;;  %v2402_v45 = vsub.f32 %v5218_v60, %v5380_v49  ;;  %v2401_v44 = vsub.f32 %v5210_v51, %v5378_v30  ;;  %v4208_v49 = vld [vmem:[#allocation2 + $0x18] sm:$0xff]   ;;  %v4209_v51 = vld [vmem:[#allocation2 + $0x20] sm:$0xff]  }
 0x6f6   :  { %4180 = vrsqrt.f32 %v2426_v56  ;;  %3825 = vmatpush3.bf16.msra.mxu1 %v2578_v57  ;;  %v2464_v57 = vmul.f32 %v5449_v50, %v2400_v53  ;;  %v2404_v36 = vsub.f32 %v5290_v23, %v5424_v5  ;;  %v2403_v60 = vsub.f32 %v5283_v55, %v5422_v52  ;;  %v4213_v47 = vld [vmem:[#allocation2 + $0x40] sm:$0xff]  }
 0x6f7   :  { %3826 = vmatprep.subr.bf16.mxu1 %v2579_v61  ;;  %v2568_v59 = vsel %vm1461_vm0, %v2567_v48, %v2557_v4  ;;  %v2463_v28 = vmul.f32 %v5444_v58, %v2399_v31  ;;  %v2466_v25 = vmul.f32 %v5436_v14, %v2402_v45  ;;  %v2465_v17 = vmul.f32 %v5446_v19, %v2401_v44  ;;  %v4215_v4 = vld [vmem:[#allocation2 + $0x50] sm:$0xff]  }
 0x6f8   :  { %v2569_v34 = vsel %vm1463_vm1, %v2567_v48, %v2568_v59  ;;  %v2468_v50 = vmul.f32 %v5484_v11, %v2404_v36  ;;  %v2406_v30 = vsub.f32 %v5275_v16, %v5420_v24  ;;  %v2467_v23 = vmul.f32 %v5474_v63, %v2403_v60  ;;  %v4210_v16 = vld [vmem:[#allocation2 + $0x28] sm:$0xff]   ;;  %v4211_v11 = vld [vmem:[#allocation2 + $0x30] sm:$0xff]  }
 0x6f9   :  { %v2570_v26 = vsel %vm1465_vm2, %v2567_v48, %v2569_v34  ;;  %v2584_v33 = vpack.c.bf16 %v2464_v57, %v2463_v28  ;;  %v2585_v58 = vpack.c.bf16 %v2466_v25, %v2465_v17  ;;  %v2408_v52 = vsub.f32 %v5338_v10, %v5456_v13  ;;  %v5576_v10 = vld [vmem:[#allocation9_spill] sm:$0xff]  ;;  %v4218_v59 = vld [vmem:[#allocation2 + $0x68] sm:$0xff]   ;;  %v4220_v34 = vld [vmem:[#allocation2 + $0x78] sm:$0xff]  }
 0x6fa   :  { %v5493_v40 = vpop.eup %4174  ;;  %3827 = vmatpush3.bf16.msra.mxu1 %v2579_v61  ;;  %v2571_v20 = vsel %vm1467_vm3, %v2567_v48, %v2570_v26  ;;  %v2586_v5 = vpack.c.bf16 %v2468_v50, %v2467_v23  ;;  %v2470_v55 = vmul.f32 %v5464_v12, %v2406_v30  ;;  %v2407_v19 = vsub.f32 %v5331_v21, %v5454_v15  ;;  %v4212_v15 = vld [vmem:[#allocation2 + $0x38] sm:$0xff]  }
 0x6fb   :  { %v2455_v9 = vmul.f32 %v5493_v40, %v2391_v29  ;;  %2573 = vst [vmem:[%s5567_s4 + $0x2] sm:$0x3] %v2571_v20  ;;  %v2409_v13 = vsub.f32 %v5576_v10, %v5458_v6  ;;  %v4216_v48 = vld [vmem:[#allocation2 + $0x58] sm:$0xff]   ;;  %v4217_v6 = vld [vmem:[#allocation2 + $0x60] sm:$0xff]  }
 0x6fc   :  { %v4177_v32 = vpop.eup %4176  ;;  %v2471_v12 = vmul.f32 %v5493_v40, %v2407_v19  ;;  %v4219_v40 = vld [vmem:[#allocation2 + $0x70] sm:$0xff]  }
 0x6fd   :  { %v2456_v27 = vmul.f32 %v4177_v32, %v2392_v43  ;;  %v2472_v63 = vmul.f32 %v4177_v32, %v2408_v52 }
 0x6fe   :  { %v5506_v39 = vpop.eup %4178 }
 0x6ff   :  { %v2580_v7 = vpack.c.bf16 %v2456_v27, %v2455_v9  ;;  %v2457_v42 = vmul.f32 %v5506_v39, %v2393_v18  ;;  %v2473_v21 = vmul.f32 %v5506_v39, %v2409_v13 }
 0x700   :  { %v4181_v41 = vpop.eup %4180 }
 0x701   :  { %3828 = vmatprep.subr.bf16.mxu1 %v2580_v7  ;;  %v2458_v54 = vmul.f32 %v4181_v41, %v2394_v22 }
 0x702   :  { %3829 = vmatpush3.bf16.msra.mxu1 %v2580_v7 }
 0x703   :  { %v2581_v62 = vpack.c.bf16 %v2458_v54, %v2457_v42 }
 0x705   :  { %3830 = vmatprep.subr.bf16.mxu1 %v2581_v62 }
 0x706   :  { %3831 = vmatpush3.bf16.msra.mxu1 %v2581_v62 }
 0x707   :  { %3848 = vmatprep.subr.bf16.mxu1 %v2582_v2 }
 0x709   :  { %3833 = vmatmul.mubr.bf16.vlgmr.msra.gmra.mrb[64].mxu1 %v4206_v1 }
 0x70a   :  { %3849 = vmatpush3.bf16.msra.mxu1 %v2582_v2  ;;  %3836 = vmatprep.mubr.bf16.mxu1 %v4207_v46 }
 0x70b   :  { %3850 = vmatprep.subr.bf16.mxu1 %v5412_v3 }
 0x70e   :  { %3851 = vmatpush3.bf16.msra.mxu1 %v5412_v3  ;;  %v2405_v3 = vsub.f32 %v5268_v38, %v5418_v37  ;;  %v5575_v38 = vld [vmem:[#allocation10_spill] sm:$0xff] }
 0x70f   :  { %3852 = vmatprep.subr.bf16.mxu1 %v2584_v33  ;;  %v2410_v37 = vsub.f32 %v5575_v38, %v5462_v0  ;;  %v4214_v0 = vld [vmem:[#allocation2 + $0x48] sm:$0xff]  }
 0x710   :  { %v2469_v14 = vmul.f32 %v5478_v35, %v2405_v3  ;;  %v2588_v35 = vpack.c.bf16 %v2472_v63, %v2471_v12 }
 0x711   :  { %3837 = vmatmul.mubr.bf16.gmra.mrb[68].mxu1 %v4208_v49  ;;  %v2474_v56 = vmul.f32 %v4181_v41, %v2410_v37 }
 0x712   :  { %3853 = vmatpush3.bf16.msra.mxu1 %v2584_v33  ;;  %3840 = vmatprep.mubr.bf16.mxu1 %v4209_v51  ;;  %v2587_v24 = vpack.c.bf16 %v2470_v55, %v2469_v14 }
 0x713   :  { %3854 = vmatprep.subr.bf16.mxu1 %v2585_v58  ;;  %v2589_v61 = vpack.c.bf16 %v2474_v56, %v2473_v21 }
 0x716   :  { %3855 = vmatpush3.bf16.msra.mxu1 %v2585_v58 }
 0x717   :  { %3856 = vmatprep.subr.bf16.mxu1 %v2586_v5 }
 0x719   :  { %3841 = vmatmul.mubr.bf16.gmra.mrb[72].mxu1 %v4210_v16 }
 0x71a   :  { %3857 = vmatpush3.bf16.msra.mxu1 %v2586_v5  ;;  %3844 = vmatprep.mubr.bf16.mxu1 %v4211_v11 }
 0x71b   :  { %3858 = vmatprep.subr.bf16.mxu1 %v2587_v24 }
 0x71e   :  { %3859 = vmatpush3.bf16.msra.mxu1 %v2587_v24 }
 0x71f   :  { %3860 = vmatprep.subr.bf16.mxu1 %v2588_v35 }
 0x721   :  { %3845 = vmatmul.mubr.bf16.gmra.mrb[76].mxu1 %v4212_v15 }
 0x722   :  { %3861 = vmatpush3.bf16.msra.mxu1 %v2588_v35  ;;  %3864 = vmatprep.mubr.bf16.mxu1 %v4213_v47 }
 0x723   :  { %3862 = vmatprep.subr.bf16.mxu1 %v2589_v61 }
 0x726   :  { %3863 = vmatpush3.bf16.msra.mxu1 %v2589_v61 }
 0x729   :  { %3865 = vmatmul.mubr.bf16.vlgmr.msra.gmra.mrb[80].mxu1 %v4214_v0 }
 0x72a   :  { %3868 = vmatprep.mubr.bf16.mxu1 %v4215_v4 }
 0x731   :  { %3869 = vmatmul.mubr.bf16.gmra.mrb[84].mxu1 %v4216_v48 }
 0x732   :  { %3872 = vmatprep.mubr.bf16.mxu1 %v4217_v6 }
 0x739   :  { %3873 = vmatmul.mubr.bf16.gmra.mrb[88].mxu1 %v4218_v59 }
 0x73a   :  { %3876 = vmatprep.mubr.bf16.mxu1 %v4219_v40 }
 0x741   :  { %3877 = vmatmul.mubr.bf16.gmra.mrb[92].mxu1 %v4220_v34 }
 0x7dc   :  { %v3834_v29 = vpop.f32.mrb[64].mxu1 }
 0x7dd   :  { %v2643_v43 = vpop.f32.mrb[65].mxu1 }
 0x7de   :  { %v3835_v26 = vpop.f32.mrb[66].mxu1 }
 0x7df   :  { %v2804_v32 = vpack.c.bf16 %v3835_v26, %v3834_v29  ;;  %v2646_v20 = vpop.f32.mrb[67].mxu1  ;;  %v3423_v26 = vld [vmem:[%s5566_s3 + $0x2] ss:$0 sm:$0xff] }
 0x7e0   :  { %v2803_v9 = vpack.c.bf16 %v2646_v20, %v2643_v43 }
 0x7e2   :  { %3896 = vmatprep.mubr.bf16.mxu0 %v2803_v9 }
 0x7e3   :  { %3897 = vmatmul.mubr.bf16.vlgmr.msra.gmra.mrb[64].mxu0 %v2804_v32 }
 0x7e4   :  { %v3838_v27 = vpop.f32.mrb[68].mxu1 }
 0x7e5   :  { %v2659_v39 = vpop.f32.mrb[69].mxu1 }
 0x7e6   :  { %v3839_v18 = vpop.f32.mrb[70].mxu1 }
 0x7e7   :  { %v2806_v22 = vpack.c.bf16 %v3839_v18, %v3838_v27  ;;  %v2662_v7 = vpop.f32.mrb[71].mxu1 }
 0x7e8   :  { %v2805_v41 = vpack.c.bf16 %v2662_v7, %v2659_v39 }
 0x7ea   :  { %3900 = vmatprep.mubr.bf16.mxu0 %v2805_v41 }
 0x7eb   :  { %3901 = vmatmul.mubr.bf16.gmra.mrb[68].mxu0 %v2806_v22 }
 0x7ec   :  { %v3842_v42 = vpop.f32.mrb[72].mxu1 }
 0x7ed   :  { %v2675_v54 = vpop.f32.mrb[73].mxu1 }
 0x7ee   :  { %v3843_v62 = vpop.f32.mrb[74].mxu1 }
 0x7ef   :  { %v2808_v2 = vpack.c.bf16 %v3843_v62, %v3842_v42  ;;  %v2678_v53 = vpop.f32.mrb[75].mxu1 }
 0x7f0   :  { %v2807_v31 = vpack.c.bf16 %v2678_v53, %v2675_v54 }
 0x7f2   :  { %3904 = vmatprep.mubr.bf16.mxu0 %v2807_v31 }
 0x7f3   :  { %3905 = vmatmul.mubr.bf16.gmra.mrb[72].mxu0 %v2808_v2 }
 0x7f4   :  { %v3846_v1 = vpop.f32.mrb[76].mxu1 }
 0x7f5   :  { %v2691_v57 = vpop.f32.mrb[77].mxu1 }
 0x7f6   :  { %v3847_v46 = vpop.f32.mrb[78].mxu1 }
 0x7f7   :  { %v2810_v45 = vpack.c.bf16 %v3847_v46, %v3846_v1  ;;  %v2694_v28 = vpop.f32.mrb[79].mxu1 }
 0x7f8   :  { %v2809_v44 = vpack.c.bf16 %v2694_v28, %v2691_v57 }
 0x7fa   :  { %3908 = vmatprep.mubr.bf16.mxu0 %v2809_v44 }
 0x7fb   :  { %3909 = vmatmul.mubr.bf16.gmra.mrb[76].mxu0 %v2810_v45 }
 0x7fc   :  { %v3866_v33 = vpop.f32.mrb[80].mxu1 }
 0x7fd   :  { %v2740_v25 = vpop.f32.mrb[81].mxu1 }
 0x7fe   :  { %v3867_v36 = vpop.f32.mrb[82].mxu1 }
 0x7ff   :  { %v2812_v17 = vpack.c.bf16 %v3867_v36, %v3866_v33  ;;  %v2743_v60 = vpop.f32.mrb[83].mxu1 }
 0x800   :  { %v2811_v49 = vpack.c.bf16 %v2743_v60, %v2740_v25 }
 0x802   :  { %3912 = vmatprep.mubr.bf16.mxu0 %v2811_v49 }
 0x803   :  { %3913 = vmatmul.mubr.bf16.gmra.mrb[80].mxu0 %v2812_v17 }
 0x804   :  { %v3870_v58 = vpop.f32.mrb[84].mxu1 }
 0x805   :  { %v2756_v50 = vpop.f32.mrb[85].mxu1 }
 0x806   :  { %v3871_v51 = vpop.f32.mrb[86].mxu1 }
 0x807   :  { %v2814_v30 = vpack.c.bf16 %v3871_v51, %v3870_v58  ;;  %v2759_v23 = vpop.f32.mrb[87].mxu1 }
 0x808   :  { %v2813_v3 = vpack.c.bf16 %v2759_v23, %v2756_v50 }
 0x80a   :  { %3916 = vmatprep.mubr.bf16.mxu0 %v2813_v3 }
 0x80b   :  { %3917 = vmatmul.mubr.bf16.gmra.mrb[84].mxu0 %v2814_v30 }
 0x80c   :  { %v3874_v5 = vpop.f32.mrb[88].mxu1 }
 0x80d   :  { %v2772_v55 = vpop.f32.mrb[89].mxu1 }
 0x80e   :  { %v3875_v52 = vpop.f32.mrb[90].mxu1 }
 0x80f   :  { %v2816_v14 = vpack.c.bf16 %v3875_v52, %v3874_v5  ;;  %v2775_v19 = vpop.f32.mrb[91].mxu1 }
 0x810   :  { %v2815_v16 = vpack.c.bf16 %v2775_v19, %v2772_v55 }
 0x812   :  { %3920 = vmatprep.mubr.bf16.mxu0 %v2815_v16 }
 0x813   :  { %3921 = vmatmul.mubr.bf16.gmra.mrb[88].mxu0 %v2816_v14 }
 0x814   :  { %v3878_v24 = vpop.f32.mrb[92].mxu1 }
 0x815   :  { %v2788_v63 = vpop.f32.mrb[93].mxu1 }
 0x816   :  { %v3879_v11 = vpop.f32.mrb[94].mxu1 }
 0x817   :  { %v2818_v38 = vpack.c.bf16 %v3879_v11, %v3878_v24  ;;  %v2791_v37 = vpop.f32.mrb[95].mxu1 }
 0x818   :  { %v2817_v12 = vpack.c.bf16 %v2791_v37, %v2788_v63 }
 0x81a   :  { %3924 = vmatprep.mubr.bf16.mxu0 %v2817_v12 }
 0x81b   :  { %3925 = vmatmul.mubr.bf16.gmra.mrb[92].mxu0 %v2818_v38 }
 0x8b6   :  { %v3898_v10 = vpop.f32.mrb[64].mxu0 }
 0x8b7   :  { %v2901_v13 = vpop.f32.mrb[65].mxu0 }
 0x8b8   :  { %v3899_v35 = vpop.f32.mrb[66].mxu0  ;;  %v3034_v39 = vadd.f32 %v3423_v26, %v2901_v13 }
 0x8b9   :  { %v2904_v56 = vpop.f32.mrb[67].mxu0 }
 0x8ba   :  { %v3035_v7 = vadd.f32 %v3423_v26, %v2904_v56  ;;  %v3066_v42 = vmul.f32 %v3034_v39, %v3034_v39 }
 0x8bc   :  { %v3067_v2 = vmul.f32 %v3035_v7, %v3035_v7 }
 0x8be   :  { %v3902_v21 = vpop.f32.mrb[68].mxu0 }
 0x8bf   :  { %v2917_v15 = vpop.f32.mrb[69].mxu0 }
 0x8c0   :  { %v3903_v61 = vpop.f32.mrb[70].mxu0 }
 0x8c1   :  { %v2920_v47 = vpop.f32.mrb[71].mxu0 }
 0x8c6   :  { %v3906_v0 = vpop.f32.mrb[72].mxu0 }
 0x8c7   :  { %v2933_v4 = vpop.f32.mrb[73].mxu0 }
 0x8c8   :  { %v3907_v48 = vpop.f32.mrb[74].mxu0 }
 0x8c9   :  { %v2936_v6 = vpop.f32.mrb[75].mxu0 }
 0x8ce   :  { %v3910_v59 = vpop.f32.mrb[76].mxu0 }
 0x8cf   :  { %v2949_v40 = vpop.f32.mrb[77].mxu0 }
 0x8d0   :  { %v3911_v34 = vpop.f32.mrb[78].mxu0 }
 0x8d1   :  { %v2952_v29 = vpop.f32.mrb[79].mxu0 }
 0x8d6   :  { %v3914_v43 = vpop.f32.mrb[80].mxu0 }
 0x8d7   :  { %v2965_v32 = vpop.f32.mrb[81].mxu0 }
 0x8d8   :  { %v3050_v20 = vadd.f32 %v3423_v26, %v2965_v32  ;;  %v3915_v9 = vpop.f32.mrb[82].mxu0 }
 0x8d9   :  { %v2968_v27 = vpop.f32.mrb[83].mxu0 }
 0x8da   :  { %v3082_v18 = vmul.f32 %v3050_v20, %v3050_v20  ;;  %v3051_v22 = vadd.f32 %v3423_v26, %v2968_v27 }
 0x8dc   :  { %v3083_v41 = vmul.f32 %v3051_v22, %v3051_v22  ;;  %3130 = vadd.xlane.f32.xlu0 %v3082_v18 }
 0x8de   :  { %3132 = vadd.xlane.f32.xlu1 %v3083_v41  ;;  %v3918_v54 = vpop.f32.mrb[84].mxu0 }
 0x8df   :  { %v2981_v62 = vpop.f32.mrb[85].mxu0 }
 0x8e0   :  { %3098 = vadd.xlane.f32.xlu0 %v3066_v42  ;;  %v3919_v53 = vpop.f32.mrb[86].mxu0 }
 0x8e1   :  { %v2984_v31 = vpop.f32.mrb[87].mxu0 }
 0x8e2   :  { %3100 = vadd.xlane.f32.xlu1 %v3067_v2 }
 0x8e6   :  { %v3922_v1 = vpop.f32.mrb[88].mxu0 }
 0x8e7   :  { %v2997_v57 = vpop.f32.mrb[89].mxu0 }
 0x8e8   :  { %v3923_v46 = vpop.f32.mrb[90].mxu0 }
 0x8e9   :  { %v3000_v45 = vpop.f32.mrb[91].mxu0 }
 0x8ee   :  { %v3926_v28 = vpop.f32.mrb[92].mxu0 }
 0x8ef   :  { %v3013_v44 = vpop.f32.mrb[93].mxu0 }
 0x8f0   :  { %v3927_v33 = vpop.f32.mrb[94].mxu0 }
 0x8f1   :  { %v3016_v25 = vpop.f32.mrb[95].mxu0 }
 0x969   :  { %v3131_v36 = vpop.xlane.xlu0 %3130 }
 0x96a   :  { %v3178_v17 = vmax.f32 %v3131_v36, 1e-24 }
 0x96b   :  { %v3133_v60 = vpop.xlane.xlu1 %3132 }
 0x96c   :  { %4182 = vrsqrt.f32 %v3178_v17  ;;  %v3179_v49 = vmax.f32 %v3133_v60, 1e-24 }
 0x96d   :  { %v3099_v58 = vpop.xlane.xlu0 %3098 }
 0x96e   :  { %4184 = vrsqrt.f32 %v3179_v49  ;;  %v3162_v50 = vmax.f32 %v3099_v58, 1e-24 }
 0x96f   :  { %v3101_v51 = vpop.xlane.xlu1 %3100 }
 0x970   :  { %4186 = vrsqrt.f32 %v3162_v50  ;;  %v3163_v30 = vmax.f32 %v3101_v51, 1e-24 }
 0x972   :  { %4188 = vrsqrt.f32 %v3163_v30 }
 0x976   :  { %v4183_v23 = vpop.eup %4182 }
 0x977   :  { %v3242_v3 = vmul.f32 %v4183_v23, %v3050_v20 }
 0x978   :  { %v4185_v5 = vpop.eup %4184 }
 0x979   :  { %v3311_v55 = vmax.f32 %v3242_v3, -1e+30  ;;  %v3243_v52 = vmul.f32 %v4185_v5, %v3051_v22 }
 0x97a   :  { %v4187_v14 = vpop.eup %4186 }
 0x97b   :  { %v3313_v19 = vmax.f32 %v3311_v55, -1e+30  ;;  %v3312_v16 = vmax.f32 %v3243_v52, -1e+30  ;;  %v3226_v24 = vmul.f32 %v4187_v14, %v3034_v39 }
 0x97c   :  { %v4189_v63 = vpop.eup %4188 }
 0x97d   :  { %v3315_v11 = vmax.f32 %v3313_v19, -1e+30  ;;  %v3314_v38 = vmax.f32 %v3312_v16, -1e+30  ;;  %v3290_v37 = vmax.f32 %v3226_v24, -1e+30  ;;  %v3227_v12 = vmul.f32 %v4189_v63, %v3035_v7 }
 0x97f   :  { %v3317_v10 = vmax.f32 %v3315_v11, -1e+30  ;;  %v3316_v13 = vmax.f32 %v3314_v38, -1e+30  ;;  %v3292_v35 = vmax.f32 %v3290_v37, -1e+30 }
 0x980   :  { %v3291_v56 = vmax.f32 %v3227_v12, -1e+30 }
 0x981   :  { %v3319_v21 = vmax.f32 %v3317_v10, -1e+30  ;;  %v3318_v15 = vmax.f32 %v3316_v13, -1e+30  ;;  %v3294_v61 = vmax.f32 %v3292_v35, -1e+30 }
 0x982   :  { %v3293_v47 = vmax.f32 %v3291_v56, -1e+30 }
 0x983   :  { %v3321_v0 = vmax.f32 %v3319_v21, -1e+30  ;;  %v3320_v4 = vmax.f32 %v3318_v15, -1e+30  ;;  %v3296_v48 = vmax.f32 %v3294_v61, -1e+30 }
 0x984   :  { %v3295_v6 = vmax.f32 %v3293_v47, -1e+30 }
 0x985   :  { %v3322_v59 = vmax.f32 %v3320_v4, -1e+30  ;;  %v3298_v40 = vmax.f32 %v3296_v48, -1e+30  ;;  %v3323_v29 = vmax.f32 %v3321_v0, -1e+30 }
 0x986   :  { %v3297_v34 = vmax.f32 %v3295_v6, -1e+30 }
 0x987   :  { %v3324_v43 = vmax.f32 %v3322_v59, -1e+30  ;;  %v3300_v26 = vmax.f32 %v3298_v40, -1e+30 }
 0x988   :  { %v3299_v32 = vmax.f32 %v3297_v34, -1e+30 }
 0x989   :  { %v3325_v20 = vmax.f32 %v3323_v29, %v3324_v43  ;;  %v3302_v39 = vmax.f32 %v3300_v26, -1e+30 }
 0x98a   :  { %v3301_v9 = vmax.f32 %v3299_v32, -1e+30 }
 0x98b   :  { %v3326_v27 = vrot.slane %v3325_v20, 4 }
 0x98c   :  { %v3303_v18 = vmax.f32 %v3301_v9, -1e+30 }
 0x98d   :  { %v3327_v22 = vmax.f32 %v3325_v20, %v3326_v27 }
 0x98e   :  { %v3304_v7 = vmax.f32 %v3302_v39, %v3303_v18 }
 0x98f   :  { %v3328_v41 = vrot.slane %v3327_v22, 2 }
 0x990   :  { %v3305_v42 = vrot.slane %v3304_v7, 4 }
 0x991   :  { %v3329_v54 = vmax.f32 %v3327_v22, %v3328_v41 }
 0x992   :  { %v3306_v62 = vmax.f32 %v3304_v7, %v3305_v42 }
 0x993   :  { %v3330_v2 = vrot.slane %v3329_v54, 1 }
 0x994   :  { %v3307_v53 = vrot.slane %v3306_v62, 2 }
 0x995   :  { %v3331_v31 = vmax.f32 %v3329_v54, %v3330_v2 }
 0x996   :  { %v3308_v1 = vmax.f32 %v3306_v62, %v3307_v53 }
 0x997   :  { %v3347_v57 = vrot.slane %v3331_v31, %v4902_v8 }
 0x998   :  { %v3309_v46 = vrot.slane %v3308_v1, 1 }
 0x999   :  { %v3350_v28 = vrot.slane %v3347_v57, 7 }
 0x99a   :  { %v3310_v45 = vmax.f32 %v3308_v1, %v3309_v46 }
 0x99c   :  { %v3340_v44 = vrot.slane %v3310_v45, %v4902_v8 }
 0x99e   :  { %v3351_v33 = vsel %vm1461_vm0, %v3350_v28, %v3340_v44 }
 0x99f   :  { %v3352_v25 = vsel %vm1463_vm1, %v3350_v28, %v3351_v33 }
 0x9a0   :  { %v3353_v36 = vsel %vm1465_vm2, %v3350_v28, %v3352_v25 }
 0x9a1   :  { %v3354_v17 = vsel %vm1467_vm3, %v3350_v28, %v3353_v36 }
 0x9a2   :  { %3356 = vst [vmem:[%s5567_s4 + $0x4] sm:$0x3] %v3354_v17 }
 0x9a3   :  { %3361 = vsyncpa [#allocation3], 1 }
 0x9a4   :  { %3362 = vsyncpa [#allocation5], 1 }

</bundles_post_ra>
